<compile_context>
chip_gen: v7x
topology: tpu7x:2x2x1
jax: 0.10.0
libtpu: 0.0.40
codegen_flags: <defaults>
</compile_context>

<pallas_src>
import functools

import jax
import jax.numpy as jnp
from jax import lax
from jax.experimental import pallas as pl
from jax.experimental.pallas import tpu as pltpu


def _resblock_kernel(x_ref, w1_ref, w2_ref, o_ref, pad_ref, *, res_scale):
    # Shapes seen by the kernel:
    #   x_ref  : (1, H, W, C)   input tile (also the residual branch)
    #   w1_ref : (9*C, C)       conv1 weights, rows ordered (dy, dx, c_in)
    #   w2_ref : (9*C, C)       conv2 weights
    #   o_ref  : (1, H, W, C)   output tile
    #   pad_ref: (H+2, W+2, C)  zero-border scratch shared by both convs
    _, H, W, C = x_ref.shape

    # Zero only the 1-px border; the interior is fully overwritten below and
    # the border is never written anywhere else.  Done every iteration (a few
    # thin stores) so it is correct even when the "parallel" batch axis is
    # split across TensorCores and a core never runs grid step 0.
    zrow = jnp.zeros((1, W + 2, C), pad_ref.dtype)
    zcol = jnp.zeros((H + 2, 1, C), pad_ref.dtype)
    pad_ref[0:1, :, :] = zrow
    pad_ref[H + 1:H + 2, :, :] = zrow
    pad_ref[:, 0:1, :] = zcol
    pad_ref[:, W + 1:W + 2, :] = zcol

    def conv3x3(w_flat):
        # im2col along the channel (lane) axis: concat the 9 shifted taps into
        # an (H, W, 9C) slab and do a single MXU matmul with K = 9C.  The
        # leading (H, W) dims are collapsed by the compiler; lane density of
        # the LHS scales with 9*C instead of C.
        taps = [pad_ref[dy:dy + H, dx:dx + W, :]
                for dy in range(3) for dx in range(3)]
        col = jnp.concatenate(taps, axis=-1)                   # (H, W, 9C)
        return jnp.dot(col, w_flat, preferred_element_type=jnp.float32)

    # ---- conv1: stage x into the padded interior, one matmul, ReLU in f32 ----
    pad_ref[1:H + 1, 1:W + 1, :] = x_ref[0]
    h1 = jnp.maximum(conv3x3(w1_ref[...]), 0.0)                # (H, W, C) f32

    # ---- conv2: reuse the same scratch (border still zero) for relu(conv1) ----
    pad_ref[1:H + 1, 1:W + 1, :] = h1.astype(pad_ref.dtype)
    y2 = conv3x3(w2_ref[...])                                  # (H, W, C) f32

    # ---- residual epilogue in f32: res = body(x) * res_scale + x ----
    res = y2 * jnp.float32(res_scale) + x_ref[0].astype(jnp.float32)
    # NOTE: last-dim C < 128 at toy shapes means masked writeback; real EDSR
    # channel counts (>=128 per tile) make this store lane-dense.
    o_ref[0] = res.astype(o_ref.dtype)


def resblock_pallas(x_nchw, w1_hwio, w2_hwio, res_scale=0.1):
    """x_nchw: (N, C, H, W) like PyTorch. Returns (N, C, H, W)."""
    N, C, H, W = x_nchw.shape
    x = jnp.transpose(x_nchw, (0, 2, 3, 1))                    # NHWC

    # Flatten weights to MXU-ready (9*C_in, C_out) slabs, rows in (dy, dx, cin)
    # order to match the kernel's im2col channel ordering.
    w1f = w1_hwio.reshape(9 * C, C)
    w2f = w2_hwio.reshape(9 * C, C)

    kernel = functools.partial(_resblock_kernel, res_scale=res_scale)

    out = pl.pallas_call(
        kernel,
        out_shape=jax.ShapeDtypeStruct((N, H, W, C), x.dtype),
        grid_spec=pltpu.PrefetchScalarGridSpec(
            num_scalar_prefetch=0,
            grid=(N,),
            in_specs=[
                pl.BlockSpec((1, H, W, C), lambda n: (n, 0, 0, 0)),
                pl.BlockSpec((9 * C, C), lambda n: (0, 0)),
                pl.BlockSpec((9 * C, C), lambda n: (0, 0)),
            ],
            out_specs=pl.BlockSpec((1, H, W, C), lambda n: (n, 0, 0, 0)),
            scratch_shapes=[pltpu.VMEM((H + 2, W + 2, C), x.dtype)],
        ),
        compiler_params=pltpu.CompilerParams(
            dimension_semantics=("parallel",),
            vmem_limit_bytes=48 * 1024 * 1024),
    )(x, w1f, w2f)

    return jnp.transpose(out, (0, 3, 1, 2))                    # back to NCHW


def resblock_reference(x_nchw, w1_hwio, w2_hwio, res_scale=0.1):
    """Pure-JAX reference (lax.conv) for correctness checking."""
    x = jnp.transpose(x_nchw, (0, 2, 3, 1)).astype(jnp.float32)
    dn = lax.conv_dimension_numbers(x.shape, w1_hwio.shape, ("NHWC", "HWIO", "NHWC"))
    h = lax.conv_general_dilated(x, w1_hwio.astype(jnp.float32), (1, 1), "SAME",
                                 dimension_numbers=dn)
    h = jnp.maximum(h, 0.0)
    h = lax.conv_general_dilated(h, w2_hwio.astype(jnp.float32), (1, 1), "SAME",
                                 dimension_numbers=dn)
    res = h * res_scale + x
    return jnp.transpose(res, (0, 3, 1, 2)).astype(x_nchw.dtype)


if __name__ == "__main__":
    # Small shapes consistent with the module: batch=2, channels=4, spatial=16.
    N, C, H, W = 2, 4, 16, 16
    res_scale = 0.1

    key = jax.random.PRNGKey(0)
    kx, k1, k2 = jax.random.split(key, 3)

    x = jax.random.normal(kx, (N, C, H, W), jnp.float32)
    # Deterministic synthetic weights, shape (3, 3, C_in, C_out); ~kaiming fan-in scale.
    fan_in = 3 * 3 * C
    w1 = jax.random.normal(k1, (3, 3, C, C), jnp.float32) * (2.0 / fan_in) ** 0.5
    w2 = jax.random.normal(k2, (3, 3, C, C), jnp.float32) * (2.0 / fan_in) ** 0.5

    out = resblock_pallas(x, w1, w2, res_scale)
    out = jax.block_until_ready(out)

    ref = resblock_reference(x, w1, w2, res_scale)
    assert out.shape == (N, C, H, W)
    assert jnp.allclose(out, ref, atol=1e-4, rtol=1e-4), "mismatch vs reference"

    print("KERNEL_OK")
</pallas_src>

<mosaic_0001>
module attributes {stable_mosaic.version = 11 : i64} {
  func.func @_resblock_kernel(%arg0: i32, %arg1: memref<1x16x16x4xf32, #tpu.memory_space<vmem>>, %arg2: memref<36x4xf32, #tpu.memory_space<vmem>>, %arg3: memref<36x4xf32, #tpu.memory_space<vmem>>, %arg4: memref<1x16x16x4xf32, #tpu.memory_space<vmem>>, %arg5: memref<18x18x4xf32, #tpu.memory_space<vmem>>) attributes {dimension_semantics = [#tpu.dimension_semantics<parallel>], iteration_bounds = array<i64: 2>, scalar_prefetch = 0 : i64, scratch_operands = 1 : i64, tpu.core_type = #tpu.core_type<tc>, window_params = [{transform_indices = @transform_0, window_bounds = array<i64: 1, 16, 16, 4>}, {pipeline_mode = #tpu.pipeline_mode<synchronous>, transform_indices = @transform_1, window_bounds = array<i64: 36, 4>}, {pipeline_mode = #tpu.pipeline_mode<synchronous>, transform_indices = @transform_2, window_bounds = array<i64: 36, 4>}, {transform_indices = @transform_3, window_bounds = array<i64: 1, 16, 16, 4>}]} {
    %cst = arith.constant 0.000000e+00 : f32
    %0 = vector.broadcast %cst : f32 to vector<1x18x4xf32>
    %cst_0 = arith.constant 0.000000e+00 : f32
    %1 = vector.broadcast %cst_0 : f32 to vector<18x1x4xf32>
    %c0 = arith.constant 0 : index
    %c0_1 = arith.constant 0 : index
    %c0_2 = arith.constant 0 : index
    %2 = vector.load %arg5[%c0, %c0_1, %c0_2] : memref<18x18x4xf32, #tpu.memory_space<vmem>>, vector<1x18x4xf32>
    tpu.vector_store %arg5[%c0, %c0_1, %c0_2], %0 {strides = array<i32>} : memref<18x18x4xf32, #tpu.memory_space<vmem>>, vector<1x18x4xf32>,
    %c17 = arith.constant 17 : index
    %c0_3 = arith.constant 0 : index
    %c0_4 = arith.constant 0 : index
    %3 = vector.load %arg5[%c17, %c0_3, %c0_4] : memref<18x18x4xf32, #tpu.memory_space<vmem>>, vector<1x18x4xf32>
    tpu.vector_store %arg5[%c17, %c0_3, %c0_4], %0 {strides = array<i32>} : memref<18x18x4xf32, #tpu.memory_space<vmem>>, vector<1x18x4xf32>,
    %c0_5 = arith.constant 0 : index
    %c0_6 = arith.constant 0 : index
    %c0_7 = arith.constant 0 : index
    %4 = vector.load %arg5[%c0_5, %c0_6, %c0_7] : memref<18x18x4xf32, #tpu.memory_space<vmem>>, vector<18x1x4xf32>
    tpu.vector_store %arg5[%c0_5, %c0_6, %c0_7], %1 {strides = array<i32>} : memref<18x18x4xf32, #tpu.memory_space<vmem>>, vector<18x1x4xf32>,
    %c0_8 = arith.constant 0 : index
    %c17_9 = arith.constant 17 : index
    %c0_10 = arith.constant 0 : index
    %5 = vector.load %arg5[%c0_8, %c17_9, %c0_10] : memref<18x18x4xf32, #tpu.memory_space<vmem>>, vector<18x1x4xf32>
    tpu.vector_store %arg5[%c0_8, %c17_9, %c0_10], %1 {strides = array<i32>} : memref<18x18x4xf32, #tpu.memory_space<vmem>>, vector<18x1x4xf32>,
    %c0_11 = arith.constant 0 : index
    %c0_12 = arith.constant 0 : index
    %c0_13 = arith.constant 0 : index
    %c0_14 = arith.constant 0 : index
    %6 = vector.load %arg1[%c0_11, %c0_12, %c0_13, %c0_14] : memref<1x16x16x4xf32, #tpu.memory_space<vmem>>, vector<1x16x16x4xf32>
    %7 = vector.shape_cast %6 : vector<1x16x16x4xf32> to vector<16x16x4xf32>
    %c1 = arith.constant 1 : index
    %c1_15 = arith.constant 1 : index
    %c0_16 = arith.constant 0 : index
    %8 = vector.load %arg5[%c1, %c1_15, %c0_16] : memref<18x18x4xf32, #tpu.memory_space<vmem>>, vector<16x16x4xf32>
    tpu.vector_store %arg5[%c1, %c1_15, %c0_16], %7 {strides = array<i32>} : memref<18x18x4xf32, #tpu.memory_space<vmem>>, vector<16x16x4xf32>,
    %c0_17 = arith.constant 0 : index
    %c0_18 = arith.constant 0 : index
    %9 = vector.load %arg2[%c0_17, %c0_18] : memref<36x4xf32, #tpu.memory_space<vmem>>, vector<36x4xf32>
    %c0_19 = arith.constant 0 : index
    %c0_20 = arith.constant 0 : index
    %c0_21 = arith.constant 0 : index
    %10 = vector.load %arg5[%c0_19, %c0_20, %c0_21] : memref<18x18x4xf32, #tpu.memory_space<vmem>>, vector<16x16x4xf32>
    %c0_22 = arith.constant 0 : index
    %c1_23 = arith.constant 1 : index
    %c0_24 = arith.constant 0 : index
    %11 = vector.load %arg5[%c0_22, %c1_23, %c0_24] : memref<18x18x4xf32, #tpu.memory_space<vmem>>, vector<16x16x4xf32>
    %c0_25 = arith.constant 0 : index
    %c2 = arith.constant 2 : index
    %c0_26 = arith.constant 0 : index
    %12 = vector.load %arg5[%c0_25, %c2, %c0_26] : memref<18x18x4xf32, #tpu.memory_space<vmem>>, vector<16x16x4xf32>
    %c1_27 = arith.constant 1 : index
    %c0_28 = arith.constant 0 : index
    %c0_29 = arith.constant 0 : index
    %13 = vector.load %arg5[%c1_27, %c0_28, %c0_29] : memref<18x18x4xf32, #tpu.memory_space<vmem>>, vector<16x16x4xf32>
    %c1_30 = arith.constant 1 : index
    %c1_31 = arith.constant 1 : index
    %c0_32 = arith.constant 0 : index
    %14 = vector.load %arg5[%c1_30, %c1_31, %c0_32] : memref<18x18x4xf32, #tpu.memory_space<vmem>>, vector<16x16x4xf32>
    %c1_33 = arith.constant 1 : index
    %c2_34 = arith.constant 2 : index
    %c0_35 = arith.constant 0 : index
    %15 = vector.load %arg5[%c1_33, %c2_34, %c0_35] : memref<18x18x4xf32, #tpu.memory_space<vmem>>, vector<16x16x4xf32>
    %c2_36 = arith.constant 2 : index
    %c0_37 = arith.constant 0 : index
    %c0_38 = arith.constant 0 : index
    %16 = vector.load %arg5[%c2_36, %c0_37, %c0_38] : memref<18x18x4xf32, #tpu.memory_space<vmem>>, vector<16x16x4xf32>
    %c2_39 = arith.constant 2 : index
    %c1_40 = arith.constant 1 : index
    %c0_41 = arith.constant 0 : index
    %17 = vector.load %arg5[%c2_39, %c1_40, %c0_41] : memref<18x18x4xf32, #tpu.memory_space<vmem>>, vector<16x16x4xf32>
    %c2_42 = arith.constant 2 : index
    %c2_43 = arith.constant 2 : index
    %c0_44 = arith.constant 0 : index
    %18 = vector.load %arg5[%c2_42, %c2_43, %c0_44] : memref<18x18x4xf32, #tpu.memory_space<vmem>>, vector<16x16x4xf32>
    %19 = tpu.concatenate %10, %11, %12, %13, %14, %15, %16, %17, %18 in 2 : vector<16x16x4xf32>, vector<16x16x4xf32>, vector<16x16x4xf32>, vector<16x16x4xf32>, vector<16x16x4xf32>, vector<16x16x4xf32>, vector<16x16x4xf32>, vector<16x16x4xf32>, vector<16x16x4xf32> -> vector<16x16x36xf32>
    %cst_45 = arith.constant dense<0.000000e+00> : vector<16x16x4xf32>
    %20 = tpu.matmul %19, %9, %cst_45 {dimension_numbers = #tpu.dot_dimension_numbers<[2], [0], [0, 1], [1], [0, 0, 0, 1, 1, 1], [], []>} : vector<16x16x36xf32>, vector<36x4xf32>, vector<16x16x4xf32> -> vector<16x16x4xf32>
    %cst_46 = arith.constant 0.000000e+00 : f32
    %21 = vector.broadcast %cst_46 : f32 to vector<16x16x4xf32>
    %22 = arith.maximumf %20, %21 : vector<16x16x4xf32>
    %c1_47 = arith.constant 1 : index
    %c1_48 = arith.constant 1 : index
    %c0_49 = arith.constant 0 : index
    %23 = vector.load %arg5[%c1_47, %c1_48, %c0_49] : memref<18x18x4xf32, #tpu.memory_space<vmem>>, vector<16x16x4xf32>
    tpu.vector_store %arg5[%c1_47, %c1_48, %c0_49], %22 {strides = array<i32>} : memref<18x18x4xf32, #tpu.memory_space<vmem>>, vector<16x16x4xf32>,
    %c0_50 = arith.constant 0 : index
    %c0_51 = arith.constant 0 : index
    %24 = vector.load %arg3[%c0_50, %c0_51] : memref<36x4xf32, #tpu.memory_space<vmem>>, vector<36x4xf32>
    %c0_52 = arith.constant 0 : index
    %c0_53 = arith.constant 0 : index
    %c0_54 = arith.constant 0 : index
    %25 = vector.load %arg5[%c0_52, %c0_53, %c0_54] : memref<18x18x4xf32, #tpu.memory_space<vmem>>, vector<16x16x4xf32>
    %c0_55 = arith.constant 0 : index
    %c1_56 = arith.constant 1 : index
    %c0_57 = arith.constant 0 : index
    %26 = vector.load %arg5[%c0_55, %c1_56, %c0_57] : memref<18x18x4xf32, #tpu.memory_space<vmem>>, vector<16x16x4xf32>
    %c0_58 = arith.constant 0 : index
    %c2_59 = arith.constant 2 : index
    %c0_60 = arith.constant 0 : index
    %27 = vector.load %arg5[%c0_58, %c2_59, %c0_60] : memref<18x18x4xf32, #tpu.memory_space<vmem>>, vector<16x16x4xf32>
    %c1_61 = arith.constant 1 : index
    %c0_62 = arith.constant 0 : index
    %c0_63 = arith.constant 0 : index
    %28 = vector.load %arg5[%c1_61, %c0_62, %c0_63] : memref<18x18x4xf32, #tpu.memory_space<vmem>>, vector<16x16x4xf32>
    %c1_64 = arith.constant 1 : index
    %c1_65 = arith.constant 1 : index
    %c0_66 = arith.constant 0 : index
    %29 = vector.load %arg5[%c1_64, %c1_65, %c0_66] : memref<18x18x4xf32, #tpu.memory_space<vmem>>, vector<16x16x4xf32>
    %c1_67 = arith.constant 1 : index
    %c2_68 = arith.constant 2 : index
    %c0_69 = arith.constant 0 : index
    %30 = vector.load %arg5[%c1_67, %c2_68, %c0_69] : memref<18x18x4xf32, #tpu.memory_space<vmem>>, vector<16x16x4xf32>
    %c2_70 = arith.constant 2 : index
    %c0_71 = arith.constant 0 : index
    %c0_72 = arith.constant 0 : index
    %31 = vector.load %arg5[%c2_70, %c0_71, %c0_72] : memref<18x18x4xf32, #tpu.memory_space<vmem>>, vector<16x16x4xf32>
    %c2_73 = arith.constant 2 : index
    %c1_74 = arith.constant 1 : index
    %c0_75 = arith.constant 0 : index
    %32 = vector.load %arg5[%c2_73, %c1_74, %c0_75] : memref<18x18x4xf32, #tpu.memory_space<vmem>>, vector<16x16x4xf32>
    %c2_76 = arith.constant 2 : index
    %c2_77 = arith.constant 2 : index
    %c0_78 = arith.constant 0 : index
    %33 = vector.load %arg5[%c2_76, %c2_77, %c0_78] : memref<18x18x4xf32, #tpu.memory_space<vmem>>, vector<16x16x4xf32>
    %34 = tpu.concatenate %25, %26, %27, %28, %29, %30, %31, %32, %33 in 2 : vector<16x16x4xf32>, vector<16x16x4xf32>, vector<16x16x4xf32>, vector<16x16x4xf32>, vector<16x16x4xf32>, vector<16x16x4xf32>, vector<16x16x4xf32>, vector<16x16x4xf32>, vector<16x16x4xf32> -> vector<16x16x36xf32>
    %cst_79 = arith.constant dense<0.000000e+00> : vector<16x16x4xf32>
    %35 = tpu.matmul %34, %24, %cst_79 {dimension_numbers = #tpu.dot_dimension_numbers<[2], [0], [0, 1], [1], [0, 0, 0, 1, 1, 1], [], []>} : vector<16x16x36xf32>, vector<36x4xf32>, vector<16x16x4xf32> -> vector<16x16x4xf32>
    %cst_80 = arith.constant 1.000000e-01 : f32
    %36 = vector.broadcast %cst_80 : f32 to vector<16x16x4xf32>
    %37 = arith.mulf %35, %36 : vector<16x16x4xf32>
    %c0_81 = arith.constant 0 : index
    %c0_82 = arith.constant 0 : index
    %c0_83 = arith.constant 0 : index
    %c0_84 = arith.constant 0 : index
    %38 = vector.load %arg1[%c0_81, %c0_82, %c0_83, %c0_84] : memref<1x16x16x4xf32, #tpu.memory_space<vmem>>, vector<1x16x16x4xf32>
    %39 = vector.shape_cast %38 : vector<1x16x16x4xf32> to vector<16x16x4xf32>
    %40 = arith.addf %37, %39 : vector<16x16x4xf32>
    %c0_85 = arith.constant 0 : index
    %c0_86 = arith.constant 0 : index
    %c0_87 = arith.constant 0 : index
    %c0_88 = arith.constant 0 : index
    %41 = vector.load %arg4[%c0_85, %c0_86, %c0_87, %c0_88] : memref<1x16x16x4xf32, #tpu.memory_space<vmem>>, vector<1x16x16x4xf32>
    %42 = vector.shape_cast %41 : vector<1x16x16x4xf32> to vector<16x16x4xf32>
    %43 = vector.shape_cast %40 : vector<16x16x4xf32> to vector<1x16x16x4xf32>
    tpu.vector_store %arg4[%c0_85, %c0_86, %c0_87, %c0_88], %43 {strides = array<i32>} : memref<1x16x16x4xf32, #tpu.memory_space<vmem>>, vector<1x16x16x4xf32>,
    return
  }
  func.func @transform_0(%arg0: i32) -> (i32, i32, i32, i32) {
    %c0_i32 = arith.constant 0 : i32
    %c0_i32_0 = arith.constant 0 : i32
    %c0_i32_1 = arith.constant 0 : i32
    %c0_i32_2 = arith.constant 0 : i32
    return %arg0, %c0_i32, %c0_i32_0, %c0_i32_1 : i32, i32, i32, i32
  }
  func.func @transform_1(%arg0: i32) -> (i32, i32) {
    %c0_i32 = arith.constant 0 : i32
    %c0_i32_0 = arith.constant 0 : i32
    %c0_i32_1 = arith.constant 0 : i32
    return %c0_i32, %c0_i32_0 : i32, i32
  }
  func.func @transform_2(%arg0: i32) -> (i32, i32) {
    %c0_i32 = arith.constant 0 : i32
    %c0_i32_0 = arith.constant 0 : i32
    %c0_i32_1 = arith.constant 0 : i32
    return %c0_i32, %c0_i32_0 : i32, i32
  }
  func.func @transform_3(%arg0: i32) -> (i32, i32, i32, i32) {
    %c0_i32 = arith.constant 0 : i32
    %c0_i32_0 = arith.constant 0 : i32
    %c0_i32_1 = arith.constant 0 : i32
    %c0_i32_2 = arith.constant 0 : i32
    return %arg0, %c0_i32, %c0_i32_0, %c0_i32_1 : i32, i32, i32, i32
  }
}

</mosaic_0001>

<bundles_post_ra>
// kernel: tpu_custom_call.1
= control target key start
LH: loop header
LB: loop body
LE: loop exit
PB: predicated region body
PF: predicated region fallthrough
CT: control target
= control target key end

     0   :  { %s4705_s12 = smov 0   ;;  %s7600_s0 = inlined_call_operand.vmem [shape: f32[2,16,16,4], index: 0, kind: input, shape index: {}]   ;;  %s7601_s1 = inlined_call_operand.vmem [shape: f32[36,4], index: 1, kind: input, shape index: {}]   ;;  %s7602_s2 = inlined_call_operand.vmem [shape: f32[36,4], index: 2, kind: input, shape index: {}]   ;;  %s7603_s3 = inlined_call_operand.vmem [shape: f32[2,16,16,4], index: 3, kind: output, shape index: {}]  }
   0x1 LB: > { %s4333_s13 = sadd.s32 4294967295, %s4674_s12   ;;  %p4337_p0 = scmp.ge.s32.totalorder %s4674_s12, 1  ;;  %s4674_s12 = sphi %s4705_s12, %s13_s12  }
   0x2   : > { %p137_p1 = scmp.lt.s32.totalorder %s4674_s12, 3 }
   0x4   : > { %p138_p2 = pnand %p4337_p0, %p137_p1 }
   0x6   : > { %141 = sbr.rel (%p138_p2) target bundleno = 1665 (0x681), region = 32 }
   0xd   : > { %vm171_vm0 = vcmask 31744   ;;  %vm174_vm1 = vcmask 25600   ;;  %p4715_p3 = scmp.lt.s32.totalorder %s4333_s13, 1  ;;  %vm180_vm2 = vcmask 24576   ;;  %v4676_v0 = vmov 0.0   ;;  %s4677_s19 = smov 4  }
   0xe   : > { %172 = vst.msk [vmem:[#allocation2] sm:$0xff] %vm171_vm0, %v4676_v0  ;;  %173 = vst.msk [vmem:[#allocation2 + $0x8] sm:$0xff] %vm171_vm0, %v4676_v0  ;;  %s4678_s20 = smov 8   ;;  %s4679_s21 = smov 12   ;;  %vm1960_vm3 = vcmask 1043456   ;;  %vm1632_vm4 = vcmask 64512  }
   0xf   : > { %177 = vst.msk [vmem:[#allocation2 + $0x198] sm:$0xff] %vm171_vm0, %v4676_v0  ;;  %178 = vst.msk [vmem:[#allocation2 + $0x1a0] sm:$0xff] %vm171_vm0, %v4676_v0  ;;  %s8145_s13 = smov (!%p4715_p3, %s4333_s13), 1  ;;  %s4680_s22 = smov 16   ;;  %vm1665_vm5 = vcmask 97280   ;;  %vm1698_vm6 = vcmask 130048  }
  0x10   : > { %175 = vst.msk [vmem:[#allocation2 + $0x10] sm:$0x3] %vm174_vm1, %v4676_v0  ;;  %179 = vst.msk [vmem:[#allocation2 + $0x1a8] sm:$0x3] %vm174_vm1, %v4676_v0  ;;  %s4410_s15 = sshll.u32 %s8145_s13, 8  ;;  %s4681_s23 = smov 20  }
  0x11   : > { %182 = vst.msk [vmem:[#allocation2 + $0x18] sm:$0x1] %vm180_vm2, %v4676_v0  ;;  %183 = vst.msk [vmem:[#allocation2 + $0x30] sm:$0x1] %vm180_vm2, %v4676_v0  ;;  %s4771_s18 = scalar_lea.vmem %s7600_s0, %s4410_s15  ;;  %s4682_s24 = smov 24   ;;  %vm1731_vm7 = vcmask 162816  }
  0x12   : > { %184 = vst.msk [vmem:[#allocation2 + $0x48] sm:$0x1] %vm180_vm2, %v4676_v0  ;;  %185 = vst.msk [vmem:[#allocation2 + $0x60] sm:$0x1] %vm180_vm2, %v4676_v0  ;;  %v217_v1 = vld [vmem:[%s4771_s18] sm:$0xff]  ;;  %v219_v2 = vld [vmem:[%s4771_s18 + $0x10] sm:$0xff] }
  0x13   : > { %186 = vst.msk [vmem:[#allocation2 + $0x78] sm:$0x1] %vm180_vm2, %v4676_v0  ;;  %187 = vst.msk [vmem:[#allocation2 + $0x90] sm:$0x1] %vm180_vm2, %v4676_v0  ;;  %v218_v3 = vld [vmem:[%s4771_s18 + $0x8] sm:$0xff]  ;;  %v221_v4 = vld [vmem:[%s4771_s18 + $0x20] sm:$0xff] }
  0x14   : > { %188 = vst.msk [vmem:[#allocation2 + $0xa8] sm:$0x1] %vm180_vm2, %v4676_v0  ;;  %189 = vst.msk [vmem:[#allocation2 + $0xc0] sm:$0x1] %vm180_vm2, %v4676_v0  ;;  %v220_v5 = vld [vmem:[%s4771_s18 + $0x18] sm:$0xff]  ;;  %v223_v6 = vld [vmem:[%s4771_s18 + $0x30] sm:$0xff] }
  0x15   : > { %190 = vst.msk [vmem:[#allocation2 + $0xd8] sm:$0x1] %vm180_vm2, %v4676_v0  ;;  %191 = vst.msk [vmem:[#allocation2 + $0xf0] sm:$0x1] %vm180_vm2, %v4676_v0  ;;  %v319_v7 = vld [vmem:[#allocation2 + $0x1] sm:$0xff]  ;;  %v224_v11 = vld [vmem:[%s4771_s18 + $0x38] sm:$0xff] }
  0x16   : > { %192 = vst.msk [vmem:[#allocation2 + $0x108] sm:$0x1] %vm180_vm2, %v4676_v0  ;;  %193 = vst.msk [vmem:[#allocation2 + $0x120] sm:$0x1] %vm180_vm2, %v4676_v0  ;;  %v222_v9 = vld [vmem:[%s4771_s18 + $0x28] sm:$0xff]  ;;  %608 = vrot.lane.b32.xlu0 %v319_v7, %s4677_s19  ;;  %v225_v10 = vld [vmem:[%s4771_s18 + $0x40] sm:$0xff] }
  0x17   : > { %194 = vst.msk [vmem:[#allocation2 + $0x138] sm:$0x1] %vm180_vm2, %v4676_v0  ;;  %195 = vst.msk [vmem:[#allocation2 + $0x150] sm:$0x1] %vm180_vm2, %v4676_v0  ;;  %v320_v8 = vld [vmem:[#allocation2 + $0x9] sm:$0xff]  ;;  %v229_v14 = vld [vmem:[%s4771_s18 + $0x60] sm:$0xff] }
  0x18   : > { %196 = vst.msk [vmem:[#allocation2 + $0x168] sm:$0x1] %vm180_vm2, %v4676_v0  ;;  %197 = vst.msk [vmem:[#allocation2 + $0x180] sm:$0x1] %vm180_vm2, %v4676_v0  ;;  %v227_v12 = vld [vmem:[%s4771_s18 + $0x50] sm:$0xff]  ;;  %v226_v13 = vld [vmem:[%s4771_s18 + $0x48] sm:$0xff] }
  0x19   : > { %200 = vst.msk [vmem:[#allocation2 + $0x29] sm:$0x1] %vm180_vm2, %v4676_v0  ;;  %201 = vst.msk [vmem:[#allocation2 + $0x41] sm:$0x1] %vm180_vm2, %v4676_v0  ;;  %v228_v15 = vld [vmem:[%s4771_s18 + $0x58] sm:$0xff]  ;;  %v231_v16 = vld [vmem:[%s4771_s18 + $0x70] sm:$0xff] }
  0x1a   : > { %202 = vst.msk [vmem:[#allocation2 + $0x59] sm:$0x1] %vm180_vm2, %v4676_v0  ;;  %203 = vst.msk [vmem:[#allocation2 + $0x71] sm:$0x1] %vm180_vm2, %v4676_v0  ;;  %v230_v17 = vld [vmem:[%s4771_s18 + $0x68] sm:$0xff]  ;;  %v233_v18 = vld [vmem:[%s4771_s18 + $0x80] sm:$0xff]  ;;  %610 = vrot.lane.b32.xlu0 %v320_v8, %s4677_s19 }
  0x1b   : > { %204 = vst.msk [vmem:[#allocation2 + $0x89] sm:$0x1] %vm180_vm2, %v4676_v0  ;;  %205 = vst.msk [vmem:[#allocation2 + $0xa1] sm:$0x1] %vm180_vm2, %v4676_v0  ;;  %v232_v19 = vld [vmem:[%s4771_s18 + $0x78] sm:$0xff]  ;;  %v235_v20 = vld [vmem:[%s4771_s18 + $0x90] sm:$0xff] }
  0x1c   : > { %206 = vst.msk [vmem:[#allocation2 + $0xb9] sm:$0x1] %vm180_vm2, %v4676_v0  ;;  %207 = vst.msk [vmem:[#allocation2 + $0xd1] sm:$0x1] %vm180_vm2, %v4676_v0  ;;  %v234_v21 = vld [vmem:[%s4771_s18 + $0x88] sm:$0xff]  ;;  %v237_v22 = vld [vmem:[%s4771_s18 + $0xa0] sm:$0xff] }
  0x1d   : > { %208 = vst.msk [vmem:[#allocation2 + $0xe9] sm:$0x1] %vm180_vm2, %v4676_v0  ;;  %209 = vst.msk [vmem:[#allocation2 + $0x101] sm:$0x1] %vm180_vm2, %v4676_v0  ;;  %v236_v23 = vld [vmem:[%s4771_s18 + $0x98] sm:$0xff]  ;;  %v239_v24 = vld [vmem:[%s4771_s18 + $0xb0] sm:$0xff] }
  0x1e   : > { %210 = vst.msk [vmem:[#allocation2 + $0x119] sm:$0x1] %vm180_vm2, %v4676_v0  ;;  %211 = vst.msk [vmem:[#allocation2 + $0x131] sm:$0x1] %vm180_vm2, %v4676_v0  ;;  %v238_v28 = vld [vmem:[%s4771_s18 + $0xa8] sm:$0xff]  ;;  %v241_v29 = vld [vmem:[%s4771_s18 + $0xc0] sm:$0xff] }
  0x1f   : > { %212 = vst.msk [vmem:[#allocation2 + $0x149] sm:$0x1] %vm180_vm2, %v4676_v0  ;;  %213 = vst.msk [vmem:[#allocation2 + $0x161] sm:$0x1] %vm180_vm2, %v4676_v0  ;;  %v240_v33 = vld [vmem:[%s4771_s18 + $0xb8] sm:$0xff]  ;;  %v243_v34 = vld [vmem:[%s4771_s18 + $0xd0] sm:$0xff] }
  0x20   : > { %214 = vst.msk [vmem:[#allocation2 + $0x179] sm:$0x1] %vm180_vm2, %v4676_v0  ;;  %215 = vst.msk [vmem:[#allocation2 + $0x191] sm:$0x1] %vm180_vm2, %v4676_v0  ;;  %v242_v35 = vld [vmem:[%s4771_s18 + $0xc8] sm:$0xff]  ;;  %v245_v36 = vld [vmem:[%s4771_s18 + $0xe0] sm:$0xff] }
  0x21   : > { %199 = vst.msk [vmem:[#allocation2 + $0x11] sm:$0x1] %vm180_vm2, %v4676_v0  ;;  %181 = vst.msk [vmem:[#allocation2] sm:$0x1] %vm180_vm2, %v4676_v0  ;;  %v244_v37 = vld [vmem:[%s4771_s18 + $0xd8] sm:$0xff]  ;;  %v246_v39 = vld [vmem:[%s4771_s18 + $0xe8] sm:$0xff] }
  0x22   : > { %198 = vst.msk [vmem:[#allocation2 + $0x198] sm:$0x1] %vm180_vm2, %v4676_v0  ;;  %216 = vst.msk [vmem:[#allocation2 + $0x1a9] sm:$0x1] %vm180_vm2, %v4676_v0  ;;  %v247_v58 = vld [vmem:[%s4771_s18 + $0xf0] sm:$0xff]  ;;  %v248_v62 = vld [vmem:[%s4771_s18 + $0xf8] sm:$0xff] }
  0x23   : > { %250 = vst.msk [vmem:[#allocation2 + $0x19] sm:$0xff] %vm171_vm0, %v217_v1  ;;  %252 = vst.msk [vmem:[#allocation2 + $0x31] sm:$0xff] %vm171_vm0, %v219_v2  ;;  %v351_v0 = vld [vmem:[#allocation2 + $0x2] sm:$0xff]  ;;  %s4683_s6 = smov 28   ;;  %s4684_s9 = smov 32   ;;  %vm1764_vm8 = vcmask 195584  }
  0x24   : > { %251 = vst.msk [vmem:[#allocation2 + $0x21] sm:$0xff] %vm171_vm0, %v218_v3  ;;  %254 = vst.msk [vmem:[#allocation2 + $0x49] sm:$0xff] %vm171_vm0, %v221_v4  ;;  %vm1797_vm9 = vcmask 228352   ;;  %vm1830_vm10 = vcmask 261120   ;;  %vm1863_vm11 = vcmask 293888  }
  0x25   : > { %253 = vst.msk [vmem:[#allocation2 + $0x39] sm:$0xff] %vm171_vm0, %v220_v5  ;;  %256 = vst.msk [vmem:[#allocation2 + $0x61] sm:$0xff] %vm171_vm0, %v223_v6 }
  0x26   : > { %255 = vst.msk [vmem:[#allocation2 + $0x51] sm:$0xff] %vm171_vm0, %v222_v9  ;;  %258 = vst.msk [vmem:[#allocation2 + $0x79] sm:$0xff] %vm171_vm0, %v225_v10 }
  0x27   : > { %257 = vst.msk [vmem:[#allocation2 + $0x69] sm:$0xff] %vm171_vm0, %v224_v11  ;;  %260 = vst.msk [vmem:[#allocation2 + $0x91] sm:$0xff] %vm171_vm0, %v227_v12 }
  0x28   : > { %259 = vst.msk [vmem:[#allocation2 + $0x81] sm:$0xff] %vm171_vm0, %v226_v13  ;;  %262 = vst.msk [vmem:[#allocation2 + $0xa9] sm:$0xff] %vm171_vm0, %v229_v14  ;;  %v352_v3 = vld [vmem:[#allocation2 + $0xa] sm:$0xff] }
  0x29   : > { %261 = vst.msk [vmem:[#allocation2 + $0x99] sm:$0xff] %vm171_vm0, %v228_v15  ;;  %264 = vst.msk [vmem:[#allocation2 + $0xc1] sm:$0xff] %vm171_vm0, %v231_v16 }
  0x2a   : > { %263 = vst.msk [vmem:[#allocation2 + $0xb1] sm:$0xff] %vm171_vm0, %v230_v17  ;;  %266 = vst.msk [vmem:[#allocation2 + $0xd9] sm:$0xff] %vm171_vm0, %v233_v18  ;;  %v4816_v25 = vld [vmem:[#allocation2 + $0x19] sm:$0xff]  ;;  %v4818_v26 = vld [vmem:[#allocation2 + $0x31] sm:$0xff] }
  0x2b   : > { %265 = vst.msk [vmem:[#allocation2 + $0xc9] sm:$0xff] %vm171_vm0, %v232_v19  ;;  %268 = vst.msk [vmem:[#allocation2 + $0xf1] sm:$0xff] %vm171_vm0, %v235_v20  ;;  %612 = vrot.lane.b32.xlu1 %v4816_v25, %s4677_s19  ;;  %v4825_v27 = vld [vmem:[#allocation2 + $0x21] sm:$0xff]  ;;  %616 = vrot.lane.b32.xlu0 %v4818_v26, %s4677_s19  ;;  %v4833_v30 = vld [vmem:[#allocation2 + $0x49] sm:$0xff] }
  0x2c   : > { %267 = vst.msk [vmem:[#allocation2 + $0xe1] sm:$0xff] %vm171_vm0, %v234_v21  ;;  %270 = vst.msk [vmem:[#allocation2 + $0x109] sm:$0xff] %vm171_vm0, %v237_v22  ;;  %v4837_v31 = vld [vmem:[#allocation2 + $0x39] sm:$0xff]  ;;  %v4841_v32 = vld [vmem:[#allocation2 + $0x61] sm:$0xff] }
  0x2d   : > { %269 = vst.msk [vmem:[#allocation2 + $0xf9] sm:$0xff] %vm171_vm0, %v236_v23  ;;  %272 = vst.msk [vmem:[#allocation2 + $0x121] sm:$0xff] %vm171_vm0, %v239_v24  ;;  %v4853_v38 = vld [vmem:[#allocation2 + $0x51] sm:$0xff]  ;;  %v4861_v40 = vld [vmem:[#allocation2 + $0x79] sm:$0xff] }
  0x2e   : > { %271 = vst.msk [vmem:[#allocation2 + $0x111] sm:$0xff] %vm171_vm0, %v238_v28  ;;  %274 = vst.msk [vmem:[#allocation2 + $0x139] sm:$0xff] %vm171_vm0, %v241_v29  ;;  %v4865_v41 = vld [vmem:[#allocation2 + $0x69] sm:$0xff]  ;;  %v4869_v42 = vld [vmem:[#allocation2 + $0x91] sm:$0xff] }
  0x2f   : > { %614 = vrot.lane.b32.xlu1 %v4825_v27, %s4677_s19  ;;  %620 = vrot.lane.b32.xlu0 %v4833_v30, %s4677_s19  ;;  %273 = vst.msk [vmem:[#allocation2 + $0x129] sm:$0xff] %vm171_vm0, %v240_v33  ;;  %276 = vst.msk [vmem:[#allocation2 + $0x151] sm:$0xff] %vm171_vm0, %v243_v34  ;;  %v4873_v43 = vld [vmem:[#allocation2 + $0x81] sm:$0xff]  ;;  %v4877_v44 = vld [vmem:[#allocation2 + $0xa9] sm:$0xff] }
  0x30   : > { %275 = vst.msk [vmem:[#allocation2 + $0x141] sm:$0xff] %vm171_vm0, %v242_v35  ;;  %278 = vst.msk [vmem:[#allocation2 + $0x169] sm:$0xff] %vm171_vm0, %v245_v36  ;;  %v4881_v45 = vld [vmem:[#allocation2 + $0x99] sm:$0xff]  ;;  %v4885_v46 = vld [vmem:[#allocation2 + $0xc1] sm:$0xff] }
  0x31   : > { %277 = vst.msk [vmem:[#allocation2 + $0x159] sm:$0xff] %vm171_vm0, %v244_v37  ;;  %279 = vst.msk [vmem:[#allocation2 + $0x171] sm:$0xff] %vm171_vm0, %v246_v39  ;;  %v4889_v47 = vld [vmem:[#allocation2 + $0xb1] sm:$0xff]  ;;  %v4893_v48 = vld [vmem:[#allocation2 + $0xd9] sm:$0xff] }
  0x32   : > { %v4897_v49 = vld [vmem:[#allocation2 + $0xc9] sm:$0xff]  ;;  %v4901_v50 = vld [vmem:[#allocation2 + $0xf1] sm:$0xff]  ;;  %280 = vst.msk [vmem:[#allocation2 + $0x181] sm:$0xff] %vm171_vm0, %v247_v58  ;;  %281 = vst.msk [vmem:[#allocation2 + $0x189] sm:$0xff] %vm171_vm0, %v248_v62 }
  0x33   : > { %618 = vrot.lane.b32.xlu1 %v4837_v31, %s4677_s19  ;;  %624 = vrot.lane.b32.xlu0 %v4841_v32, %s4677_s19  ;;  %v4905_v51 = vld [vmem:[#allocation2 + $0xe1] sm:$0xff]  ;;  %v4909_v52 = vld [vmem:[#allocation2 + $0x109] sm:$0xff]  ;;  %v4964_v4 = vld [vmem:[#allocation2 + $0x32] sm:$0xff] }
  0x34   : > { %v4913_v53 = vld [vmem:[#allocation2 + $0xf9] sm:$0xff]  ;;  %v4917_v54 = vld [vmem:[#allocation2 + $0x121] sm:$0xff]  ;;  %v4971_v6 = vld [vmem:[#allocation2 + $0x4a] sm:$0xff] }
  0x35   : > { %v4921_v55 = vld [vmem:[#allocation2 + $0x111] sm:$0xff]  ;;  %v4925_v56 = vld [vmem:[#allocation2 + $0x139] sm:$0xff]  ;;  %v4967_v5 = vld [vmem:[#allocation2 + $0x22] sm:$0xff] }
  0x36   : > { %v4929_v57 = vld [vmem:[#allocation2 + $0x129] sm:$0xff]  ;;  %v4935_v59 = vld [vmem:[#allocation2 + $0x151] sm:$0xff]  ;;  %v4958_v2 = vld [vmem:[#allocation2 + $0x1a] sm:$0xff] }
  0x37   : > { %622 = vrot.lane.b32.xlu1 %v4853_v38, %s4677_s19  ;;  %628 = vrot.lane.b32.xlu0 %v4861_v40, %s4677_s19  ;;  %v4939_v60 = vld [vmem:[#allocation2 + $0x141] sm:$0xff]  ;;  %v4943_v61 = vld [vmem:[#allocation2 + $0x169] sm:$0xff]  ;;  %v4983_v9 = vld [vmem:[#allocation2 + $0x52] sm:$0xff] }
  0x38   : > { %v4949_v63 = vld [vmem:[#allocation2 + $0x159] sm:$0xff]  ;;  %v4955_v1 = vld [vmem:[#allocation2 + $0x171] sm:$0xff]  ;;  %v4979_v8 = vld [vmem:[#allocation2 + $0x62] sm:$0xff] }
  0x39   : > { %v4975_v7 = vld [vmem:[#allocation2 + $0x3a] sm:$0xff]  ;;  %v4991_v11 = vld [vmem:[#allocation2 + $0x6a] sm:$0xff]  ;;  %v4995_v12 = vld [vmem:[#allocation2 + $0x92] sm:$0xff] }
  0x3a   : > { %v4987_v10 = vld [vmem:[#allocation2 + $0x7a] sm:$0xff]  ;;  %v4999_v13 = vld [vmem:[#allocation2 + $0x82] sm:$0xff]  ;;  %v5003_v14 = vld [vmem:[#allocation2 + $0xaa] sm:$0xff] }
  0x3b   : > { %626 = vrot.lane.b32.xlu1 %v4865_v41, %s4677_s19  ;;  %632 = vrot.lane.b32.xlu0 %v4869_v42, %s4677_s19  ;;  %v5007_v15 = vld [vmem:[#allocation2 + $0x9a] sm:$0xff]  ;;  %v5011_v16 = vld [vmem:[#allocation2 + $0xc2] sm:$0xff]  ;;  %v5015_v17 = vld [vmem:[#allocation2 + $0xb2] sm:$0xff] }
  0x3c   : > { %v5019_v18 = vld [vmem:[#allocation2 + $0xda] sm:$0xff]  ;;  %v5023_v19 = vld [vmem:[#allocation2 + $0xca] sm:$0xff]  ;;  %v5027_v20 = vld [vmem:[#allocation2 + $0xf2] sm:$0xff] }
  0x3d   : > { %v5031_v21 = vld [vmem:[#allocation2 + $0xe2] sm:$0xff]  ;;  %v5035_v22 = vld [vmem:[#allocation2 + $0x10a] sm:$0xff]  ;;  %v5039_v23 = vld [vmem:[#allocation2 + $0xfa] sm:$0xff] }
  0x3e   : > { %v5043_v24 = vld [vmem:[#allocation2 + $0x122] sm:$0xff]  ;;  %v5047_v28 = vld [vmem:[#allocation2 + $0x112] sm:$0xff]  ;;  %v5051_v29 = vld [vmem:[#allocation2 + $0x13a] sm:$0xff] }
  0x3f   : > { %630 = vrot.lane.b32.xlu1 %v4873_v43, %s4677_s19  ;;  %636 = vrot.lane.b32.xlu0 %v4877_v44, %s4677_s19  ;;  %v5057_v34 = vld [vmem:[#allocation2 + $0x12a] sm:$0xff]  ;;  %v5061_v35 = vld [vmem:[#allocation2 + $0x152] sm:$0xff]  ;;  %v5067_v37 = vld [vmem:[#allocation2 + $0x142] sm:$0xff] }
  0x40   : > { %7648 = vst [vmem:[#allocation5_spill] sm:$0xff] %v5067_v37  ;;  %v5073_v58 = vld [vmem:[#allocation2 + $0x16a] sm:$0xff] }
  0x41   : > { %7650 = vst [vmem:[#allocation7_spill] sm:$0xff] %v5073_v58 }
  0x43   : > { %634 = vrot.lane.b32.xlu1 %v4881_v45, %s4677_s19  ;;  %640 = vrot.lane.b32.xlu0 %v4885_v46, %s4677_s19 }
  0x47   : > { %638 = vrot.lane.b32.xlu1 %v4889_v47, %s4677_s19  ;;  %644 = vrot.lane.b32.xlu0 %v4893_v48, %s4677_s19 }
  0x4b   : > { %642 = vrot.lane.b32.xlu1 %v4897_v49, %s4677_s19  ;;  %648 = vrot.lane.b32.xlu0 %v4901_v50, %s4677_s19 }
  0x4f   : > { %646 = vrot.lane.b32.xlu1 %v4905_v51, %s4677_s19  ;;  %652 = vrot.lane.b32.xlu0 %v4909_v52, %s4677_s19 }
  0x53   : > { %650 = vrot.lane.b32.xlu1 %v4913_v53, %s4677_s19  ;;  %656 = vrot.lane.b32.xlu0 %v4917_v54, %s4677_s19 }
  0x57   : > { %654 = vrot.lane.b32.xlu1 %v4921_v55, %s4677_s19  ;;  %660 = vrot.lane.b32.xlu0 %v4925_v56, %s4677_s19 }
  0x5b   : > { %658 = vrot.lane.b32.xlu1 %v4929_v57, %s4677_s19  ;;  %664 = vrot.lane.b32.xlu0 %v4935_v59, %s4677_s19 }
  0x5f   : > { %662 = vrot.lane.b32.xlu1 %v4939_v60, %s4677_s19  ;;  %668 = vrot.lane.b32.xlu0 %v4943_v61, %s4677_s19 }
  0x63   : > { %666 = vrot.lane.b32.xlu1 %v4949_v63, %s4677_s19  ;;  %736 = vrot.lane.b32.xlu0 %v351_v0, %s4678_s20  ;;  %v5079_v0 = vld [vmem:[#allocation2 + $0x15a] sm:$0xff] }
  0x64   : > { %7652 = vst [vmem:[#allocation9_spill] sm:$0xff] %v5079_v0 }
  0x67   : > { %670 = vrot.lane.b32.xlu1 %v4955_v1, %s4677_s19  ;;  %740 = vrot.lane.b32.xlu0 %v4958_v2, %s4678_s20 }
  0x6b   : > { %738 = vrot.lane.b32.xlu1 %v352_v3, %s4678_s20  ;;  %744 = vrot.lane.b32.xlu0 %v4964_v4, %s4678_s20 }
  0x6f   : > { %742 = vrot.lane.b32.xlu1 %v4967_v5, %s4678_s20  ;;  %748 = vrot.lane.b32.xlu0 %v4971_v6, %s4678_s20 }
  0x73   : > { %746 = vrot.lane.b32.xlu1 %v4975_v7, %s4678_s20  ;;  %752 = vrot.lane.b32.xlu0 %v4979_v8, %s4678_s20 }
  0x77   : > { %750 = vrot.lane.b32.xlu1 %v4983_v9, %s4678_s20  ;;  %756 = vrot.lane.b32.xlu0 %v4987_v10, %s4678_s20 }
  0x7b   : > { %754 = vrot.lane.b32.xlu1 %v4991_v11, %s4678_s20  ;;  %760 = vrot.lane.b32.xlu0 %v4995_v12, %s4678_s20 }
  0x7f   : > { %758 = vrot.lane.b32.xlu1 %v4999_v13, %s4678_s20  ;;  %764 = vrot.lane.b32.xlu0 %v5003_v14, %s4678_s20 }
  0x83   : > { %762 = vrot.lane.b32.xlu1 %v5007_v15, %s4678_s20  ;;  %768 = vrot.lane.b32.xlu0 %v5011_v16, %s4678_s20 }
  0x87   : > { %766 = vrot.lane.b32.xlu1 %v5015_v17, %s4678_s20  ;;  %772 = vrot.lane.b32.xlu0 %v5019_v18, %s4678_s20 }
  0x88   : > { %v5053_v33 = vpop.permute.xlu0 %608 }
  0x89   : > { %7646 = vst [vmem:[#allocation3_spill] sm:$0xff] %v5053_v33  ;;  %v5091_v33 = vld [vmem:[#allocation2 + $0x172] sm:$0xff] }
  0x8a   : > { %7656 = vst [vmem:[#allocation13_spill] sm:$0xff] %v5091_v33 }
  0x8b   : > { %770 = vrot.lane.b32.xlu1 %v5023_v19, %s4678_s20  ;;  %776 = vrot.lane.b32.xlu0 %v5027_v20, %s4678_s20 }
  0x8c   : > { %v5063_v36 = vpop.permute.xlu0 %610 }
  0x8d   : > { %7647 = vst [vmem:[#allocation4_spill] sm:$0xff] %v5063_v36 }
  0x8f   : > { %774 = vrot.lane.b32.xlu1 %v5031_v21, %s4678_s20  ;;  %780 = vrot.lane.b32.xlu0 %v5035_v22, %s4678_s20 }
  0x93   : > { %778 = vrot.lane.b32.xlu1 %v5039_v23, %s4678_s20  ;;  %784 = vrot.lane.b32.xlu0 %v5043_v24, %s4678_s20 }
  0x97   : > { %782 = vrot.lane.b32.xlu1 %v5047_v28, %s4678_s20  ;;  %788 = vrot.lane.b32.xlu0 %v5051_v29, %s4678_s20 }
  0x9b   : > { %786 = vrot.lane.b32.xlu1 %v5057_v34, %s4678_s20  ;;  %792 = vrot.lane.b32.xlu0 %v5061_v35, %s4678_s20 }
  0x9d   : > { %v5071_v39 = vpop.permute.xlu1 %612  ;;  %v5075_v62 = vpop.permute.xlu0 %616 }
  0x9e   : > { %7649 = vst [vmem:[#allocation6_spill] sm:$0xff] %v5071_v39  ;;  %7651 = vst [vmem:[#allocation8_spill] sm:$0xff] %v5075_v62  ;;  %v5089_v39 = vld [vmem:[#allocation2 + $0x18] sm:$0xff] }
  0x9f   : > { %790 = vrot.lane.b32.xlu1 %v5067_v37, %s4678_s20  ;;  %796 = vrot.lane.b32.xlu0 %v5073_v58, %s4678_s20  ;;  %7655 = vst [vmem:[#allocation12_spill] sm:$0xff] %v5089_v39 }
  0xa1   : > { %v5083_v3 = vpop.permute.xlu1 %614  ;;  %v5085_v36 = vpop.permute.xlu0 %620 }
  0xa2   : > { %7653 = vst [vmem:[#allocation10_spill] sm:$0xff] %v5083_v3  ;;  %7654 = vst [vmem:[#allocation11_spill] sm:$0xff] %v5085_v36  ;;  %v5101_v3 = vld [vmem:[#allocation2 + $0x30] sm:$0xff] }
  0xa3   : > { %794 = vrot.lane.b32.xlu1 %v5079_v0, %s4678_s20  ;;  %864 = vrot.lane.b32.xlu0 %v5089_v39, %s4679_s21  ;;  %7659 = vst [vmem:[#allocation16_spill] sm:$0xff] %v5101_v3  ;;  %v5107_v0 = vld [vmem:[#allocation2 + $0x20] sm:$0xff]  ;;  %v5119_v39 = vld [vmem:[#allocation2 + $0x38] sm:$0xff] }
  0xa4   : > { %7661 = vst [vmem:[#allocation18_spill] sm:$0xff] %v5107_v0  ;;  %7665 = vst [vmem:[#allocation22_spill] sm:$0xff] %v5119_v39 }
  0xa5   : > { %v5095_v62 = vpop.permute.xlu1 %618  ;;  %v5097_v37 = vpop.permute.xlu0 %624 }
  0xa6   : > { %7657 = vst [vmem:[#allocation14_spill] sm:$0xff] %v5095_v62  ;;  %7658 = vst [vmem:[#allocation15_spill] sm:$0xff] %v5097_v37  ;;  %v5113_v62 = vld [vmem:[#allocation2 + $0x48] sm:$0xff] }
  0xa7   : > { %798 = vrot.lane.b32.xlu1 %v5091_v33, %s4678_s20  ;;  %868 = vrot.lane.b32.xlu0 %v5101_v3, %s4679_s21  ;;  %7663 = vst [vmem:[#allocation20_spill] sm:$0xff] %v5113_v62 }
  0xa9   : > { %v5105_v36 = vpop.permute.xlu1 %622  ;;  %v5109_v58 = vpop.permute.xlu0 %628 }
  0xaa   : > { %7660 = vst [vmem:[#allocation17_spill] sm:$0xff] %v5105_v36  ;;  %7662 = vst [vmem:[#allocation19_spill] sm:$0xff] %v5109_v58  ;;  %v5125_v36 = vld [vmem:[#allocation2 + $0x60] sm:$0xff] }
  0xab   : > { %866 = vrot.lane.b32.xlu1 %v5107_v0, %s4679_s21  ;;  %872 = vrot.lane.b32.xlu0 %v5113_v62, %s4679_s21  ;;  %7667 = vst [vmem:[#allocation24_spill] sm:$0xff] %v5125_v36  ;;  %v5131_v0 = vld [vmem:[#allocation2 + $0x50] sm:$0xff] }
  0xac   : > { %7669 = vst [vmem:[#allocation26_spill] sm:$0xff] %v5131_v0 }
  0xad   : > { %v5117_v37 = vpop.permute.xlu1 %626  ;;  %v5121_v33 = vpop.permute.xlu0 %632 }
  0xae   : > { %7664 = vst [vmem:[#allocation21_spill] sm:$0xff] %v5117_v37  ;;  %7666 = vst [vmem:[#allocation23_spill] sm:$0xff] %v5121_v33  ;;  %v5137_v37 = vld [vmem:[#allocation2 + $0x78] sm:$0xff] }
  0xaf   : > { %870 = vrot.lane.b32.xlu1 %v5119_v39, %s4679_s21  ;;  %876 = vrot.lane.b32.xlu0 %v5125_v36, %s4679_s21  ;;  %7671 = vst [vmem:[#allocation28_spill] sm:$0xff] %v5137_v37  ;;  %v5143_v39 = vld [vmem:[#allocation2 + $0x68] sm:$0xff] }
  0xb0   : > { %7673 = vst [vmem:[#allocation30_spill] sm:$0xff] %v5143_v39 }
  0xb1   : > { %v5129_v58 = vpop.permute.xlu1 %630  ;;  %v5133_v3 = vpop.permute.xlu0 %636 }
  0xb2   : > { %7668 = vst [vmem:[#allocation25_spill] sm:$0xff] %v5129_v58  ;;  %7670 = vst [vmem:[#allocation27_spill] sm:$0xff] %v5133_v3  ;;  %v5149_v58 = vld [vmem:[#allocation2 + $0x90] sm:$0xff] }
  0xb3   : > { %874 = vrot.lane.b32.xlu1 %v5131_v0, %s4679_s21  ;;  %880 = vrot.lane.b32.xlu0 %v5137_v37, %s4679_s21  ;;  %7675 = vst [vmem:[#allocation32_spill] sm:$0xff] %v5149_v58  ;;  %v5155_v0 = vld [vmem:[#allocation2 + $0x80] sm:$0xff] }
  0xb4   : > { %7677 = vst [vmem:[#allocation34_spill] sm:$0xff] %v5155_v0 }
  0xb5   : > { %v5141_v33 = vpop.permute.xlu1 %634  ;;  %v5145_v62 = vpop.permute.xlu0 %640 }
  0xb6   : > { %7672 = vst [vmem:[#allocation29_spill] sm:$0xff] %v5141_v33  ;;  %7674 = vst [vmem:[#allocation31_spill] sm:$0xff] %v5145_v62  ;;  %v5161_v33 = vld [vmem:[#allocation2 + $0xa8] sm:$0xff] }
  0xb7   : > { %878 = vrot.lane.b32.xlu1 %v5143_v39, %s4679_s21  ;;  %884 = vrot.lane.b32.xlu0 %v5149_v58, %s4679_s21  ;;  %7679 = vst [vmem:[#allocation36_spill] sm:$0xff] %v5161_v33  ;;  %v5167_v39 = vld [vmem:[#allocation2 + $0x98] sm:$0xff] }
  0xb8   : > { %7681 = vst [vmem:[#allocation38_spill] sm:$0xff] %v5167_v39 }
  0xb9   : > { %v5153_v3 = vpop.permute.xlu1 %638  ;;  %v5157_v36 = vpop.permute.xlu0 %644 }
  0xba   : > { %7676 = vst [vmem:[#allocation33_spill] sm:$0xff] %v5153_v3  ;;  %7678 = vst [vmem:[#allocation35_spill] sm:$0xff] %v5157_v36  ;;  %v5173_v3 = vld [vmem:[#allocation2 + $0xc0] sm:$0xff] }
  0xbb   : > { %882 = vrot.lane.b32.xlu1 %v5155_v0, %s4679_s21  ;;  %888 = vrot.lane.b32.xlu0 %v5161_v33, %s4679_s21  ;;  %7683 = vst [vmem:[#allocation40_spill] sm:$0xff] %v5173_v3  ;;  %v5179_v0 = vld [vmem:[#allocation2 + $0xb0] sm:$0xff] }
  0xbc   : > { %7685 = vst [vmem:[#allocation42_spill] sm:$0xff] %v5179_v0 }
  0xbd   : > { %v5165_v62 = vpop.permute.xlu1 %642  ;;  %v5169_v37 = vpop.permute.xlu0 %648 }
  0xbe   : > { %7680 = vst [vmem:[#allocation37_spill] sm:$0xff] %v5165_v62  ;;  %7682 = vst [vmem:[#allocation39_spill] sm:$0xff] %v5169_v37  ;;  %v5185_v62 = vld [vmem:[#allocation2 + $0xd8] sm:$0xff] }
  0xbf   : > { %886 = vrot.lane.b32.xlu1 %v5167_v39, %s4679_s21  ;;  %892 = vrot.lane.b32.xlu0 %v5173_v3, %s4679_s21  ;;  %7687 = vst [vmem:[#allocation44_spill] sm:$0xff] %v5185_v62  ;;  %v5191_v39 = vld [vmem:[#allocation2 + $0xc8] sm:$0xff] }
  0xc0   : > { %7689 = vst [vmem:[#allocation46_spill] sm:$0xff] %v5191_v39 }
  0xc1   : > { %v5177_v36 = vpop.permute.xlu1 %646  ;;  %v5181_v58 = vpop.permute.xlu0 %652 }
  0xc2   : > { %7684 = vst [vmem:[#allocation41_spill] sm:$0xff] %v5177_v36  ;;  %7686 = vst [vmem:[#allocation43_spill] sm:$0xff] %v5181_v58  ;;  %v5197_v36 = vld [vmem:[#allocation2 + $0xf0] sm:$0xff] }
  0xc3   : > { %890 = vrot.lane.b32.xlu1 %v5179_v0, %s4679_s21  ;;  %896 = vrot.lane.b32.xlu0 %v5185_v62, %s4679_s21  ;;  %7691 = vst [vmem:[#allocation48_spill] sm:$0xff] %v5197_v36  ;;  %v5203_v0 = vld [vmem:[#allocation2 + $0xe0] sm:$0xff] }
  0xc4   : > { %7693 = vst [vmem:[#allocation50_spill] sm:$0xff] %v5203_v0 }
  0xc5   : > { %v5189_v37 = vpop.permute.xlu1 %650  ;;  %v5193_v33 = vpop.permute.xlu0 %656 }
  0xc6   : > { %7688 = vst [vmem:[#allocation45_spill] sm:$0xff] %v5189_v37  ;;  %7690 = vst [vmem:[#allocation47_spill] sm:$0xff] %v5193_v33  ;;  %v5209_v37 = vld [vmem:[#allocation2 + $0x108] sm:$0xff] }
  0xc7   : > { %894 = vrot.lane.b32.xlu1 %v5191_v39, %s4679_s21  ;;  %900 = vrot.lane.b32.xlu0 %v5197_v36, %s4679_s21  ;;  %7695 = vst [vmem:[#allocation52_spill] sm:$0xff] %v5209_v37  ;;  %v5215_v39 = vld [vmem:[#allocation2 + $0xf8] sm:$0xff] }
  0xc8   : > { %7697 = vst [vmem:[#allocation54_spill] sm:$0xff] %v5215_v39 }
  0xc9   : > { %v5201_v58 = vpop.permute.xlu1 %654  ;;  %v5205_v3 = vpop.permute.xlu0 %660 }
  0xca   : > { %7692 = vst [vmem:[#allocation49_spill] sm:$0xff] %v5201_v58  ;;  %7694 = vst [vmem:[#allocation51_spill] sm:$0xff] %v5205_v3  ;;  %v5221_v58 = vld [vmem:[#allocation2 + $0x120] sm:$0xff] }
  0xcb   : > { %898 = vrot.lane.b32.xlu1 %v5203_v0, %s4679_s21  ;;  %904 = vrot.lane.b32.xlu0 %v5209_v37, %s4679_s21  ;;  %7699 = vst [vmem:[#allocation56_spill] sm:$0xff] %v5221_v58  ;;  %v5227_v0 = vld [vmem:[#allocation2 + $0x110] sm:$0xff] }
  0xcc   : > { %7701 = vst [vmem:[#allocation58_spill] sm:$0xff] %v5227_v0 }
  0xcd   : > { %v5213_v33 = vpop.permute.xlu1 %658  ;;  %v5217_v62 = vpop.permute.xlu0 %664 }
  0xce   : > { %7696 = vst [vmem:[#allocation53_spill] sm:$0xff] %v5213_v33  ;;  %7698 = vst [vmem:[#allocation55_spill] sm:$0xff] %v5217_v62  ;;  %v5233_v33 = vld [vmem:[#allocation2 + $0x138] sm:$0xff] }
  0xcf   : > { %902 = vrot.lane.b32.xlu1 %v5215_v39, %s4679_s21  ;;  %908 = vrot.lane.b32.xlu0 %v5221_v58, %s4679_s21  ;;  %7703 = vst [vmem:[#allocation60_spill] sm:$0xff] %v5233_v33  ;;  %v5239_v39 = vld [vmem:[#allocation2 + $0x128] sm:$0xff] }
  0xd0   : > { %7705 = vst [vmem:[#allocation62_spill] sm:$0xff] %v5239_v39 }
  0xd1   : > { %v5225_v3 = vpop.permute.xlu1 %662  ;;  %v5229_v36 = vpop.permute.xlu0 %668 }
  0xd2   : > { %7700 = vst [vmem:[#allocation57_spill] sm:$0xff] %v5225_v3  ;;  %7702 = vst [vmem:[#allocation59_spill] sm:$0xff] %v5229_v36  ;;  %v5245_v3 = vld [vmem:[#allocation2 + $0x150] sm:$0xff] }
  0xd3   : > { %906 = vrot.lane.b32.xlu1 %v5227_v0, %s4679_s21  ;;  %912 = vrot.lane.b32.xlu0 %v5233_v33, %s4679_s21  ;;  %7707 = vst [vmem:[#allocation64_spill] sm:$0xff] %v5245_v3  ;;  %v5251_v0 = vld [vmem:[#allocation2 + $0x140] sm:$0xff] }
  0xd4   : > { %7709 = vst [vmem:[#allocation66_spill] sm:$0xff] %v5251_v0  ;;  %v5265_v33 = vld [vmem:[#allocation2 + $0x180] sm:$0xff] }
  0xd5   : > { %v5237_v62 = vpop.permute.xlu1 %666  ;;  %v5241_v37 = vpop.permute.xlu0 %736 }
  0xd6   : > { %7704 = vst [vmem:[#allocation61_spill] sm:$0xff] %v5237_v62  ;;  %7706 = vst [vmem:[#allocation63_spill] sm:$0xff] %v5241_v37  ;;  %v5257_v62 = vld [vmem:[#allocation2 + $0x168] sm:$0xff] }
  0xd7   : > { %910 = vrot.lane.b32.xlu1 %v5239_v39, %s4679_s21  ;;  %916 = vrot.lane.b32.xlu0 %v5245_v3, %s4679_s21  ;;  %v5263_v39 = vld [vmem:[#allocation2 + $0x158] sm:$0xff] }
  0xd8   : > { %7712 = vst [vmem:[#allocation69_spill] sm:$0xff] %v5263_v39 }
  0xd9   : > { %v5249_v36 = vpop.permute.xlu1 %670  ;;  %v5253_v58 = vpop.permute.xlu0 %740 }
  0xda   : > { %7708 = vst [vmem:[#allocation65_spill] sm:$0xff] %v5249_v36  ;;  %7710 = vst [vmem:[#allocation67_spill] sm:$0xff] %v5253_v58  ;;  %v5275_v58 = vld [vmem:[#allocation2 + $0x170] sm:$0xff] }
  0xdb   : > { %914 = vrot.lane.b32.xlu1 %v5251_v0, %s4679_s21  ;;  %920 = vrot.lane.b32.xlu0 %v5257_v62, %s4679_s21 }
  0xdd   : > { %v5261_v37 = vpop.permute.xlu1 %738  ;;  %v5267_v3 = vpop.permute.xlu0 %744 }
  0xde   : > { %7711 = vst [vmem:[#allocation68_spill] sm:$0xff] %v5261_v37  ;;  %7713 = vst [vmem:[#allocation70_spill] sm:$0xff] %v5267_v3  ;;  %v5281_v37 = vld [vmem:[#allocation2 + $0x188] sm:$0xff] }
  0xdf   : > { %918 = vrot.lane.b32.xlu1 %v5263_v39, %s4679_s21  ;;  %924 = vrot.lane.b32.xlu0 %v5265_v33, %s4679_s21 }
  0xe1   : > { %v5273_v36 = vpop.permute.xlu1 %742  ;;  %v5277_v0 = vpop.permute.xlu0 %748 }
  0xe2   : > { %7714 = vst [vmem:[#allocation71_spill] sm:$0xff] %v5273_v36  ;;  %7715 = vst [vmem:[#allocation72_spill] sm:$0xff] %v5277_v0 }
  0xe3   : > { %922 = vrot.lane.b32.xlu1 %v5275_v58, %s4679_s21  ;;  %992 = vrot.lane.b32.xlu0 %v4816_v25, %s4680_s22 }
  0xe5   : > { %v5285_v3 = vpop.permute.xlu1 %746  ;;  %v5287_v39 = vpop.permute.xlu0 %752 }
  0xe6   : > { %7716 = vst [vmem:[#allocation73_spill] sm:$0xff] %v5285_v3  ;;  %7717 = vst [vmem:[#allocation74_spill] sm:$0xff] %v5287_v39 }
  0xe7   : > { %926 = vrot.lane.b32.xlu1 %v5281_v37, %s4679_s21  ;;  %996 = vrot.lane.b32.xlu0 %v4818_v26, %s4680_s22 }
  0xe9   : > { %v5293_v0 = vpop.permute.xlu1 %750  ;;  %v5295_v36 = vpop.permute.xlu0 %756 }
  0xeb   : > { %994 = vrot.lane.b32.xlu1 %v4825_v27, %s4680_s22  ;;  %1000 = vrot.lane.b32.xlu0 %v4833_v30, %s4680_s22 }
  0xed   : > { %v5301_v25 = vpop.permute.xlu1 %754  ;;  %v5303_v3 = vpop.permute.xlu0 %760 }
  0xee   : > { %7718 = vst [vmem:[#allocation75_spill] sm:$0xff] %v5303_v3 }
  0xef   : > { %998 = vrot.lane.b32.xlu1 %v4837_v31, %s4680_s22  ;;  %1004 = vrot.lane.b32.xlu0 %v4841_v32, %s4680_s22 }
  0xf1   : > { %v5309_v26 = vpop.permute.xlu1 %758  ;;  %v5311_v39 = vpop.permute.xlu0 %764 }
  0xf2   : > { %7719 = vst [vmem:[#allocation76_spill] sm:$0xff] %v5309_v26  ;;  %7720 = vst [vmem:[#allocation77_spill] sm:$0xff] %v5311_v39 }
  0xf3   : > { %1002 = vrot.lane.b32.xlu1 %v4853_v38, %s4680_s22  ;;  %1008 = vrot.lane.b32.xlu0 %v4861_v40, %s4680_s22 }
  0xf5   : > { %v5317_v27 = vpop.permute.xlu1 %762  ;;  %v5319_v30 = vpop.permute.xlu0 %768 }
  0xf6   : > { %7721 = vst [vmem:[#allocation78_spill] sm:$0xff] %v5317_v27  ;;  %7722 = vst [vmem:[#allocation79_spill] sm:$0xff] %v5319_v30 }
  0xf7   : > { %1006 = vrot.lane.b32.xlu1 %v4865_v41, %s4680_s22  ;;  %1012 = vrot.lane.b32.xlu0 %v4869_v42, %s4680_s22 }
  0xf9   : > { %v5325_v31 = vpop.permute.xlu1 %766  ;;  %v5327_v32 = vpop.permute.xlu0 %772 }
  0xfa   : > { %7723 = vst [vmem:[#allocation80_spill] sm:$0xff] %v5325_v31  ;;  %7724 = vst [vmem:[#allocation81_spill] sm:$0xff] %v5327_v32 }
  0xfb   : > { %1010 = vrot.lane.b32.xlu1 %v4873_v43, %s4680_s22  ;;  %1016 = vrot.lane.b32.xlu0 %v4877_v44, %s4680_s22 }
  0xfd   : > { %v5333_v38 = vpop.permute.xlu1 %770  ;;  %v5335_v40 = vpop.permute.xlu0 %776 }
  0xfe   : > { %7725 = vst [vmem:[#allocation82_spill] sm:$0xff] %v5333_v38  ;;  %7726 = vst [vmem:[#allocation83_spill] sm:$0xff] %v5335_v40  ;;  %v514_v38 = vld [vmem:[#allocation2 + $0x49] sm:$0xff] }
  0xff   : > { %1014 = vrot.lane.b32.xlu1 %v4881_v45, %s4680_s22  ;;  %1020 = vrot.lane.b32.xlu0 %v4885_v46, %s4680_s22 }
 0x101   : > { %v5341_v41 = vpop.permute.xlu1 %774  ;;  %v5343_v42 = vpop.permute.xlu0 %780 }
 0x102   : > { %7727 = vst [vmem:[#allocation84_spill] sm:$0xff] %v5341_v41  ;;  %7728 = vst [vmem:[#allocation85_spill] sm:$0xff] %v5343_v42 }
 0x103   : > { %1018 = vrot.lane.b32.xlu1 %v4889_v47, %s4680_s22  ;;  %1024 = vrot.lane.b32.xlu0 %v4893_v48, %s4680_s22 }
 0x105   : > { %v5349_v43 = vpop.permute.xlu1 %778  ;;  %v5351_v44 = vpop.permute.xlu0 %784 }
 0x106   : > { %7729 = vst [vmem:[#allocation86_spill] sm:$0xff] %v5349_v43  ;;  %7730 = vst [vmem:[#allocation87_spill] sm:$0xff] %v5351_v44 }
 0x107   : > { %1022 = vrot.lane.b32.xlu1 %v4897_v49, %s4680_s22  ;;  %1028 = vrot.lane.b32.xlu0 %v4901_v50, %s4680_s22 }
 0x109   : > { %v5357_v45 = vpop.permute.xlu1 %782  ;;  %v5359_v46 = vpop.permute.xlu0 %788 }
 0x10a   : > { %7731 = vst [vmem:[#allocation88_spill] sm:$0xff] %v5357_v45  ;;  %7732 = vst [vmem:[#allocation89_spill] sm:$0xff] %v5359_v46  ;;  %v7773_v45 = vld [vmem:[#allocation28_spill] sm:$0xff] }
 0x10b   : > { %1026 = vrot.lane.b32.xlu1 %v4905_v51, %s4680_s22  ;;  %1032 = vrot.lane.b32.xlu0 %v4909_v52, %s4680_s22 }
 0x10d   : > { %v5365_v47 = vpop.permute.xlu1 %786  ;;  %v5367_v48 = vpop.permute.xlu0 %792 }
 0x10e   : > { %7733 = vst [vmem:[#allocation90_spill] sm:$0xff] %v5365_v47  ;;  %7734 = vst [vmem:[#allocation91_spill] sm:$0xff] %v5367_v48  ;;  %v7769_v47 = vld [vmem:[#allocation24_spill] sm:$0xff] }
 0x10f   : > { %1030 = vrot.lane.b32.xlu1 %v4913_v53, %s4680_s22  ;;  %1036 = vrot.lane.b32.xlu0 %v4917_v54, %s4680_s22 }
 0x111   : > { %v5373_v49 = vpop.permute.xlu1 %790  ;;  %v5375_v50 = vpop.permute.xlu0 %796 }
 0x112   : > { %7735 = vst [vmem:[#allocation92_spill] sm:$0xff] %v5373_v49  ;;  %7736 = vst [vmem:[#allocation93_spill] sm:$0xff] %v5375_v50 }
 0x113   : > { %1034 = vrot.lane.b32.xlu1 %v4921_v55, %s4680_s22  ;;  %1040 = vrot.lane.b32.xlu0 %v4925_v56, %s4680_s22  ;;  %v5399_v56 = vld [vmem:[#allocation2 + $0x181] sm:$0xff] }
 0x115   : > { %v5381_v51 = vpop.permute.xlu1 %794  ;;  %v5383_v52 = vpop.permute.xlu0 %864 }
 0x116   : > { %7737 = vst [vmem:[#allocation94_spill] sm:$0xff] %v5381_v51 }
 0x117   : > { %1038 = vrot.lane.b32.xlu1 %v4929_v57, %s4680_s22  ;;  %1044 = vrot.lane.b32.xlu0 %v4935_v59, %s4680_s22 }
 0x119   : > { %v5389_v53 = vpop.permute.xlu1 %798  ;;  %v5391_v54 = vpop.permute.xlu0 %868 }
 0x11a   : > { %7738 = vst [vmem:[#allocation95_spill] sm:$0xff] %v5389_v53 }
 0x11b   : > { %1042 = vrot.lane.b32.xlu1 %v4939_v60, %s4680_s22  ;;  %1048 = vrot.lane.b32.xlu0 %v4943_v61, %s4680_s22  ;;  %v5413_v60 = vld [vmem:[#allocation2 + $0x189] sm:$0xff] }
 0x11d   : > { %v5397_v55 = vpop.permute.xlu1 %866  ;;  %v5401_v50 = vpop.permute.xlu0 %872 }
 0x11f   : > { %1046 = vrot.lane.b32.xlu1 %v4949_v63, %s4680_s22  ;;  %1052 = vrot.lane.b32.xlu0 %v5399_v56, %s4680_s22 }
 0x121   : > { %v5407_v57 = vpop.permute.xlu1 %870  ;;  %v5409_v59 = vpop.permute.xlu0 %876 }
 0x123   : > { %1050 = vrot.lane.b32.xlu1 %v4955_v1, %s4680_s22  ;;  %1120 = vrot.lane.b32.xlu0 %v4958_v2, %s4681_s23 }
 0x125   : > { %v5417_v61 = vpop.permute.xlu1 %874  ;;  %v5419_v53 = vpop.permute.xlu0 %880 }
 0x127   : > { %1054 = vrot.lane.b32.xlu1 %v5413_v60, %s4680_s22  ;;  %1124 = vrot.lane.b32.xlu0 %v4964_v4, %s4681_s23 }
 0x129   : > { %v5425_v63 = vpop.permute.xlu1 %878  ;;  %v5427_v51 = vpop.permute.xlu0 %884 }
 0x12a   : > { %7739 = vst [vmem:[#allocation96_spill] sm:$0xff] %v5427_v51 }
 0x12b   : > { %1122 = vrot.lane.b32.xlu1 %v4967_v5, %s4681_s23  ;;  %1128 = vrot.lane.b32.xlu0 %v4971_v6, %s4681_s23 }
 0x12d   : > { %v5433_v1 = vpop.permute.xlu1 %882  ;;  %v5435_v2 = vpop.permute.xlu0 %888 }
 0x12e   : > { %7740 = vst [vmem:[#allocation97_spill] sm:$0xff] %v5435_v2 }
 0x12f   : > { %1126 = vrot.lane.b32.xlu1 %v4975_v7, %s4681_s23  ;;  %1132 = vrot.lane.b32.xlu0 %v4979_v8, %s4681_s23 }
 0x131   : > { %v5441_v4 = vpop.permute.xlu1 %886  ;;  %v5443_v48 = vpop.permute.xlu0 %892 }
 0x132   : > { %7741 = vst [vmem:[#allocation98_spill] sm:$0xff] %v5441_v4  ;;  %7742 = vst [vmem:[#allocation99_spill] sm:$0xff] %v5443_v48  ;;  %v549_v48 = vld [vmem:[#allocation2 + $0x6a] sm:$0xff]  ;;  %v564_v4 = vld [vmem:[#allocation2 + $0x122] sm:$0xff] }
 0x133   : > { %1130 = vrot.lane.b32.xlu1 %v4983_v9, %s4681_s23  ;;  %1136 = vrot.lane.b32.xlu0 %v4987_v10, %s4681_s23 }
 0x135   : > { %v5449_v5 = vpop.permute.xlu1 %890  ;;  %v5451_v6 = vpop.permute.xlu0 %896 }
 0x136   : > { %7743 = vst [vmem:[#allocation100_spill] sm:$0xff] %v5449_v5  ;;  %7744 = vst [vmem:[#allocation101_spill] sm:$0xff] %v5451_v6  ;;  %v560_v5 = vld [vmem:[#allocation2 + $0xf2] sm:$0xff] }
 0x137   : > { %1134 = vrot.lane.b32.xlu1 %v4991_v11, %s4681_s23  ;;  %1140 = vrot.lane.b32.xlu0 %v4995_v12, %s4681_s23 }
 0x139   : > { %v5457_v7 = vpop.permute.xlu1 %894  ;;  %v5459_v8 = vpop.permute.xlu0 %900 }
 0x13a   : > { %7745 = vst [vmem:[#allocation102_spill] sm:$0xff] %v5457_v7  ;;  %7746 = vst [vmem:[#allocation103_spill] sm:$0xff] %v5459_v8  ;;  %v7788_v8 = vld [vmem:[#allocation42_spill] sm:$0xff]  ;;  %v545_v7 = vld [vmem:[#allocation2 + $0x3a] sm:$0xff] }
 0x13b   : > { %1138 = vrot.lane.b32.xlu1 %v4999_v13, %s4681_s23  ;;  %1144 = vrot.lane.b32.xlu0 %v5003_v14, %s4681_s23 }
 0x13d   : > { %v5465_v9 = vpop.permute.xlu1 %898  ;;  %v5467_v10 = vpop.permute.xlu0 %904 }
 0x13e   : > { %7747 = vst [vmem:[#allocation104_spill] sm:$0xff] %v5465_v9  ;;  %7748 = vst [vmem:[#allocation105_spill] sm:$0xff] %v5467_v10  ;;  %v7780_v10 = vld [vmem:[#allocation34_spill] sm:$0xff] }
 0x13f   : > { %1142 = vrot.lane.b32.xlu1 %v5007_v15, %s4681_s23  ;;  %1148 = vrot.lane.b32.xlu0 %v5011_v16, %s4681_s23 }
 0x141   : > { %v5473_v11 = vpop.permute.xlu1 %902  ;;  %v5475_v12 = vpop.permute.xlu0 %908 }
 0x142   : > { %7749 = vst [vmem:[#allocation106_spill] sm:$0xff] %v5473_v11  ;;  %7750 = vst [vmem:[#allocation107_spill] sm:$0xff] %v5475_v12  ;;  %v7784_v11 = vld [vmem:[#allocation38_spill] sm:$0xff] }
 0x143   : > { %1146 = vrot.lane.b32.xlu1 %v5015_v17, %s4681_s23  ;;  %1152 = vrot.lane.b32.xlu0 %v5019_v18, %s4681_s23 }
 0x145   : > { %v5481_v13 = vpop.permute.xlu1 %906  ;;  %v5483_v14 = vpop.permute.xlu0 %912 }
 0x146   : > { %7751 = vst [vmem:[#allocation108_spill] sm:$0xff] %v5481_v13  ;;  %7752 = vst [vmem:[#allocation109_spill] sm:$0xff] %v5483_v14  ;;  %v7776_v13 = vld [vmem:[#allocation30_spill] sm:$0xff] }
 0x147   : > { %1150 = vrot.lane.b32.xlu1 %v5023_v19, %s4681_s23  ;;  %1156 = vrot.lane.b32.xlu0 %v5027_v20, %s4681_s23 }
 0x149   : > { %v5489_v15 = vpop.permute.xlu1 %910  ;;  %v5491_v16 = vpop.permute.xlu0 %916 }
 0x14a   : > { %7753 = vst [vmem:[#allocation110_spill] sm:$0xff] %v5489_v15  ;;  %7754 = vst [vmem:[#allocation111_spill] sm:$0xff] %v5491_v16  ;;  %v7772_v15 = vld [vmem:[#allocation26_spill] sm:$0xff] }
 0x14b   : > { %1154 = vrot.lane.b32.xlu1 %v5031_v21, %s4681_s23  ;;  %1160 = vrot.lane.b32.xlu0 %v5035_v22, %s4681_s23 }
 0x14d   : > { %v5497_v17 = vpop.permute.xlu1 %914  ;;  %v5499_v18 = vpop.permute.xlu0 %920 }
 0x14e   : > { %7755 = vst [vmem:[#allocation112_spill] sm:$0xff] %v5497_v17  ;;  %7756 = vst [vmem:[#allocation113_spill] sm:$0xff] %v5499_v18 }
 0x14f   : > { %1158 = vrot.lane.b32.xlu1 %v5039_v23, %s4681_s23  ;;  %1164 = vrot.lane.b32.xlu0 %v5043_v24, %s4681_s23 }
 0x151   : > { %v5505_v19 = vpop.permute.xlu1 %918  ;;  %v5507_v20 = vpop.permute.xlu0 %924 }
 0x152   : > { %7757 = vst [vmem:[#allocation114_spill] sm:$0xff] %v5505_v19  ;;  %7758 = vst [vmem:[#allocation115_spill] sm:$0xff] %v5507_v20  ;;  %v7761_v20 = vld [vmem:[#allocation5_spill] sm:$0xff]  ;;  %v7765_v19 = vld [vmem:[#allocation16_spill] sm:$0xff] }
 0x153   : > { %1162 = vrot.lane.b32.xlu1 %v5047_v28, %s4681_s23  ;;  %1168 = vrot.lane.b32.xlu0 %v5051_v29, %s4681_s23  ;;  %v7762_v28 = vld [vmem:[#allocation7_spill] sm:$0xff] }
 0x155   : > { %v5513_v21 = vpop.permute.xlu1 %922  ;;  %v5515_v22 = vpop.permute.xlu0 %992 }
 0x156   : > { %7759 = vst [vmem:[#allocation116_spill] sm:$0xff] %v5513_v21  ;;  %v5531_v21 = vld [vmem:[#allocation2 + $0x182] sm:$0xff] }
 0x157   : > { %1166 = vrot.lane.b32.xlu1 %v5057_v34, %s4681_s23  ;;  %1172 = vrot.lane.b32.xlu0 %v5061_v35, %s4681_s23  ;;  %v7763_v34 = vld [vmem:[#allocation9_spill] sm:$0xff] }
 0x159   : > { %v5521_v23 = vpop.permute.xlu1 %926  ;;  %v5523_v24 = vpop.permute.xlu0 %996 }
 0x15a   : > { %7760 = vst [vmem:[#allocation117_spill] sm:$0xff] %v5521_v23 }
 0x15b   : > { %1170 = vrot.lane.b32.xlu1 %v7761_v20, %s4681_s23  ;;  %1176 = vrot.lane.b32.xlu0 %v7762_v28, %s4681_s23  ;;  %v7764_v20 = vld [vmem:[#allocation13_spill] sm:$0xff]  ;;  %v5545_v28 = vld [vmem:[#allocation2 + $0x18a] sm:$0xff] }
 0x15d   : > { %v5529_v29 = vpop.permute.xlu1 %994  ;;  %v5533_v18 = vpop.permute.xlu0 %1000 }
 0x15f   : > { %1174 = vrot.lane.b32.xlu1 %v7763_v34, %s4681_s23  ;;  %1180 = vrot.lane.b32.xlu0 %v5531_v21, %s4681_s23  ;;  %v7766_v34 = vld [vmem:[#allocation20_spill] sm:$0xff] }
 0x161   : > { %v5539_v35 = vpop.permute.xlu1 %998  ;;  %v5541_v23 = vpop.permute.xlu0 %1004 }
 0x163   : > { %1178 = vrot.lane.b32.xlu1 %v7764_v20, %s4681_s23  ;;  %1248 = vrot.lane.b32.xlu0 %v7765_v19, %s4682_s24  ;;  %v7768_v20 = vld [vmem:[#allocation22_spill] sm:$0xff] }
 0x165   : > { %v5549_v49 = vpop.permute.xlu1 %1002  ;;  %v5551_v16 = vpop.permute.xlu0 %1008 }
 0x167   : > { %1182 = vrot.lane.b32.xlu1 %v5545_v28, %s4681_s23  ;;  %1252 = vrot.lane.b32.xlu0 %v7766_v34, %s4682_s24 }
 0x169   : > { %v5557_v46 = vpop.permute.xlu1 %1006  ;;  %v5559_v17 = vpop.permute.xlu0 %1012 }
 0x16a   : > { %7767 = vst [vmem:[#allocation5_spill] sm:$0xff] %v5559_v17  ;;  %v575_v17 = vld [vmem:[#allocation2 + $0x1a2] sm:$0xff] }
 0x16b   : > { %1250 = vrot.lane.b32.xlu1 %v7768_v20, %s4682_s24  ;;  %1256 = vrot.lane.b32.xlu0 %v7769_v47, %s4682_s24  ;;  %v7777_v20 = vld [vmem:[#allocation32_spill] sm:$0xff] }
 0x16d   : > { %v5565_v14 = vpop.permute.xlu1 %1010  ;;  %v5567_v44 = vpop.permute.xlu0 %1016 }
 0x16e   : > { %7770 = vst [vmem:[#allocation7_spill] sm:$0xff] %v5565_v14  ;;  %7771 = vst [vmem:[#allocation9_spill] sm:$0xff] %v5567_v44  ;;  %v7868_v14 = vld [vmem:[#allocation18_spill] sm:$0xff] }
 0x16f   : > { %1254 = vrot.lane.b32.xlu1 %v7772_v15, %s4682_s24  ;;  %1260 = vrot.lane.b32.xlu0 %v7773_v45, %s4682_s24  ;;  %v7781_v15 = vld [vmem:[#allocation36_spill] sm:$0xff] }
 0x171   : > { %v5573_v12 = vpop.permute.xlu1 %1014  ;;  %v5575_v42 = vpop.permute.xlu0 %1020 }
 0x172   : > { %7774 = vst [vmem:[#allocation13_spill] sm:$0xff] %v5573_v12  ;;  %7775 = vst [vmem:[#allocation16_spill] sm:$0xff] %v5575_v42  ;;  %v532_v12 = vld [vmem:[#allocation2 + $0x121] sm:$0xff] }
 0x173   : > { %1258 = vrot.lane.b32.xlu1 %v7776_v13, %s4682_s24  ;;  %1264 = vrot.lane.b32.xlu0 %v7777_v20, %s4682_s24  ;;  %v7785_v13 = vld [vmem:[#allocation40_spill] sm:$0xff] }
 0x175   : > { %v5581_v47 = vpop.permute.xlu1 %1018  ;;  %v5583_v43 = vpop.permute.xlu0 %1024 }
 0x176   : > { %7778 = vst [vmem:[#allocation20_spill] sm:$0xff] %v5581_v47  ;;  %7779 = vst [vmem:[#allocation22_spill] sm:$0xff] %v5583_v43 }
 0x177   : > { %1262 = vrot.lane.b32.xlu1 %v7780_v10, %s4682_s24  ;;  %1268 = vrot.lane.b32.xlu0 %v7781_v15, %s4682_s24  ;;  %v7789_v10 = vld [vmem:[#allocation44_spill] sm:$0xff] }
 0x179   : > { %v5589_v45 = vpop.permute.xlu1 %1022  ;;  %v5591_v40 = vpop.permute.xlu0 %1028 }
 0x17a   : > { %7782 = vst [vmem:[#allocation24_spill] sm:$0xff] %v5589_v45  ;;  %7783 = vst [vmem:[#allocation26_spill] sm:$0xff] %v5591_v40  ;;  %v7792_v40 = vld [vmem:[#allocation46_spill] sm:$0xff] }
 0x17b   : > { %1266 = vrot.lane.b32.xlu1 %v7784_v11, %s4682_s24  ;;  %1272 = vrot.lane.b32.xlu0 %v7785_v13, %s4682_s24  ;;  %v7793_v11 = vld [vmem:[#allocation48_spill] sm:$0xff]  ;;  %v517_v45 = vld [vmem:[#allocation2 + $0x69] sm:$0xff] }
 0x17d   : > { %v5597_v20 = vpop.permute.xlu1 %1026  ;;  %v5599_v41 = vpop.permute.xlu0 %1032 }
 0x17e   : > { %7786 = vst [vmem:[#allocation28_spill] sm:$0xff] %v5597_v20  ;;  %7787 = vst [vmem:[#allocation30_spill] sm:$0xff] %v5599_v41  ;;  %v7796_v41 = vld [vmem:[#allocation50_spill] sm:$0xff] }
 0x17f   : > { %1270 = vrot.lane.b32.xlu1 %v7788_v8, %s4682_s24  ;;  %1276 = vrot.lane.b32.xlu0 %v7789_v10, %s4682_s24  ;;  %v7797_v8 = vld [vmem:[#allocation52_spill] sm:$0xff] }
 0x181   : > { %v5605_v15 = vpop.permute.xlu1 %1030  ;;  %v5607_v32 = vpop.permute.xlu0 %1036 }
 0x182   : > { %7790 = vst [vmem:[#allocation32_spill] sm:$0xff] %v5605_v15  ;;  %7791 = vst [vmem:[#allocation34_spill] sm:$0xff] %v5607_v32  ;;  %v7800_v32 = vld [vmem:[#allocation54_spill] sm:$0xff] }
 0x183   : > { %1274 = vrot.lane.b32.xlu1 %v7792_v40, %s4682_s24  ;;  %1280 = vrot.lane.b32.xlu0 %v7793_v11, %s4682_s24  ;;  %v7801_v40 = vld [vmem:[#allocation56_spill] sm:$0xff] }
 0x185   : > { %v5613_v13 = vpop.permute.xlu1 %1034  ;;  %v5615_v20 = vpop.permute.xlu0 %1040 }
 0x186   : > { %7794 = vst [vmem:[#allocation36_spill] sm:$0xff] %v5613_v13  ;;  %7795 = vst [vmem:[#allocation38_spill] sm:$0xff] %v5615_v20  ;;  %v7804_v20 = vld [vmem:[#allocation58_spill] sm:$0xff] }
 0x187   : > { %1278 = vrot.lane.b32.xlu1 %v7796_v41, %s4682_s24  ;;  %1284 = vrot.lane.b32.xlu0 %v7797_v8, %s4682_s24  ;;  %v7805_v41 = vld [vmem:[#allocation60_spill] sm:$0xff] }
 0x189   : > { %v5621_v10 = vpop.permute.xlu1 %1038  ;;  %v5623_v15 = vpop.permute.xlu0 %1044 }
 0x18a   : > { %7798 = vst [vmem:[#allocation40_spill] sm:$0xff] %v5621_v10  ;;  %7799 = vst [vmem:[#allocation42_spill] sm:$0xff] %v5623_v15  ;;  %v7808_v15 = vld [vmem:[#allocation62_spill] sm:$0xff] }
 0x18b   : > { %1282 = vrot.lane.b32.xlu1 %v7800_v32, %s4682_s24  ;;  %1288 = vrot.lane.b32.xlu0 %v7801_v40, %s4682_s24  ;;  %v7809_v32 = vld [vmem:[#allocation64_spill] sm:$0xff] }
 0x18d   : > { %v5629_v11 = vpop.permute.xlu1 %1042  ;;  %v5631_v13 = vpop.permute.xlu0 %1048 }
 0x18e   : > { %7802 = vst [vmem:[#allocation44_spill] sm:$0xff] %v5629_v11  ;;  %7803 = vst [vmem:[#allocation46_spill] sm:$0xff] %v5631_v13  ;;  %v7811_v13 = vld [vmem:[#allocation66_spill] sm:$0xff] }
 0x18f   : > { %1286 = vrot.lane.b32.xlu1 %v7804_v20, %s4682_s24  ;;  %1292 = vrot.lane.b32.xlu0 %v7805_v41, %s4682_s24 }
 0x191   : > { %v5637_v8 = vpop.permute.xlu1 %1046  ;;  %v5639_v10 = vpop.permute.xlu0 %1052 }
 0x192   : > { %7806 = vst [vmem:[#allocation48_spill] sm:$0xff] %v5637_v8  ;;  %7807 = vst [vmem:[#allocation50_spill] sm:$0xff] %v5639_v10  ;;  %v7813_v10 = vld [vmem:[#allocation69_spill] sm:$0xff] }
 0x193   : > { %1290 = vrot.lane.b32.xlu1 %v7808_v15, %s4682_s24  ;;  %1296 = vrot.lane.b32.xlu0 %v7809_v32, %s4682_s24  ;;  %v510_v32 = vld [vmem:[#allocation2 + $0x198] sm:$0xff] }
 0x195   : > { %v5645_v40 = vpop.permute.xlu1 %1050  ;;  %v5647_v11 = vpop.permute.xlu0 %1120 }
 0x196   : > { %7810 = vst [vmem:[#allocation52_spill] sm:$0xff] %v5645_v40 }
 0x197   : > { %1294 = vrot.lane.b32.xlu1 %v7811_v13, %s4682_s24  ;;  %1300 = vrot.lane.b32.xlu0 %v5257_v62, %s4682_s24  ;;  %v282_v62 = vld [vmem:[%s7601_s1] sm:$0xff]  ;;  %v283_v13 = vld [vmem:[%s7601_s1 + $0x8] sm:$0xff] }
 0x199   : > { %v5653_v20 = vpop.permute.xlu1 %1054  ;;  %v5655_v41 = vpop.permute.xlu0 %1124 }
 0x19a   : > { %7812 = vst [vmem:[#allocation54_spill] sm:$0xff] %v5653_v20  ;;  %v512_v20 = vld [vmem:[#allocation2 + $0x31] sm:$0xff] }
 0x19b   : > { %1298 = vrot.lane.b32.xlu1 %v7813_v10, %s4682_s24  ;;  %1304 = vrot.lane.b32.xlu0 %v5265_v33, %s4682_s24  ;;  %v4602_v10 = vpack.c.bf16 %v283_v13, %v282_v62  ;;  %v285_v62 = vld [vmem:[%s7601_s1 + $0x18] sm:$0xff]  ;;  %v511_v13 = vld [vmem:[#allocation2 + $0x1a0] sm:$0xff] }
 0x19d   : > { %v5661_v15 = vpop.permute.xlu1 %1122  ;;  %v5663_v40 = vpop.permute.xlu0 %1128  ;;  %4603 = vmatprep.subr.bf16.mxu0 %v4602_v10 }
 0x19e   : > { %4605 = vmatpush3.bf16.msra.mxu0 %v4602_v10 }
 0x19f   : > { %1302 = vrot.lane.b32.xlu1 %v5275_v58, %s4682_s24  ;;  %1308 = vrot.lane.b32.xlu0 %v510_v32, %s4682_s24  ;;  %v284_v58 = vld [vmem:[%s7601_s1 + $0x10] sm:$0xff] }
 0x1a0   : > { %v4606_v32 = vpack.c.bf16 %v285_v62, %v284_v58  ;;  %v286_v58 = vld [vmem:[%s7601_s1 + $0x20] sm:$0xf] }
 0x1a1   : > { %v5674_v33 = vpop.permute.xlu1 %1126  ;;  %v5676_v8 = vpop.permute.xlu0 %1132 }
 0x1a2   : > { %4607 = vmatprep.subr.bf16.mxu0 %v4606_v32 }
 0x1a3   : > { %1306 = vrot.lane.b32.xlu1 %v5281_v37, %s4682_s24  ;;  %1376 = vrot.lane.b32.xlu0 %v512_v20, %s4683_s6  ;;  %v513_v37 = vld [vmem:[#allocation2 + $0x39] sm:$0xff]  ;;  %v516_v20 = vld [vmem:[#allocation2 + $0x61] sm:$0xff] }
 0x1a4   : > { %4609 = vmatpush3.bf16.msra.mxu0 %v4606_v32  ;;  %v518_v32 = vld [vmem:[#allocation2 + $0x79] sm:$0xff] }
 0x1a5   : > { %v5687_v9 = vpop.permute.xlu1 %1130  ;;  %v5689_v43 = vpop.permute.xlu0 %1136  ;;  %4494 = vmatprep.subr.msk.mxu0 %vm1960_vm3, %v286_v58 }
 0x1a7   : > { %1310 = vrot.lane.b32.xlu1 %v511_v13, %s4682_s24  ;;  %1380 = vrot.lane.b32.xlu0 %v514_v38, %s4683_s6  ;;  %v515_v13 = vld [vmem:[#allocation2 + $0x51] sm:$0xff] }
 0x1a8   : > { %4495 = vmatpush3.msk.msra.mxu0 %vm1960_vm3, %v286_v58 }
 0x1a9   : > { %v5693_v10 = vpop.permute.xlu1 %1134  ;;  %v5699_v62 = vpop.permute.xlu0 %1140 }
 0x1aa   : > { %7814 = vst [vmem:[#allocation56_spill] sm:$0xff] %v5699_v62 }
 0x1ab   : > { %1378 = vrot.lane.b32.xlu1 %v513_v37, %s4683_s6  ;;  %1384 = vrot.lane.b32.xlu0 %v516_v20, %s4683_s6  ;;  %v544_v37 = vld [vmem:[#allocation2 + $0x32] sm:$0xff] }
 0x1ac   : > { %v547_v20 = vld [vmem:[#allocation2 + $0x52] sm:$0xff] }
 0x1ad   : > { %v5704_v38 = vpop.permute.xlu1 %1138  ;;  %v5706_v6 = vpop.permute.xlu0 %1144 }
 0x1ae   : > { %7815 = vst [vmem:[#allocation58_spill] sm:$0xff] %v5704_v38  ;;  %7816 = vst [vmem:[#allocation60_spill] sm:$0xff] %v5706_v6  ;;  %v530_v6 = vld [vmem:[#allocation2 + $0x109] sm:$0xff]  ;;  %v7865_v38 = vld [vmem:[#allocation8_spill] sm:$0xff] }
 0x1af   : > { %1382 = vrot.lane.b32.xlu1 %v515_v13, %s4683_s6  ;;  %1388 = vrot.lane.b32.xlu0 %v518_v32, %s4683_s6  ;;  %v546_v13 = vld [vmem:[#allocation2 + $0x4a] sm:$0xff] }
 0x1b1   : > { %v5710_v30 = vpop.permute.xlu1 %1142  ;;  %v5712_v31 = vpop.permute.xlu0 %1148 }
 0x1b2   : > { %7817 = vst [vmem:[#allocation62_spill] sm:$0xff] %v5710_v30  ;;  %7818 = vst [vmem:[#allocation64_spill] sm:$0xff] %v5712_v31  ;;  %v562_v30 = vld [vmem:[#allocation2 + $0x10a] sm:$0xff] }
 0x1b3   : > { %1386 = vrot.lane.b32.xlu1 %v517_v45, %s4683_s6  ;;  %1506 = vrot.lane.b32.xlu0 %v545_v7, %s4684_s9  ;;  %v548_v45 = vld [vmem:[#allocation2 + $0x62] sm:$0xff] }
 0x1b5   : > { %v5716_v58 = vpop.permute.xlu1 %1146  ;;  %v5718_v42 = vpop.permute.xlu0 %1152 }
 0x1b6   : > { %7819 = vst [vmem:[#allocation66_spill] sm:$0xff] %v5716_v58  ;;  %7820 = vst [vmem:[#allocation69_spill] sm:$0xff] %v5718_v42  ;;  %v550_v58 = vld [vmem:[#allocation2 + $0x7a] sm:$0xff]  ;;  %v520_v42 = vld [vmem:[#allocation2 + $0x91] sm:$0xff] }
 0x1b7   : > { %1504 = vrot.lane.b32.xlu1 %v544_v37, %s4684_s9  ;;  %1510 = vrot.lane.b32.xlu0 %v547_v20, %s4684_s9  ;;  %v519_v37 = vld [vmem:[#allocation2 + $0x81] sm:$0xff] }
 0x1b9   : > { %v5722_v32 = vpop.permute.xlu1 %1150  ;;  %v5724_v31 = vpop.permute.xlu0 %1156 }
 0x1ba   : > { %7821 = vst [vmem:[#allocation118_spill] sm:$0xff] %v5722_v32  ;;  %7822 = vst [vmem:[#allocation119_spill] sm:$0xff] %v5724_v31  ;;  %v552_v31 = vld [vmem:[#allocation2 + $0x92] sm:$0xff] }
 0x1bb   : > { %1508 = vrot.lane.b32.xlu1 %v546_v13, %s4684_s9  ;;  %1514 = vrot.lane.b32.xlu0 %v549_v48, %s4684_s9  ;;  %v551_v13 = vld [vmem:[#allocation2 + $0x82] sm:$0xff] }
 0x1bd   : > { %v5728_v7 = vpop.permute.xlu1 %1154  ;;  %v5730_v47 = vpop.permute.xlu0 %1160 }
 0x1be   : > { %7823 = vst [vmem:[#allocation120_spill] sm:$0xff] %v5728_v7  ;;  %7824 = vst [vmem:[#allocation121_spill] sm:$0xff] %v5730_v47  ;;  %v522_v47 = vld [vmem:[#allocation2 + $0xa9] sm:$0xff] }
 0x1bf   : > { %1512 = vrot.lane.b32.xlu1 %v548_v45, %s4684_s9  ;;  %1516 = vrot.lane.b32.xlu0 %v550_v58, %s4684_s9  ;;  %v521_v45 = vld [vmem:[#allocation2 + $0x99] sm:$0xff] }
 0x1c1   : > { %v5734_v20 = vpop.permute.xlu1 %1158  ;;  %v5736_v32 = vpop.permute.xlu0 %1164 }
 0x1c2   : > { %7825 = vst [vmem:[#allocation122_spill] sm:$0xff] %v5734_v20  ;;  %7826 = vst [vmem:[#allocation123_spill] sm:$0xff] %v5736_v32  ;;  %v554_v32 = vld [vmem:[#allocation2 + $0xaa] sm:$0xff] }
 0x1c3   : > { %1390 = vrot.lane.b32.xlu1 %v519_v37, %s4683_s6  ;;  %1392 = vrot.lane.b32.xlu0 %v520_v42, %s4683_s6  ;;  %v553_v37 = vld [vmem:[#allocation2 + $0x9a] sm:$0xff] }
 0x1c5   : > { %v5740_v48 = vpop.permute.xlu1 %1162  ;;  %v5742_v7 = vpop.permute.xlu0 %1168 }
 0x1c6   : > { %7827 = vst [vmem:[#allocation124_spill] sm:$0xff] %v5740_v48  ;;  %7828 = vst [vmem:[#allocation125_spill] sm:$0xff] %v5742_v7  ;;  %v524_v7 = vld [vmem:[#allocation2 + $0xc1] sm:$0xff] }
 0x1c7   : > { %1518 = vrot.lane.b32.xlu1 %v551_v13, %s4684_s9  ;;  %1520 = vrot.lane.b32.xlu0 %v552_v31, %s4684_s9  ;;  %v523_v13 = vld [vmem:[#allocation2 + $0xb1] sm:$0xff] }
 0x1c9   : > { %v5746_v58 = vpop.permute.xlu1 %1166  ;;  %v5748_v20 = vpop.permute.xlu0 %1172 }
 0x1ca   : > { %7829 = vst [vmem:[#allocation126_spill] sm:$0xff] %v5746_v58  ;;  %7830 = vst [vmem:[#allocation127_spill] sm:$0xff] %v5748_v20  ;;  %v556_v20 = vld [vmem:[#allocation2 + $0xc2] sm:$0xff] }
 0x1cb   : > { %1394 = vrot.lane.b32.xlu1 %v521_v45, %s4683_s6  ;;  %1396 = vrot.lane.b32.xlu0 %v522_v47, %s4683_s6  ;;  %v555_v45 = vld [vmem:[#allocation2 + $0xb2] sm:$0xff] }
 0x1cd   : > { %v5752_v42 = vpop.permute.xlu1 %1170  ;;  %v5754_v48 = vpop.permute.xlu0 %1176 }
 0x1ce   : > { %7831 = vst [vmem:[#allocation128_spill] sm:$0xff] %v5752_v42  ;;  %7832 = vst [vmem:[#allocation129_spill] sm:$0xff] %v5754_v48  ;;  %v526_v48 = vld [vmem:[#allocation2 + $0xd9] sm:$0xff] }
 0x1cf   : > { %1522 = vrot.lane.b32.xlu1 %v553_v37, %s4684_s9  ;;  %1524 = vrot.lane.b32.xlu0 %v554_v32, %s4684_s9  ;;  %v525_v37 = vld [vmem:[#allocation2 + $0xc9] sm:$0xff] }
 0x1d1   : > { %v5758_v31 = vpop.permute.xlu1 %1174  ;;  %v5760_v58 = vpop.permute.xlu0 %1180 }
 0x1d2   : > { %7833 = vst [vmem:[#allocation130_spill] sm:$0xff] %v5758_v31  ;;  %7834 = vst [vmem:[#allocation131_spill] sm:$0xff] %v5760_v58  ;;  %v558_v58 = vld [vmem:[#allocation2 + $0xda] sm:$0xff] }
 0x1d3   : > { %1398 = vrot.lane.b32.xlu1 %v523_v13, %s4683_s6  ;;  %1400 = vrot.lane.b32.xlu0 %v524_v7, %s4683_s6  ;;  %v557_v13 = vld [vmem:[#allocation2 + $0xca] sm:$0xff] }
 0x1d5   : > { %v5764_v47 = vpop.permute.xlu1 %1178  ;;  %v5766_v42 = vpop.permute.xlu0 %1248 }
 0x1d6   : > { %7835 = vst [vmem:[#allocation132_spill] sm:$0xff] %v5764_v47 }
 0x1d7   : > { %1526 = vrot.lane.b32.xlu1 %v555_v45, %s4684_s9  ;;  %1528 = vrot.lane.b32.xlu0 %v556_v20, %s4684_s9  ;;  %v527_v45 = vld [vmem:[#allocation2 + $0xe1] sm:$0xff] }
 0x1d9   : > { %v5770_v32 = vpop.permute.xlu1 %1182  ;;  %v5772_v31 = vpop.permute.xlu0 %1252 }
 0x1da   : > { %7836 = vst [vmem:[#allocation133_spill] sm:$0xff] %v5770_v32  ;;  %v528_v32 = vld [vmem:[#allocation2 + $0xf1] sm:$0xff] }
 0x1db   : > { %1402 = vrot.lane.b32.xlu1 %v525_v37, %s4683_s6  ;;  %1404 = vrot.lane.b32.xlu0 %v526_v48, %s4683_s6  ;;  %v559_v37 = vld [vmem:[#allocation2 + $0xe2] sm:$0xff] }
 0x1dd   : > { %v5776_v7 = vpop.permute.xlu1 %1250  ;;  %v5778_v47 = vpop.permute.xlu0 %1256 }
 0x1df   : > { %1530 = vrot.lane.b32.xlu1 %v557_v13, %s4684_s9  ;;  %1532 = vrot.lane.b32.xlu0 %v558_v58, %s4684_s9  ;;  %v529_v13 = vld [vmem:[#allocation2 + $0xf9] sm:$0xff] }
 0x1e1   : > { %v5782_v20 = vpop.permute.xlu1 %1254  ;;  %v5784_v39 = vpop.permute.xlu0 %1260 }
 0x1e3   : > { %1406 = vrot.lane.b32.xlu1 %v527_v45, %s4683_s6  ;;  %1408 = vrot.lane.b32.xlu0 %v528_v32, %s4683_s6  ;;  %v561_v45 = vld [vmem:[#allocation2 + $0xfa] sm:$0xff] }
 0x1e5   : > { %v5788_v48 = vpop.permute.xlu1 %1258  ;;  %v5790_v27 = vpop.permute.xlu0 %1264 }
 0x1e7   : > { %1534 = vrot.lane.b32.xlu1 %v559_v37, %s4684_s9  ;;  %1536 = vrot.lane.b32.xlu0 %v560_v5, %s4684_s9  ;;  %v531_v37 = vld [vmem:[#allocation2 + $0x111] sm:$0xff] }
 0x1e9   : > { %v5794_v58 = vpop.permute.xlu1 %1262  ;;  %v5796_v44 = vpop.permute.xlu0 %1268 }
 0x1ea   : > { %7837 = vst [vmem:[#allocation134_spill] sm:$0xff] %v5796_v44  ;;  %v7863_v44 = vld [vmem:[#allocation12_spill] sm:$0xff] }
 0x1eb   : > { %1410 = vrot.lane.b32.xlu1 %v529_v13, %s4683_s6  ;;  %1412 = vrot.lane.b32.xlu0 %v530_v6, %s4683_s6  ;;  %v563_v13 = vld [vmem:[#allocation2 + $0x112] sm:$0xff] }
 0x1ed   : > { %v5800_v32 = vpop.permute.xlu1 %1266  ;;  %v5802_v2 = vpop.permute.xlu0 %1272 }
 0x1ee   : > { %7838 = vst [vmem:[#allocation135_spill] sm:$0xff] %v5800_v32  ;;  %7839 = vst [vmem:[#allocation136_spill] sm:$0xff] %v5802_v2  ;;  %v534_v2 = vld [vmem:[#allocation2 + $0x139] sm:$0xff]  ;;  %v7864_v32 = vld [vmem:[#allocation63_spill] sm:$0xff] }
 0x1ef   : > { %1538 = vrot.lane.b32.xlu1 %v561_v45, %s4684_s9  ;;  %1540 = vrot.lane.b32.xlu0 %v562_v30, %s4684_s9  ;;  %v533_v45 = vld [vmem:[#allocation2 + $0x129] sm:$0xff] }
 0x1f1   : > { %v5806_v5 = vpop.permute.xlu1 %1270  ;;  %v5808_v3 = vpop.permute.xlu0 %1276 }
 0x1f2   : > { %7840 = vst [vmem:[#allocation137_spill] sm:$0xff] %v5806_v5  ;;  %7841 = vst [vmem:[#allocation138_spill] sm:$0xff] %v5808_v3  ;;  %v566_v3 = vld [vmem:[#allocation2 + $0x13a] sm:$0xff] }
 0x1f3   : > { %1414 = vrot.lane.b32.xlu1 %v531_v37, %s4683_s6  ;;  %1416 = vrot.lane.b32.xlu0 %v532_v12, %s4683_s6  ;;  %v565_v37 = vld [vmem:[#allocation2 + $0x12a] sm:$0xff] }
 0x1f5   : > { %v5812_v6 = vpop.permute.xlu1 %1274  ;;  %v5814_v26 = vpop.permute.xlu0 %1280 }
 0x1f6   : > { %7842 = vst [vmem:[#allocation139_spill] sm:$0xff] %v5812_v6  ;;  %7843 = vst [vmem:[#allocation140_spill] sm:$0xff] %v5814_v26  ;;  %v536_v26 = vld [vmem:[#allocation2 + $0x151] sm:$0xff] }
 0x1f7   : > { %1542 = vrot.lane.b32.xlu1 %v563_v13, %s4684_s9  ;;  %1544 = vrot.lane.b32.xlu0 %v564_v4, %s4684_s9  ;;  %v535_v13 = vld [vmem:[#allocation2 + $0x141] sm:$0xff] }
 0x1f9   : > { %v5818_v30 = vpop.permute.xlu1 %1278  ;;  %v5820_v5 = vpop.permute.xlu0 %1284 }
 0x1fa   : > { %7844 = vst [vmem:[#allocation141_spill] sm:$0xff] %v5818_v30  ;;  %7845 = vst [vmem:[#allocation142_spill] sm:$0xff] %v5820_v5  ;;  %v568_v5 = vld [vmem:[#allocation2 + $0x152] sm:$0xff] }
 0x1fb   : > { %1418 = vrot.lane.b32.xlu1 %v533_v45, %s4683_s6  ;;  %1420 = vrot.lane.b32.xlu0 %v534_v2, %s4683_s6  ;;  %v567_v45 = vld [vmem:[#allocation2 + $0x142] sm:$0xff] }
 0x1fd   : > { %v5824_v12 = vpop.permute.xlu1 %1282  ;;  %v5826_v6 = vpop.permute.xlu0 %1288 }
 0x1fe   : > { %7846 = vst [vmem:[#allocation143_spill] sm:$0xff] %v5824_v12  ;;  %7847 = vst [vmem:[#allocation144_spill] sm:$0xff] %v5826_v6  ;;  %v538_v6 = vld [vmem:[#allocation2 + $0x169] sm:$0xff] }
 0x1ff   : > { %1546 = vrot.lane.b32.xlu1 %v565_v37, %s4684_s9  ;;  %1548 = vrot.lane.b32.xlu0 %v566_v3, %s4684_s9  ;;  %v537_v37 = vld [vmem:[#allocation2 + $0x159] sm:$0xff] }
 0x201   : > { %v5830_v4 = vpop.permute.xlu1 %1286  ;;  %v5832_v30 = vpop.permute.xlu0 %1292 }
 0x202   : > { %7848 = vst [vmem:[#allocation145_spill] sm:$0xff] %v5830_v4  ;;  %7849 = vst [vmem:[#allocation146_spill] sm:$0xff] %v5832_v30  ;;  %v570_v30 = vld [vmem:[#allocation2 + $0x16a] sm:$0xff] }
 0x203   : > { %1422 = vrot.lane.b32.xlu1 %v535_v13, %s4683_s6  ;;  %1424 = vrot.lane.b32.xlu0 %v536_v26, %s4683_s6  ;;  %v569_v13 = vld [vmem:[#allocation2 + $0x15a] sm:$0xff] }
 0x205   : > { %v5836_v2 = vpop.permute.xlu1 %1290  ;;  %v5838_v12 = vpop.permute.xlu0 %1296 }
 0x206   : > { %7850 = vst [vmem:[#allocation147_spill] sm:$0xff] %v5836_v2  ;;  %7851 = vst [vmem:[#allocation148_spill] sm:$0xff] %v5838_v12 }
 0x207   : > { %1550 = vrot.lane.b32.xlu1 %v567_v45, %s4684_s9  ;;  %1552 = vrot.lane.b32.xlu0 %v568_v5, %s4684_s9  ;;  %v539_v45 = vld [vmem:[#allocation2 + $0x171] sm:$0xff] }
 0x209   : > { %v5842_v3 = vpop.permute.xlu1 %1294  ;;  %v5844_v4 = vpop.permute.xlu0 %1300 }
 0x20a   : > { %7852 = vst [vmem:[#allocation149_spill] sm:$0xff] %v5842_v3  ;;  %7853 = vst [vmem:[#allocation150_spill] sm:$0xff] %v5844_v4 }
 0x20b   : > { %1426 = vrot.lane.b32.xlu1 %v537_v37, %s4683_s6  ;;  %1428 = vrot.lane.b32.xlu0 %v538_v6, %s4683_s6  ;;  %v571_v37 = vld [vmem:[#allocation2 + $0x172] sm:$0xff] }
 0x20d   : > { %v5848_v26 = vpop.permute.xlu1 %1298  ;;  %v5850_v2 = vpop.permute.xlu0 %1304 }
 0x20e   : > { %7854 = vst [vmem:[#allocation151_spill] sm:$0xff] %v5848_v26  ;;  %7855 = vst [vmem:[#allocation152_spill] sm:$0xff] %v5850_v2  ;;  %v7861_v26 = vld [vmem:[#allocation4_spill] sm:$0xff] }
 0x20f   : > { %1554 = vrot.lane.b32.xlu1 %v569_v13, %s4684_s9  ;;  %1556 = vrot.lane.b32.xlu0 %v570_v30, %s4684_s9  ;;  %v542_v30 = vld [vmem:[#allocation2 + $0x199] sm:$0xff] }
 0x211   : > { %v5854_v5 = vpop.permute.xlu1 %1302  ;;  %v5856_v12 = vpop.permute.xlu0 %1308 }
 0x212   : > { %7856 = vst [vmem:[#allocation153_spill] sm:$0xff] %v5854_v5  ;;  %7857 = vst [vmem:[#allocation154_spill] sm:$0xff] %v5856_v12  ;;  %v7860_v5 = vld [vmem:[#allocation3_spill] sm:$0xff] }
 0x213   : > { %1430 = vrot.lane.b32.xlu1 %v539_v45, %s4683_s6  ;;  %1432 = vrot.lane.b32.xlu0 %v5399_v56, %s4683_s6  ;;  %v574_v56 = vld [vmem:[#allocation2 + $0x19a] sm:$0xff] }
 0x215   : > { %v5861_v6 = vpop.permute.xlu1 %1306  ;;  %v1377_v4 = vpop.permute.xlu0 %1376 }
 0x216   : > { %7858 = vst [vmem:[#allocation155_spill] sm:$0xff] %v5861_v6  ;;  %v543_v6 = vld [vmem:[#allocation2 + $0x1a1] sm:$0xff] }
 0x217   : > { %1558 = vrot.lane.b32.xlu1 %v571_v37, %s4684_s9  ;;  %1560 = vrot.lane.b32.xlu0 %v5531_v21, %s4684_s9  ;;  %v287_v37 = vld [vmem:[#allocation2] sm:$0xff]  ;;  %v288_v21 = vld [vmem:[#allocation2 + $0x8] sm:$0xff] }
 0x218   : > { %v1601_v3 = vsel %vm171_vm0, %v288_v21, %v7861_v26  ;;  %v7867_v21 = vld [vmem:[#allocation10_spill] sm:$0xff] }
 0x219   : > { %v5866_v13 = vpop.permute.xlu1 %1310  ;;  %v5868_v2 = vpop.permute.xlu0 %1380 }
 0x21a   : > { %7859 = vst [vmem:[#allocation156_spill] sm:$0xff] %v5866_v13 }
 0x21b   : > { %1434 = vrot.lane.b32.xlu1 %v5413_v60, %s4683_s6  ;;  %1436 = vrot.lane.b32.xlu0 %v542_v30, %s4683_s6  ;;  %v1600_v60 = vsel %vm171_vm0, %v287_v37, %v7860_v5  ;;  %v1604_v5 = vsel %vm171_vm0, %v7765_v19, %v7865_v38  ;;  %v7866_v37 = vld [vmem:[#allocation68_spill] sm:$0xff]  ;;  %v7869_v19 = vld [vmem:[#allocation11_spill] sm:$0xff] }
 0x21c   : > { %v1634_v51 = vsel %vm1632_vm4, %v1601_v3, %v7866_v37  ;;  %v1606_v38 = vsel %vm171_vm0, %v7766_v34, %v7869_v19  ;;  %v7870_v3 = vld [vmem:[#allocation67_spill] sm:$0xff] }
 0x21d   : > { %v1379_v45 = vpop.permute.xlu1 %1378  ;;  %v5873_v12 = vpop.permute.xlu0 %1384 }
 0x21f   : > { %1562 = vrot.lane.b32.xlu1 %v5545_v28, %s4684_s9  ;;  %1564 = vrot.lane.b32.xlu0 %v574_v56, %s4684_s9  ;;  %v7862_v28 = vld [vmem:[#allocation6_spill] sm:$0xff]  ;;  %v1633_v56 = vsel %vm1632_vm4, %v1600_v60, %v7864_v32  ;;  %v1667_v32 = vsel %vm1665_vm5, %v1634_v51, %v5397_v55 }
 0x220   : > { %v1602_v62 = vsel %vm171_vm0, %v7863_v44, %v7862_v28  ;;  %v1603_v44 = vsel %vm171_vm0, %v7868_v14, %v7867_v21  ;;  %v1700_v28 = vsel %vm1698_vm6, %v1667_v32, %v5529_v29  ;;  %v4635_v21 = vld [vmem:[#allocation2 + $0x38] sm:$0xff] }
 0x221   : > { %v1383_v13 = vpop.permute.xlu1 %1382  ;;  %v5880_v30 = vpop.permute.xlu0 %1388  ;;  %v1733_v51 = vsel %vm1731_vm7, %v1700_v28, %v5661_v15 }
 0x223   : > { %1438 = vrot.lane.b32.xlu1 %v543_v6, %s4683_s6  ;;  %v1666_v6 = vsel %vm1665_vm5, %v1633_v56, %v5383_v52  ;;  %v1635_v52 = vsel %vm1632_vm4, %v1602_v62, %v7870_v3 }
 0x224   : > { %v1699_v60 = vsel %vm1698_vm6, %v1666_v6, %v5515_v22  ;;  %v7871_v22 = vld [vmem:[#allocation71_spill] sm:$0xff]  ;;  %v1668_v29 = vsel %vm1665_vm5, %v1635_v52, %v5391_v54 }
 0x225   : > { %v1387_v26 = vpop.permute.xlu1 %1386  ;;  %v1732_v14 = vsel %vm1731_vm7, %v1699_v60, %v5647_v11  ;;  %v1507_v56 = vpop.permute.xlu0 %1506  ;;  %v1636_v34 = vsel %vm1632_vm4, %v1603_v44, %v7871_v22  ;;  %v1766_v11 = vsel %vm1764_vm8, %v1733_v51, %v5776_v7  ;;  %v7872_v44 = vld [vmem:[#allocation14_spill] sm:$0xff]  ;;  %v7874_v60 = vld [vmem:[#allocation72_spill] sm:$0xff] }
 0x226   : > { %v1765_v55 = vsel %vm1764_vm8, %v1732_v14, %v5766_v42  ;;  %v1669_v15 = vsel %vm1665_vm5, %v1636_v34, %v5407_v57  ;;  %v1701_v42 = vsel %vm1698_vm6, %v1668_v29, %v5523_v24  ;;  %v1799_v37 = vsel %vm1797_vm9, %v1766_v11, %v1379_v45  ;;  %v7873_v24 = vld [vmem:[#allocation70_spill] sm:$0xff]  ;;  %v7876_v11 = vld [vmem:[#allocation17_spill] sm:$0xff] }
 0x227   : > { %1566 = vrot.lane.b32.xlu1 %v575_v17, %s4684_s9  ;;  %v1798_v62 = vsel %vm1797_vm9, %v1765_v55, %v1377_v4  ;;  %v1605_v54 = vsel %vm171_vm0, %v4635_v21, %v7872_v44  ;;  %v1702_v7 = vsel %vm1698_vm6, %v1669_v15, %v5539_v35  ;;  %v1734_v4 = vsel %vm1731_vm7, %v1701_v42, %v5655_v41  ;;  %v7875_v41 = vld [vmem:[#allocation73_spill] sm:$0xff]  ;;  %v7877_v15 = vld [vmem:[#allocation15_spill] sm:$0xff] }
 0x228   : > { %v1832_v32 = vsel %vm1830_vm10, %v1799_v37, %v1507_v56  ;;  %v1637_v45 = vsel %vm1632_vm4, %v1604_v5, %v7873_v24  ;;  %v1639_v19 = vsel %vm1632_vm4, %v1606_v38, %v7874_v60  ;;  %v1735_v3 = vsel %vm1731_vm7, %v1702_v7, %v5674_v33 }
 0x229   : > { %v1505_v17 = vpop.permute.xlu1 %1504  ;;  %v1511_v57 = vpop.permute.xlu0 %1510  ;;  %v1767_v35 = vsel %vm1764_vm8, %v1734_v4, %v5772_v31  ;;  %v1638_v52 = vsel %vm1632_vm4, %v1605_v54, %v7875_v41  ;;  %v1670_v28 = vsel %vm1665_vm5, %v1637_v45, %v5401_v50  ;;  %v1768_v5 = vsel %vm1764_vm8, %v1735_v3, %v5782_v20  ;;  %v4638_v45 = vld [vmem:[#allocation2 + $0x68] sm:$0xff]  ;;  %v4639_v3 = vld [vmem:[#allocation2 + $0x78] sm:$0xff] }
 0x22a   : > { %v1831_v6 = vsel %vm1830_vm10, %v1798_v62, %v1505_v17  ;;  %v1800_v38 = vsel %vm1797_vm9, %v1767_v35, %v5868_v2  ;;  %v1671_v33 = vsel %vm1665_vm5, %v1638_v52, %v5417_v61  ;;  %v1703_v31 = vsel %vm1698_vm6, %v1670_v28, %v5533_v18  ;;  %v7880_v35 = vld [vmem:[#allocation19_spill] sm:$0xff] }
 0x22b   : > { %4496 = vmatprep.mubr.msk.f32.mxu0 %vm1863_vm11, %v1831_v6  ;;  %v1801_v56 = vsel %vm1797_vm9, %v1768_v5, %v1383_v13  ;;  %v1672_v50 = vsel %vm1665_vm5, %v1639_v19, %v5409_v59  ;;  %v1704_v20 = vsel %vm1698_vm6, %v1671_v33, %v5549_v49  ;;  %v1736_v2 = vsel %vm1731_vm7, %v1703_v31, %v5663_v40  ;;  %v7878_v6 = vld [vmem:[#allocation74_spill] sm:$0xff]  ;;  %v7881_v5 = vld [vmem:[#allocation7_spill] sm:$0xff] }
 0x22c   : > { %4497 = vmatmul.mubr.msk.f32.vlgmr.msra.gmra.mrb[0].mxu0 %vm1863_vm11, %v1832_v32  ;;  %v1834_v55 = vsel %vm1830_vm10, %v1801_v56, %v1511_v57  ;;  %v1705_v61 = vsel %vm1698_vm6, %v1672_v50, %v5541_v23  ;;  %v1737_v18 = vsel %vm1731_vm7, %v1704_v20, %v5687_v9  ;;  %v1769_v59 = vsel %vm1764_vm8, %v1736_v2, %v5778_v47  ;;  %v4636_v47 = vld [vmem:[#allocation2 + $0x50] sm:$0xff]  ;;  %v7883_v33 = vld [vmem:[#allocation58_spill] sm:$0xff]  ;;  %v7886_v2 = vld [vmem:[#allocation56_spill] sm:$0xff] }
 0x22d   : > { %v1509_v14 = vpop.permute.xlu1 %1508  ;;  %v1515_v22 = vpop.permute.xlu0 %1514  ;;  %v1738_v49 = vsel %vm1731_vm7, %v1705_v61, %v5676_v8  ;;  %v1770_v40 = vsel %vm1764_vm8, %v1737_v18, %v5788_v48  ;;  %v1802_v13 = vsel %vm1797_vm9, %v1769_v59, %v5873_v12  ;;  %v1607_v62 = vsel %vm171_vm0, %v4636_v47, %v7876_v11  ;;  %v7887_v61 = vld [vmem:[#allocation134_spill] sm:$0xff]  ;;  %v4641_v11 = vld [vmem:[#allocation2 + $0x90] sm:$0xff] }
 0x22e   : > { %v1833_v51 = vsel %vm1830_vm10, %v1800_v38, %v1509_v14  ;;  %v1771_v23 = vsel %vm1764_vm8, %v1738_v49, %v5784_v39  ;;  %v1803_v9 = vsel %vm1797_vm9, %v1770_v40, %v1387_v26  ;;  %v1640_v12 = vsel %vm1632_vm4, %v1607_v62, %v5293_v0  ;;  %v4637_v26 = vld [vmem:[#allocation2 + $0x60] sm:$0xff]  ;;  %v7882_v14 = vld [vmem:[#allocation96_spill] sm:$0xff]  ;;  %v7890_v62 = vld [vmem:[#allocation23_spill] sm:$0xff] }
 0x22f   : > { %4499 = vmatprep.mubr.msk.f32.mxu0 %vm1863_vm11, %v1833_v51  ;;  %v1804_v8 = vsel %vm1797_vm9, %v1771_v23, %v5880_v30  ;;  %v1836_v48 = vsel %vm1830_vm10, %v1803_v9, %v1515_v22  ;;  %v1608_v42 = vsel %vm171_vm0, %v4637_v26, %v7877_v15  ;;  %v1673_v37 = vsel %vm1665_vm5, %v1640_v12, %v5425_v63  ;;  %v7884_v51 = vld [vmem:[#allocation5_spill] sm:$0xff]  ;;  %v7889_v9 = vld [vmem:[#allocation76_spill] sm:$0xff] }
 0x230   : > { %4500 = vmatmul.mubr.msk.f32.gmra.mrb[2].mxu0 %vm1863_vm11, %v1834_v55  ;;  %v1641_v21 = vsel %vm1632_vm4, %v1608_v42, %v7878_v6  ;;  %v1706_v0 = vsel %vm1698_vm6, %v1673_v37, %v5557_v46  ;;  %v4640_v49 = vld [vmem:[#allocation2 + $0x80] sm:$0xff]  ;;  %v7895_v6 = vld [vmem:[#allocation62_spill] sm:$0xff] }
 0x231   : > { %v1513_v34 = vpop.permute.xlu1 %1512  ;;  %v1517_v17 = vpop.permute.xlu0 %1516  ;;  %v1674_v44 = vsel %vm1665_vm5, %v1641_v21, %v5419_v53  ;;  %v1739_v54 = vsel %vm1731_vm7, %v1706_v0, %v5693_v10  ;;  %v7879_v10 = vld [vmem:[#allocation21_spill] sm:$0xff] }
 0x232   : > { %v1835_v29 = vsel %vm1830_vm10, %v1802_v13, %v1513_v34  ;;  %v1837_v39 = vsel %vm1830_vm10, %v1804_v8, %v1517_v17  ;;  %v1707_v4 = vsel %vm1698_vm6, %v1674_v44, %v5551_v16  ;;  %v1772_v63 = vsel %vm1764_vm8, %v1739_v54, %v5794_v58  ;;  %v7888_v40 = vld [vmem:[#allocation25_spill] sm:$0xff] }
 0x233   : > { %4502 = vmatprep.mubr.msk.f32.mxu0 %vm1863_vm11, %v1835_v29  ;;  %v1740_v32 = vsel %vm1731_vm7, %v1707_v4, %v5689_v43  ;;  %v1609_v60 = vsel %vm171_vm0, %v4638_v45, %v7879_v10  ;;  %v1611_v13 = vsel %vm171_vm0, %v4640_v49, %v7888_v40  ;;  %v1612_v8 = vsel %vm171_vm0, %v4641_v11, %v7890_v62  ;;  %v7893_v15 = vld [vmem:[#allocation13_spill] sm:$0xff]  ;;  %v4642_v10 = vld [vmem:[#allocation2 + $0x98] sm:$0xff]  ;;  %v7911_v40 = vld [vmem:[#allocation138_spill] sm:$0xff] }
 0x234   : > { %4503 = vmatmul.mubr.msk.f32.gmra.mrb[4].mxu0 %vm1863_vm11, %v1836_v48  ;;  %v1773_v46 = vsel %vm1764_vm8, %v1740_v32, %v5790_v27  ;;  %v1642_v43 = vsel %vm1632_vm4, %v1609_v60, %v5301_v25  ;;  %v1610_v27 = vsel %vm171_vm0, %v4639_v3, %v7880_v35  ;;  %v1644_v29 = vsel %vm1632_vm4, %v1611_v13, %v7889_v9  ;;  %v7891_v48 = vld [vmem:[#allocation98_spill] sm:$0xff]  ;;  %v7894_v37 = vld [vmem:[#allocation97_spill] sm:$0xff]  ;;  %v7913_v62 = vld [vmem:[#allocation80_spill] sm:$0xff] }
 0x235   : > { %v1391_v30 = vpop.permute.xlu1 %1390  ;;  %4505 = vmatprep.mubr.msk.f32.mxu0 %vm1863_vm11, %v1837_v39  ;;  %v1393_v7 = vpop.permute.xlu0 %1392  ;;  %v1675_v41 = vsel %vm1665_vm5, %v1642_v43, %v5433_v1  ;;  %v1643_v28 = vsel %vm1632_vm4, %v1610_v27, %v5295_v36  ;;  %v7885_v1 = vld [vmem:[#allocation135_spill] sm:$0xff]  ;;  %v1677_v17 = vsel %vm1665_vm5, %v1644_v29, %v7891_v48  ;;  %v7896_v44 = vld [vmem:[#allocation9_spill] sm:$0xff]  ;;  %v4643_v27 = vld [vmem:[#allocation2 + $0xa8] sm:$0xff] }
 0x236   : > { %v1805_v57 = vsel %vm1797_vm9, %v1772_v63, %v1391_v30  ;;  %v1806_v16 = vsel %vm1797_vm9, %v1773_v46, %v1393_v7  ;;  %v1708_v38 = vsel %vm1698_vm6, %v1675_v41, %v7881_v5  ;;  %v1676_v25 = vsel %vm1665_vm5, %v1643_v28, %v7882_v14  ;;  %v7892_v39 = vld [vmem:[#allocation75_spill] sm:$0xff]  ;;  %v7897_v7 = vld [vmem:[#allocation137_spill] sm:$0xff]  ;;  %v7898_v63 = vld [vmem:[#allocation60_spill] sm:$0xff] }
 0x237   : > { %v1741_v31 = vsel %vm1731_vm7, %v1708_v38, %v7883_v33  ;;  %v1709_v50 = vsel %vm1698_vm6, %v1676_v25, %v7884_v51  ;;  %v1645_v26 = vsel %vm1632_vm4, %v1612_v8, %v7892_v39  ;;  %v1710_v42 = vsel %vm1698_vm6, %v1677_v17, %v7893_v15  ;;  %v7899_v46 = vld [vmem:[#allocation136_spill] sm:$0xff]  ;;  %v7900_v60 = vld [vmem:[#allocation29_spill] sm:$0xff]  ;;  %v7902_v41 = vld [vmem:[#allocation27_spill] sm:$0xff] }
 0x238   : > { %v1774_v20 = vsel %vm1764_vm8, %v1741_v31, %v7885_v1  ;;  %v1742_v55 = vsel %vm1731_vm7, %v1709_v50, %v7886_v2  ;;  %v1678_v30 = vsel %vm1665_vm5, %v1645_v26, %v7894_v37  ;;  %v1743_v21 = vsel %vm1731_vm7, %v1710_v42, %v7895_v6  ;;  %v7903_v28 = vld [vmem:[#allocation100_spill] sm:$0xff]  ;;  %v7904_v14 = vld [vmem:[#allocation77_spill] sm:$0xff]  ;;  %v7907_v50 = vld [vmem:[#allocation66_spill] sm:$0xff] }
 0x239   : > { %v1519_v24 = vpop.permute.xlu1 %1518  ;;  %v1521_v19 = vpop.permute.xlu0 %1520  ;;  %v1775_v18 = vsel %vm1764_vm8, %v1742_v55, %v7887_v61  ;;  %v1711_v54 = vsel %vm1698_vm6, %v1678_v30, %v7896_v44  ;;  %v1776_v4 = vsel %vm1764_vm8, %v1743_v21, %v7897_v7  ;;  %v7905_v33 = vld [vmem:[#allocation20_spill] sm:$0xff]  ;;  %v7912_v9 = vld [vmem:[#allocation33_spill] sm:$0xff]  ;;  %v7915_v26 = vld [vmem:[#allocation102_spill] sm:$0xff] }
 0x23a   : > { %v1838_v53 = vsel %vm1830_vm10, %v1805_v57, %v1519_v24  ;;  %v1839_v58 = vsel %vm1830_vm10, %v1806_v16, %v1521_v19  ;;  %v1744_v32 = vsel %vm1731_vm7, %v1711_v54, %v7898_v63  ;;  %v1613_v16 = vsel %vm171_vm0, %v4642_v10, %v7900_v60  ;;  %v7908_v2 = vld [vmem:[#allocation16_spill] sm:$0xff]  ;;  %v4645_v17 = vld [vmem:[#allocation2 + $0xc0] sm:$0xff]  ;;  %v7916_v37 = vld [vmem:[#allocation79_spill] sm:$0xff] }
 0x23b   : > { %4506 = vmatmul.mubr.msk.f32.gmra.mrb[6].mxu0 %vm1863_vm11, %v1838_v53  ;;  %v1777_v53 = vsel %vm1764_vm8, %v1744_v32, %v7899_v46  ;;  %v7910_v61 = vld [vmem:[#allocation64_spill] sm:$0xff]  ;;  %v7919_v54 = vld [vmem:[#allocation118_spill] sm:$0xff]  ;;  %v7922_v46 = vld [vmem:[#allocation69_spill] sm:$0xff] }
 0x23c   : > { %4508 = vmatprep.mubr.msk.f32.mxu0 %vm1863_vm11, %v1839_v58  ;;  %v7901_v58 = vld [vmem:[#allocation78_spill] sm:$0xff]  ;;  %v7917_v6 = vld [vmem:[#allocation24_spill] sm:$0xff] }
 0x23d   : > { %v1395_v52 = vpop.permute.xlu1 %1394  ;;  %v1397_v56 = vpop.permute.xlu0 %1396  ;;  %v1646_v3 = vsel %vm1632_vm4, %v1613_v16, %v7901_v58  ;;  %v7920_v63 = vld [vmem:[#allocation22_spill] sm:$0xff]  ;;  %v7923_v60 = vld [vmem:[#allocation140_spill] sm:$0xff]  ;;  %v7924_v58 = vld [vmem:[#allocation37_spill] sm:$0xff] }
 0x23e   : > { %v1807_v36 = vsel %vm1797_vm9, %v1774_v20, %v1395_v52  ;;  %v1808_v34 = vsel %vm1797_vm9, %v1775_v18, %v1397_v56  ;;  %v1614_v52 = vsel %vm171_vm0, %v4643_v27, %v7902_v41  ;;  %v1679_v5 = vsel %vm1665_vm5, %v1646_v3, %v7903_v28  ;;  %v7906_v56 = vld [vmem:[#allocation99_spill] sm:$0xff]  ;;  %v7925_v41 = vld [vmem:[#allocation82_spill] sm:$0xff] }
 0x23f   : > { %v1647_v25 = vsel %vm1632_vm4, %v1614_v52, %v7904_v14  ;;  %v1712_v31 = vsel %vm1698_vm6, %v1679_v5, %v7905_v33  ;;  %v4647_v5 = vld [vmem:[#allocation2 + $0xd8] sm:$0xff] }
 0x240   : > { %v1680_v51 = vsel %vm1665_vm5, %v1647_v25, %v7906_v56  ;;  %v1745_v1 = vsel %vm1731_vm7, %v1712_v31, %v7907_v50  ;;  %v7927_v25 = vld [vmem:[#allocation104_spill] sm:$0xff]  ;;  %v7928_v56 = vld [vmem:[#allocation81_spill] sm:$0xff] }
 0x241   : > { %v1523_v22 = vpop.permute.xlu1 %1522  ;;  %v1525_v23 = vpop.permute.xlu0 %1524  ;;  %v1713_v55 = vsel %vm1698_vm6, %v1680_v51, %v7908_v2  ;;  %v7929_v50 = vld [vmem:[#allocation28_spill] sm:$0xff] }
 0x242   : > { %v1840_v59 = vsel %vm1830_vm10, %v1807_v36, %v1523_v22  ;;  %v1841_v47 = vsel %vm1830_vm10, %v1808_v34, %v1525_v23  ;;  %v7909_v36 = vld [vmem:[#allocation139_spill] sm:$0xff]  ;;  %v1746_v18 = vsel %vm1731_vm7, %v1713_v55, %v7910_v61  ;;  %v7931_v55 = vld [vmem:[#allocation120_spill] sm:$0xff]  ;;  %v7932_v61 = vld [vmem:[#allocation26_spill] sm:$0xff] }
 0x243   : > { %4509 = vmatmul.mubr.msk.f32.gmra.mrb[8].mxu0 %vm1863_vm11, %v1840_v59  ;;  %v1778_v22 = vsel %vm1764_vm8, %v1745_v1, %v7909_v36  ;;  %v1779_v13 = vsel %vm1764_vm8, %v1746_v18, %v7911_v40  ;;  %v4644_v23 = vld [vmem:[#allocation2 + $0xb0] sm:$0xff] }
 0x244   : > { %4511 = vmatprep.mubr.msk.f32.mxu0 %vm1863_vm11, %v1841_v47  ;;  %v1615_v29 = vsel %vm171_vm0, %v4644_v23, %v7912_v9  ;;  %v7934_v40 = vld [vmem:[#allocation119_spill] sm:$0xff]  ;;  %v7935_v9 = vld [vmem:[#allocation142_spill] sm:$0xff] }
 0x245   : > { %v1399_v12 = vpop.permute.xlu1 %1398  ;;  %v1401_v0 = vpop.permute.xlu0 %1400  ;;  %v1648_v8 = vsel %vm1632_vm4, %v1615_v29, %v7913_v62  ;;  %v7936_v62 = vld [vmem:[#allocation41_spill] sm:$0xff] }
 0x246   : > { %v1809_v57 = vsel %vm1797_vm9, %v1776_v4, %v1399_v12  ;;  %v1810_v19 = vsel %vm1797_vm9, %v1777_v53, %v1401_v0  ;;  %v7914_v12 = vld [vmem:[#allocation31_spill] sm:$0xff]  ;;  %v1681_v15 = vsel %vm1665_vm5, %v1648_v8, %v7915_v26  ;;  %v7918_v0 = vld [vmem:[#allocation101_spill] sm:$0xff] }
 0x247   : > { %v1616_v39 = vsel %vm171_vm0, %v4645_v17, %v7914_v12  ;;  %v1714_v21 = vsel %vm1698_vm6, %v1681_v15, %v7917_v6  ;;  %v7937_v12 = vld [vmem:[#allocation84_spill] sm:$0xff]  ;;  %v4649_v15 = vld [vmem:[#allocation2 + $0xf0] sm:$0xff] }
 0x248   : > { %v1649_v30 = vsel %vm1632_vm4, %v1616_v39, %v7916_v37  ;;  %v1747_v7 = vsel %vm1731_vm7, %v1714_v21, %v7919_v54  ;;  %v7941_v54 = vld [vmem:[#allocation32_spill] sm:$0xff] }
 0x249   : > { %v1527_v24 = vpop.permute.xlu1 %1526  ;;  %v1529_v43 = vpop.permute.xlu0 %1528  ;;  %v1682_v44 = vsel %vm1665_vm5, %v1649_v30, %v7918_v0  ;;  %v7939_v30 = vld [vmem:[#allocation106_spill] sm:$0xff]  ;;  %v7940_v0 = vld [vmem:[#allocation83_spill] sm:$0xff] }
 0x24a   : > { %v1842_v45 = vsel %vm1830_vm10, %v1809_v57, %v1527_v24  ;;  %v1843_v35 = vsel %vm1830_vm10, %v1810_v19, %v1529_v43  ;;  %v1715_v32 = vsel %vm1698_vm6, %v1682_v44, %v7920_v63  ;;  %v7921_v57 = vld [vmem:[#allocation141_spill] sm:$0xff]  ;;  %v4646_v43 = vld [vmem:[#allocation2 + $0xc8] sm:$0xff] }
 0x24b   : > { %4512 = vmatmul.mubr.msk.f32.gmra.mrb[10].mxu0 %vm1863_vm11, %v1842_v45  ;;  %v1780_v24 = vsel %vm1764_vm8, %v1747_v7, %v7921_v57  ;;  %v1748_v53 = vsel %vm1731_vm7, %v1715_v32, %v7922_v46  ;;  %v1617_v3 = vsel %vm171_vm0, %v4646_v43, %v7924_v58  ;;  %v7943_v32 = vld [vmem:[#allocation122_spill] sm:$0xff]  ;;  %v7947_v58 = vld [vmem:[#allocation144_spill] sm:$0xff] }
 0x24c   : > { %4514 = vmatprep.mubr.msk.f32.mxu0 %vm1863_vm11, %v1843_v35  ;;  %v1781_v16 = vsel %vm1764_vm8, %v1748_v53, %v7923_v60  ;;  %v1650_v52 = vsel %vm1632_vm4, %v1617_v3, %v7925_v41  ;;  %v7944_v46 = vld [vmem:[#allocation30_spill] sm:$0xff]  ;;  %v7946_v60 = vld [vmem:[#allocation121_spill] sm:$0xff] }
 0x24d   : > { %v1403_v38 = vpop.permute.xlu1 %1402  ;;  %v1405_v20 = vpop.permute.xlu0 %1404  ;;  %v1683_v33 = vsel %vm1665_vm5, %v1650_v52, %v7927_v25  ;;  %v7948_v41 = vld [vmem:[#allocation45_spill] sm:$0xff] }
 0x24e   : > { %v1811_v59 = vsel %vm1797_vm9, %v1778_v22, %v1403_v38  ;;  %v1812_v47 = vsel %vm1797_vm9, %v1779_v13, %v1405_v20  ;;  %v7926_v38 = vld [vmem:[#allocation35_spill] sm:$0xff]  ;;  %v1716_v1 = vsel %vm1698_vm6, %v1683_v33, %v7929_v50  ;;  %v4651_v33 = vld [vmem:[#allocation2 + $0x108] sm:$0xff] }
 0x24f   : > { %v1618_v14 = vsel %vm171_vm0, %v4647_v5, %v7926_v38  ;;  %v7930_v20 = vld [vmem:[#allocation103_spill] sm:$0xff]  ;;  %v1749_v36 = vsel %vm1731_vm7, %v1716_v1, %v7931_v55  ;;  %v7949_v38 = vld [vmem:[#allocation86_spill] sm:$0xff]  ;;  %v7953_v55 = vld [vmem:[#allocation36_spill] sm:$0xff] }
 0x250   : > { %v1651_v51 = vsel %vm1632_vm4, %v1618_v14, %v7928_v56 }
 0x251   : > { %v1531_v49 = vpop.permute.xlu1 %1530  ;;  %v1533_v11 = vpop.permute.xlu0 %1532  ;;  %v1684_v2 = vsel %vm1665_vm5, %v1651_v51, %v7930_v20  ;;  %v7951_v51 = vld [vmem:[#allocation108_spill] sm:$0xff]  ;;  %v7952_v20 = vld [vmem:[#allocation85_spill] sm:$0xff] }
 0x252   : > { %v1844_v34 = vsel %vm1830_vm10, %v1811_v59, %v1531_v49  ;;  %v1845_v48 = vsel %vm1830_vm10, %v1812_v47, %v1533_v11  ;;  %v1717_v18 = vsel %vm1698_vm6, %v1684_v2, %v7932_v61  ;;  %v7933_v59 = vld [vmem:[#allocation143_spill] sm:$0xff]  ;;  %v4648_v11 = vld [vmem:[#allocation2 + $0xe0] sm:$0xff] }
 0x253   : > { %4515 = vmatmul.mubr.msk.f32.gmra.mrb[12].mxu0 %vm1863_vm11, %v1844_v34  ;;  %v1782_v49 = vsel %vm1764_vm8, %v1749_v36, %v7933_v59  ;;  %v1750_v13 = vsel %vm1731_vm7, %v1717_v18, %v7934_v40  ;;  %v1619_v8 = vsel %vm171_vm0, %v4648_v11, %v7936_v62  ;;  %v7955_v18 = vld [vmem:[#allocation124_spill] sm:$0xff]  ;;  %v7956_v40 = vld [vmem:[#allocation34_spill] sm:$0xff] }
 0x254   : > { %4517 = vmatprep.mubr.msk.f32.mxu0 %vm1863_vm11, %v1845_v48  ;;  %v1783_v29 = vsel %vm1764_vm8, %v1750_v13, %v7935_v9  ;;  %v1652_v39 = vsel %vm1632_vm4, %v1619_v8, %v7937_v12  ;;  %v7958_v9 = vld [vmem:[#allocation123_spill] sm:$0xff]  ;;  %v7959_v62 = vld [vmem:[#allocation146_spill] sm:$0xff]  ;;  %v7960_v12 = vld [vmem:[#allocation49_spill] sm:$0xff] }
 0x255   : > { %v1407_v42 = vpop.permute.xlu1 %1406  ;;  %v1409_v4 = vpop.permute.xlu0 %1408  ;;  %v1685_v6 = vsel %vm1665_vm5, %v1652_v39, %v7939_v30 }
 0x256   : > { %v1813_v45 = vsel %vm1797_vm9, %v1780_v24, %v1407_v42  ;;  %v1814_v35 = vsel %vm1797_vm9, %v1781_v16, %v1409_v4  ;;  %v7938_v42 = vld [vmem:[#allocation39_spill] sm:$0xff]  ;;  %v1718_v7 = vsel %vm1698_vm6, %v1685_v6, %v7941_v54  ;;  %v7942_v4 = vld [vmem:[#allocation105_spill] sm:$0xff] }
 0x257   : > { %v1620_v37 = vsel %vm171_vm0, %v4649_v15, %v7938_v42  ;;  %v1751_v57 = vsel %vm1731_vm7, %v1718_v7, %v7943_v32  ;;  %v7961_v42 = vld [vmem:[#allocation88_spill] sm:$0xff]  ;;  %v4653_v6 = vld [vmem:[#allocation2 + $0x120] sm:$0xff] }
 0x258   : > { %v1653_v44 = vsel %vm1632_vm4, %v1620_v37, %v7940_v0  ;;  %v7965_v32 = vld [vmem:[#allocation40_spill] sm:$0xff] }
 0x259   : > { %v1535_v10 = vpop.permute.xlu1 %1534  ;;  %v1537_v27 = vpop.permute.xlu0 %1536  ;;  %v1686_v63 = vsel %vm1665_vm5, %v1653_v44, %v7942_v4  ;;  %v7963_v44 = vld [vmem:[#allocation110_spill] sm:$0xff]  ;;  %v7964_v4 = vld [vmem:[#allocation87_spill] sm:$0xff] }
 0x25a   : > { %v1846_v19 = vsel %vm1830_vm10, %v1813_v45, %v1535_v10  ;;  %v1847_v28 = vsel %vm1830_vm10, %v1814_v35, %v1537_v27  ;;  %v1719_v53 = vsel %vm1698_vm6, %v1686_v63, %v7944_v46  ;;  %v7945_v45 = vld [vmem:[#allocation145_spill] sm:$0xff]  ;;  %v4650_v27 = vld [vmem:[#allocation2 + $0xf8] sm:$0xff] }
 0x25b   : > { %4518 = vmatmul.mubr.msk.f32.gmra.mrb[14].mxu0 %vm1863_vm11, %v1846_v19  ;;  %v1784_v10 = vsel %vm1764_vm8, %v1751_v57, %v7945_v45  ;;  %v1752_v16 = vsel %vm1731_vm7, %v1719_v53, %v7946_v60  ;;  %v1621_v52 = vsel %vm171_vm0, %v4650_v27, %v7948_v41  ;;  %v7967_v53 = vld [vmem:[#allocation126_spill] sm:$0xff]  ;;  %v7971_v41 = vld [vmem:[#allocation148_spill] sm:$0xff] }
 0x25c   : > { %4520 = vmatprep.mubr.msk.f32.mxu0 %vm1863_vm11, %v1847_v28  ;;  %v1785_v3 = vsel %vm1764_vm8, %v1752_v16, %v7947_v58  ;;  %v1654_v14 = vsel %vm1632_vm4, %v1621_v52, %v7949_v38  ;;  %v7968_v60 = vld [vmem:[#allocation38_spill] sm:$0xff]  ;;  %v7970_v58 = vld [vmem:[#allocation125_spill] sm:$0xff] }
 0x25d   : > { %v1411_v31 = vpop.permute.xlu1 %1410  ;;  %v1413_v22 = vpop.permute.xlu0 %1412  ;;  %v1687_v50 = vsel %vm1665_vm5, %v1654_v14, %v7951_v51  ;;  %v7972_v38 = vld [vmem:[#allocation53_spill] sm:$0xff] }
 0x25e   : > { %v1815_v34 = vsel %vm1797_vm9, %v1782_v49, %v1411_v31  ;;  %v1816_v48 = vsel %vm1797_vm9, %v1783_v29, %v1413_v22  ;;  %v7950_v31 = vld [vmem:[#allocation43_spill] sm:$0xff]  ;;  %v1720_v36 = vsel %vm1698_vm6, %v1687_v50, %v7953_v55  ;;  %v4655_v50 = vld [vmem:[#allocation2 + $0x138] sm:$0xff] }
 0x25f   : > { %v1622_v56 = vsel %vm171_vm0, %v4651_v33, %v7950_v31  ;;  %v7954_v22 = vld [vmem:[#allocation107_spill] sm:$0xff]  ;;  %v1753_v59 = vsel %vm1731_vm7, %v1720_v36, %v7955_v18  ;;  %v7973_v31 = vld [vmem:[#allocation90_spill] sm:$0xff]  ;;  %v7977_v18 = vld [vmem:[#allocation44_spill] sm:$0xff] }
 0x260   : > { %v1655_v2 = vsel %vm1632_vm4, %v1622_v56, %v7952_v20 }
 0x261   : > { %v1539_v23 = vpop.permute.xlu1 %1538  ;;  %v1541_v17 = vpop.permute.xlu0 %1540  ;;  %v1688_v61 = vsel %vm1665_vm5, %v1655_v2, %v7954_v22  ;;  %v7975_v2 = vld [vmem:[#allocation112_spill] sm:$0xff]  ;;  %v7976_v22 = vld [vmem:[#allocation89_spill] sm:$0xff] }
 0x262   : > { %v1848_v47 = vsel %vm1830_vm10, %v1815_v34, %v1539_v23  ;;  %v1849_v26 = vsel %vm1830_vm10, %v1816_v48, %v1541_v17  ;;  %v1721_v13 = vsel %vm1698_vm6, %v1688_v61, %v7956_v40  ;;  %v7957_v34 = vld [vmem:[#allocation147_spill] sm:$0xff] }
 0x263   : > { %4521 = vmatmul.mubr.msk.f32.gmra.mrb[16].mxu0 %vm1863_vm11, %v1848_v47  ;;  %v1786_v23 = vsel %vm1764_vm8, %v1753_v59, %v7957_v34  ;;  %v1754_v29 = vsel %vm1731_vm7, %v1721_v13, %v7958_v9  ;;  %v4652_v17 = vld [vmem:[#allocation2 + $0x110] sm:$0xff]  ;;  %v7979_v13 = vld [vmem:[#allocation128_spill] sm:$0xff]  ;;  %v7980_v9 = vld [vmem:[#allocation42_spill] sm:$0xff] }
 0x264   : > { %4523 = vmatprep.mubr.msk.f32.mxu0 %vm1863_vm11, %v1849_v26  ;;  %v1787_v8 = vsel %vm1764_vm8, %v1754_v29, %v7959_v62  ;;  %v1623_v39 = vsel %vm171_vm0, %v4652_v17, %v7960_v12  ;;  %v7982_v62 = vld [vmem:[#allocation127_spill] sm:$0xff]  ;;  %v7983_v12 = vld [vmem:[#allocation150_spill] sm:$0xff] }
 0x265   : > { %v1415_v21 = vpop.permute.xlu1 %1414  ;;  %v1417_v24 = vpop.permute.xlu0 %1416  ;;  %v1656_v37 = vsel %vm1632_vm4, %v1623_v39, %v7961_v42  ;;  %v7984_v42 = vld [vmem:[#allocation57_spill] sm:$0xff] }
 0x266   : > { %v1817_v19 = vsel %vm1797_vm9, %v1784_v10, %v1415_v21  ;;  %v1818_v28 = vsel %vm1797_vm9, %v1785_v3, %v1417_v24  ;;  %v7962_v21 = vld [vmem:[#allocation47_spill] sm:$0xff]  ;;  %v1689_v54 = vsel %vm1665_vm5, %v1656_v37, %v7963_v44  ;;  %v7966_v24 = vld [vmem:[#allocation109_spill] sm:$0xff] }
 0x267   : > { %v1624_v0 = vsel %vm171_vm0, %v4653_v6, %v7962_v21  ;;  %v1722_v57 = vsel %vm1698_vm6, %v1689_v54, %v7965_v32  ;;  %v7985_v21 = vld [vmem:[#allocation92_spill] sm:$0xff]  ;;  %v4657_v54 = vld [vmem:[#allocation2 + $0x150] sm:$0xff] }
 0x268   : > { %v1657_v63 = vsel %vm1632_vm4, %v1624_v0, %v7964_v4  ;;  %v1755_v45 = vsel %vm1731_vm7, %v1722_v57, %v7967_v53 }
 0x269   : > { %v1543_v43 = vpop.permute.xlu1 %1542  ;;  %v1545_v5 = vpop.permute.xlu0 %1544  ;;  %v1690_v46 = vsel %vm1665_vm5, %v1657_v63, %v7966_v24  ;;  %v7987_v63 = vld [vmem:[#allocation114_spill] sm:$0xff] }
 0x26a   : > { %v1850_v35 = vsel %vm1830_vm10, %v1817_v19, %v1543_v43  ;;  %v1851_v25 = vsel %vm1830_vm10, %v1818_v28, %v1545_v5  ;;  %v1723_v16 = vsel %vm1698_vm6, %v1690_v46, %v7968_v60  ;;  %v7969_v19 = vld [vmem:[#allocation149_spill] sm:$0xff]  ;;  %v4654_v5 = vld [vmem:[#allocation2 + $0x128] sm:$0xff]  ;;  %v7988_v46 = vld [vmem:[#allocation91_spill] sm:$0xff] }
 0x26b   : > { %4524 = vmatmul.mubr.msk.f32.gmra.mrb[18].mxu0 %vm1863_vm11, %v1850_v35  ;;  %v1788_v43 = vsel %vm1764_vm8, %v1755_v45, %v7969_v19  ;;  %v1756_v3 = vsel %vm1731_vm7, %v1723_v16, %v7970_v58  ;;  %v1625_v14 = vsel %vm171_vm0, %v4654_v5, %v7972_v38  ;;  %v2291_v24 = vld [vmem:[#allocation2 + $0x9] sm:$0xff]  ;;  %v7989_v45 = vld [vmem:[#allocation48_spill] sm:$0xff]  ;;  %v2290_v60 = vld [vmem:[#allocation2 + $0x1] sm:$0xff] }
 0x26c   : > { %4526 = vmatprep.mubr.msk.f32.mxu0 %vm1863_vm11, %v1851_v25  ;;  %v1789_v52 = vsel %vm1764_vm8, %v1756_v3, %v7971_v41  ;;  %v1658_v56 = vsel %vm1632_vm4, %v1625_v14, %v7973_v31  ;;  %2580 = vrot.lane.b32.xlu1 %v2291_v24, %s4677_s19  ;;  %v7990_v16 = vld [vmem:[#allocation113_spill] sm:$0xff] }
 0x26d   : > { %v1419_v1 = vpop.permute.xlu1 %1418  ;;  %v1421_v49 = vpop.permute.xlu0 %1420  ;;  %v1691_v55 = vsel %vm1665_vm5, %v1658_v56, %v7975_v2  ;;  %2578 = vrot.lane.b32.xlu0 %v2290_v60, %s4677_s19  ;;  %v7993_v41 = vld [vmem:[#allocation153_spill] sm:$0xff]  ;;  %v4658_v56 = vld [vmem:[#allocation2 + $0x158] sm:$0xff]  ;;  %v7997_v2 = vld [vmem:[#allocation94_spill] sm:$0xff] }
 0x26e   : > { %v1819_v47 = vsel %vm1797_vm9, %v1786_v23, %v1419_v1  ;;  %v1820_v26 = vsel %vm1797_vm9, %v1787_v8, %v1421_v49  ;;  %v7974_v1 = vld [vmem:[#allocation51_spill] sm:$0xff]  ;;  %v1724_v59 = vsel %vm1698_vm6, %v1691_v55, %v7977_v18  ;;  %v8010_v24 = vld [vmem:[#allocation117_spill] sm:$0xff] }
 0x26f   : > { %v1626_v20 = vsel %vm171_vm0, %v4655_v50, %v7974_v1  ;;  %v7978_v49 = vld [vmem:[#allocation111_spill] sm:$0xff]  ;;  %v1757_v34 = vsel %vm1731_vm7, %v1724_v59, %v7979_v13  ;;  %v7999_v59 = vld [vmem:[#allocation116_spill] sm:$0xff]  ;;  %v8000_v13 = vld [vmem:[#allocation93_spill] sm:$0xff] }
 0x270   : > { %v1659_v61 = vsel %vm1632_vm4, %v1626_v20, %v7976_v22  ;;  %v4659_v22 = vld [vmem:[#allocation2 + $0x168] sm:$0xff]  ;;  %v8012_v60 = vld [vmem:[#allocation133_spill] sm:$0xff] }
 0x271   : > { %v1547_v11 = vpop.permute.xlu1 %1546  ;;  %v1549_v15 = vpop.permute.xlu0 %1548  ;;  %v1692_v40 = vsel %vm1665_vm5, %v1659_v61, %v7978_v49  ;;  %v7998_v61 = vld [vmem:[#allocation59_spill] sm:$0xff] }
 0x272   : > { %v1852_v48 = vsel %vm1830_vm10, %v1819_v47, %v1547_v11  ;;  %v1853_v30 = vsel %vm1830_vm10, %v1820_v26, %v1549_v15  ;;  %v1725_v29 = vsel %vm1698_vm6, %v1692_v40, %v7980_v9  ;;  %v7981_v47 = vld [vmem:[#allocation151_spill] sm:$0xff]  ;;  %v4656_v15 = vld [vmem:[#allocation2 + $0x140] sm:$0xff]  ;;  %v1630_v18 = vsel %vm171_vm0, %v4659_v22, %v7998_v61 }
 0x273   : > { %4527 = vmatmul.mubr.msk.f32.gmra.mrb[20].mxu0 %vm1863_vm11, %v1852_v48  ;;  %v1790_v11 = vsel %vm1764_vm8, %v1757_v34, %v7981_v47  ;;  %v1758_v8 = vsel %vm1731_vm7, %v1725_v29, %v7982_v62  ;;  %v1627_v37 = vsel %vm171_vm0, %v4656_v15, %v7984_v42  ;;  %v1663_v34 = vsel %vm1632_vm4, %v1630_v18, %v8000_v13  ;;  %v8002_v29 = vld [vmem:[#allocation115_spill] sm:$0xff] }
 0x274   : > { %4529 = vmatprep.mubr.msk.f32.mxu0 %vm1863_vm11, %v1853_v30  ;;  %v1791_v39 = vsel %vm1764_vm8, %v1758_v8, %v7983_v12  ;;  %v1660_v0 = vsel %vm1632_vm4, %v1627_v37, %v7985_v21  ;;  %v1696_v47 = vsel %vm1665_vm5, %v1663_v34, %v8002_v29  ;;  %v8005_v12 = vld [vmem:[#allocation155_spill] sm:$0xff] }
 0x275   : > { %v1423_v7 = vpop.permute.xlu1 %1422  ;;  %v1425_v10 = vpop.permute.xlu0 %1424  ;;  %v1693_v32 = vsel %vm1665_vm5, %v1660_v0, %v7987_v63  ;;  %v4660_v0 = vld [vmem:[#allocation2 + $0x170] sm:$0xff] }
 0x276   : > { %v1821_v35 = vsel %vm1797_vm9, %v1788_v43, %v1423_v7  ;;  %v1822_v25 = vsel %vm1797_vm9, %v1789_v52, %v1425_v10  ;;  %v7986_v7 = vld [vmem:[#allocation55_spill] sm:$0xff]  ;;  %v1726_v10 = vsel %vm1698_vm6, %v1693_v32, %v7989_v45  ;;  %v7991_v43 = vld [vmem:[#allocation130_spill] sm:$0xff] }
 0x277   : > { %v1628_v4 = vsel %vm171_vm0, %v4657_v54, %v7986_v7  ;;  %v1759_v58 = vsel %vm1731_vm7, %v1726_v10, %v7991_v43  ;;  %v8009_v63 = vld [vmem:[#allocation95_spill] sm:$0xff]  ;;  %v8011_v45 = vld [vmem:[#allocation54_spill] sm:$0xff] }
 0x278   : > { %v1661_v53 = vsel %vm1632_vm4, %v1628_v4, %v7988_v46  ;;  %v1792_v52 = vsel %vm1764_vm8, %v1759_v58, %v7993_v41 }
 0x279   : > { %v1551_v27 = vpop.permute.xlu1 %1550  ;;  %v1553_v33 = vpop.permute.xlu0 %1552  ;;  %v1694_v19 = vsel %vm1665_vm5, %v1661_v53, %v7990_v16 }
 0x27a   : > { %v1854_v28 = vsel %vm1830_vm10, %v1821_v35, %v1551_v27  ;;  %v1855_v51 = vsel %vm1830_vm10, %v1822_v25, %v1553_v33  ;;  %v7992_v35 = vld [vmem:[#allocation46_spill] sm:$0xff]  ;;  %v7995_v25 = vld [vmem:[#allocation152_spill] sm:$0xff] }
 0x27b   : > { %4530 = vmatmul.mubr.msk.f32.gmra.mrb[22].mxu0 %vm1863_vm11, %v1854_v28  ;;  %v1727_v27 = vsel %vm1698_vm6, %v1694_v19, %v7992_v35  ;;  %v7994_v28 = vld [vmem:[#allocation129_spill] sm:$0xff]  ;;  %v8013_v19 = vld [vmem:[#allocation156_spill] sm:$0xff] }
 0x27c   : > { %4532 = vmatprep.mubr.msk.f32.mxu0 %vm1863_vm11, %v1855_v51  ;;  %v1760_v5 = vsel %vm1731_vm7, %v1727_v27, %v7994_v28  ;;  %v7996_v51 = vld [vmem:[#allocation61_spill] sm:$0xff] }
 0x27d   : > { %v1427_v36 = vpop.permute.xlu1 %1426  ;;  %v1429_v23 = vpop.permute.xlu0 %1428  ;;  %v1793_v33 = vsel %vm1764_vm8, %v1760_v5, %v7995_v25  ;;  %v1629_v50 = vsel %vm171_vm0, %v4658_v56, %v7996_v51 }
 0x27e   : > { %v1823_v48 = vsel %vm1797_vm9, %v1790_v11, %v1427_v36  ;;  %v1824_v30 = vsel %vm1797_vm9, %v1791_v39, %v1429_v23  ;;  %v1662_v55 = vsel %vm1632_vm4, %v1629_v50, %v7997_v2  ;;  %v8001_v23 = vld [vmem:[#allocation52_spill] sm:$0xff] }
 0x27f   : > { %v1695_v49 = vsel %vm1665_vm5, %v1662_v55, %v7999_v59  ;;  %v8003_v11 = vld [vmem:[#allocation132_spill] sm:$0xff] }
 0x280   : > { %v1728_v9 = vsel %vm1698_vm6, %v1695_v49, %v8001_v23 }
 0x281   : > { %v1555_v17 = vpop.permute.xlu1 %1554  ;;  %v1557_v6 = vpop.permute.xlu0 %1556  ;;  %v1761_v62 = vsel %vm1731_vm7, %v1728_v9, %v8003_v11 }
 0x282   : > { %v1856_v26 = vsel %vm1830_vm10, %v1823_v48, %v1555_v17  ;;  %v1857_v44 = vsel %vm1830_vm10, %v1824_v30, %v1557_v6  ;;  %v8004_v48 = vld [vmem:[#allocation50_spill] sm:$0xff]  ;;  %v1794_v39 = vsel %vm1764_vm8, %v1761_v62, %v8005_v12 }
 0x283   : > { %4533 = vmatmul.mubr.msk.f32.gmra.mrb[24].mxu0 %vm1863_vm11, %v1856_v26  ;;  %v1729_v17 = vsel %vm1698_vm6, %v1696_v47, %v8004_v48  ;;  %v8006_v26 = vld [vmem:[#allocation131_spill] sm:$0xff]  ;;  %v8007_v30 = vld [vmem:[#allocation154_spill] sm:$0xff] }
 0x284   : > { %4535 = vmatprep.mubr.msk.f32.mxu0 %vm1863_vm11, %v1857_v44  ;;  %v1762_v15 = vsel %vm1731_vm7, %v1729_v17, %v8006_v26  ;;  %v8008_v44 = vld [vmem:[#allocation65_spill] sm:$0xff] }
 0x285   : > { %v1431_v57 = vpop.permute.xlu1 %1430  ;;  %v1433_v3 = vpop.permute.xlu0 %1432  ;;  %v1795_v6 = vsel %vm1764_vm8, %v1762_v15, %v8007_v30  ;;  %v1631_v54 = vsel %vm171_vm0, %v4660_v0, %v8008_v44 }
 0x286   : > { %v1825_v38 = vsel %vm1797_vm9, %v1792_v52, %v1431_v57  ;;  %v1826_v1 = vsel %vm1797_vm9, %v1793_v33, %v1433_v3  ;;  %v1664_v32 = vsel %vm1632_vm4, %v1631_v54, %v8009_v63 }
 0x287   : > { %v1697_v46 = vsel %vm1665_vm5, %v1664_v32, %v8010_v24 }
 0x288   : > { %v1730_v10 = vsel %vm1698_vm6, %v1697_v46, %v8011_v45 }
 0x289   : > { %v1559_v14 = vpop.permute.xlu1 %1558  ;;  %v1561_v20 = vpop.permute.xlu0 %1560  ;;  %v1763_v16 = vsel %vm1731_vm7, %v1730_v10, %v8012_v60 }
 0x28a   : > { %v1858_v31 = vsel %vm1830_vm10, %v1825_v38, %v1559_v14  ;;  %v1859_v36 = vsel %vm1830_vm10, %v1826_v1, %v1561_v20  ;;  %v1796_v43 = vsel %vm1764_vm8, %v1763_v16, %v8013_v19 }
 0x28b   : > { %4536 = vmatmul.mubr.msk.f32.gmra.mrb[26].mxu0 %vm1863_vm11, %v1858_v31 }
 0x28c   : > { %4538 = vmatprep.mubr.msk.f32.mxu0 %vm1863_vm11, %v1859_v36 }
 0x28d   : > { %v1435_v40 = vpop.permute.xlu1 %1434  ;;  %v1437_v8 = vpop.permute.xlu0 %1436 }
 0x28e   : > { %v1827_v42 = vsel %vm1797_vm9, %v1794_v39, %v1435_v40  ;;  %v1828_v7 = vsel %vm1797_vm9, %v1795_v6, %v1437_v8 }
 0x291   : > { %v1563_v37 = vpop.permute.xlu1 %1562  ;;  %v1565_v4 = vpop.permute.xlu0 %1564 }
 0x292   : > { %v1860_v21 = vsel %vm1830_vm10, %v1827_v42, %v1563_v37  ;;  %v1861_v57 = vsel %vm1830_vm10, %v1828_v7, %v1565_v4 }
 0x293   : > { %4539 = vmatmul.mubr.msk.f32.gmra.mrb[28].mxu0 %vm1863_vm11, %v1860_v21 }
 0x294   : > { %4541 = vmatprep.mubr.msk.f32.mxu0 %vm1863_vm11, %v1861_v57 }
 0x295   : > { %v1439_v53 = vpop.permute.xlu1 %1438 }
 0x296   : > { %v1829_v58 = vsel %vm1797_vm9, %v1796_v43, %v1439_v53 }
 0x299   : > { %v1567_v3 = vpop.permute.xlu1 %1566 }
 0x29a   : > { %v1862_v35 = vsel %vm1830_vm10, %v1829_v58, %v1567_v3 }
 0x29b   : > { %4542 = vmatmul.mubr.msk.f32.gmra.mrb[30].mxu0 %vm1863_vm11, %v1862_v35 }
 0x2ff   : > { %v4498_v27 = vpop.f32.mrb[0].mxu0 }
 0x300   : > { %v2190_v41 = vmax.f32 %v4498_v27, 0.0  ;;  %v2030_v52 = vpop.f32.mrb[1].mxu0 }
 0x301   : > { %v2189_v28 = vmax.f32 %v2030_v52, 0.0 }
 0x302   : > { %2222 = vst.msk [vmem:[#allocation2 + $0x21] sm:$0xff] %vm171_vm0, %v2190_v41 }
 0x303   : > { %2221 = vst.msk [vmem:[#allocation2 + $0x19] sm:$0xff] %vm171_vm0, %v2189_v28  ;;  %v4501_v5 = vpop.f32.mrb[2].mxu0 }
 0x304   : > { %v2192_v38 = vmax.f32 %v4501_v5, 0.0  ;;  %v2040_v14 = vpop.f32.mrb[3].mxu0 }
 0x305   : > { %v2191_v25 = vmax.f32 %v2040_v14, 0.0 }
 0x306   : > { %2224 = vst.msk [vmem:[#allocation2 + $0x39] sm:$0xff] %vm171_vm0, %v2192_v38 }
 0x307   : > { %2223 = vst.msk [vmem:[#allocation2 + $0x31] sm:$0xff] %vm171_vm0, %v2191_v25  ;;  %v4504_v33 = vpop.f32.mrb[4].mxu0 }
 0x308   : > { %v2194_v31 = vmax.f32 %v4504_v33, 0.0  ;;  %v2050_v56 = vpop.f32.mrb[5].mxu0 }
 0x309   : > { %v2193_v51 = vmax.f32 %v2050_v56, 0.0  ;;  %v6375_v50 = vld [vmem:[#allocation2 + $0x21] sm:$0xff] }
 0x30a   : > { %2226 = vst.msk [vmem:[#allocation2 + $0x51] sm:$0xff] %vm171_vm0, %v2194_v31  ;;  %2584 = vrot.lane.b32.xlu1 %v6375_v50, %s4677_s19  ;;  %v6380_v1 = vld [vmem:[#allocation2 + $0x19] sm:$0xff] }
 0x30b   : > { %2225 = vst.msk [vmem:[#allocation2 + $0x49] sm:$0xff] %vm171_vm0, %v2193_v51  ;;  %2582 = vrot.lane.b32.xlu0 %v6380_v1, %s4677_s19 }
 0x30d   : > { %v6385_v20 = vld [vmem:[#allocation2 + $0x39] sm:$0xff] }
 0x30e   : > { %2588 = vrot.lane.b32.xlu1 %v6385_v20, %s4677_s19  ;;  %v4507_v2 = vpop.f32.mrb[6].mxu0  ;;  %v6389_v55 = vld [vmem:[#allocation2 + $0x31] sm:$0xff] }
 0x30f   : > { %v2196_v36 = vmax.f32 %v4507_v2, 0.0  ;;  %2586 = vrot.lane.b32.xlu0 %v6389_v55, %s4677_s19  ;;  %v2060_v22 = vpop.f32.mrb[7].mxu0 }
 0x310   : > { %v2195_v61 = vmax.f32 %v2060_v22, 0.0 }
 0x311   : > { %2228 = vst.msk [vmem:[#allocation2 + $0x69] sm:$0xff] %vm171_vm0, %v2196_v36  ;;  %v6394_v18 = vld [vmem:[#allocation2 + $0x51] sm:$0xff] }
 0x312   : > { %2227 = vst.msk [vmem:[#allocation2 + $0x61] sm:$0xff] %vm171_vm0, %v2195_v61  ;;  %2592 = vrot.lane.b32.xlu1 %v6394_v18, %s4677_s19  ;;  %v6399_v59 = vld [vmem:[#allocation2 + $0x49] sm:$0xff] }
 0x313   : > { %2590 = vrot.lane.b32.xlu0 %v6399_v59, %s4677_s19 }
 0x316   : > { %v4510_v49 = vpop.f32.mrb[8].mxu0 }
 0x317   : > { %v2198_v40 = vmax.f32 %v4510_v49, 0.0  ;;  %v2070_v13 = vpop.f32.mrb[9].mxu0 }
 0x318   : > { %v2197_v34 = vmax.f32 %v2070_v13, 0.0  ;;  %v6403_v23 = vld [vmem:[#allocation2 + $0x69] sm:$0xff] }
 0x319   : > { %2230 = vst.msk [vmem:[#allocation2 + $0x81] sm:$0xff] %vm171_vm0, %v2198_v40  ;;  %2596 = vrot.lane.b32.xlu1 %v6403_v23, %s4677_s19  ;;  %v6408_v9 = vld [vmem:[#allocation2 + $0x61] sm:$0xff] }
 0x31a   : > { %2229 = vst.msk [vmem:[#allocation2 + $0x79] sm:$0xff] %vm171_vm0, %v2197_v34  ;;  %2594 = vrot.lane.b32.xlu0 %v6408_v9, %s4677_s19 }
 0x31e   : > { %v4513_v29 = vpop.f32.mrb[10].mxu0 }
 0x31f   : > { %v2200_v47 = vmax.f32 %v4513_v29, 0.0  ;;  %v2080_v11 = vpop.f32.mrb[11].mxu0 }
 0x320   : > { %v2199_v62 = vmax.f32 %v2080_v11, 0.0  ;;  %v6413_v8 = vld [vmem:[#allocation2 + $0x81] sm:$0xff] }
 0x321   : > { %2232 = vst.msk [vmem:[#allocation2 + $0x99] sm:$0xff] %vm171_vm0, %v2200_v47  ;;  %2600 = vrot.lane.b32.xlu1 %v6413_v8, %s4677_s19  ;;  %v6418_v48 = vld [vmem:[#allocation2 + $0x79] sm:$0xff] }
 0x322   : > { %2231 = vst.msk [vmem:[#allocation2 + $0x91] sm:$0xff] %vm171_vm0, %v2199_v62  ;;  %2598 = vrot.lane.b32.xlu0 %v6418_v48, %s4677_s19 }
 0x326   : > { %v4516_v17 = vpop.f32.mrb[12].mxu0 }
 0x327   : > { %v2202_v12 = vmax.f32 %v4516_v17, 0.0  ;;  %v2090_v39 = vpop.f32.mrb[13].mxu0 }
 0x328   : > { %v2201_v26 = vmax.f32 %v2090_v39, 0.0  ;;  %v6423_v15 = vld [vmem:[#allocation2 + $0x99] sm:$0xff] }
 0x329   : > { %2234 = vst.msk [vmem:[#allocation2 + $0xb1] sm:$0xff] %vm171_vm0, %v2202_v12  ;;  %2604 = vrot.lane.b32.xlu1 %v6423_v15, %s4677_s19  ;;  %v6428_v42 = vld [vmem:[#allocation2 + $0x91] sm:$0xff] }
 0x32a   : > { %2233 = vst.msk [vmem:[#allocation2 + $0xa9] sm:$0xff] %vm171_vm0, %v2201_v26  ;;  %2602 = vrot.lane.b32.xlu0 %v6428_v42, %s4677_s19 }
 0x32e   : > { %v4519_v37 = vpop.f32.mrb[14].mxu0 }
 0x32f   : > { %v2204_v30 = vmax.f32 %v4519_v37, 0.0  ;;  %v2100_v6 = vpop.f32.mrb[15].mxu0 }
 0x330   : > { %v2203_v21 = vmax.f32 %v2100_v6, 0.0  ;;  %v2305_v0 = vld [vmem:[#allocation2 + $0xb1] sm:$0xff] }
 0x331   : > { %2236 = vst.msk [vmem:[#allocation2 + $0xc9] sm:$0xff] %vm171_vm0, %v2204_v30  ;;  %2608 = vrot.lane.b32.xlu1 %v2305_v0, %s4677_s19  ;;  %v6435_v44 = vld [vmem:[#allocation2 + $0xa9] sm:$0xff] }
 0x332   : > { %2235 = vst.msk [vmem:[#allocation2 + $0xc1] sm:$0xff] %vm171_vm0, %v2203_v21  ;;  %2606 = vrot.lane.b32.xlu0 %v6435_v44, %s4677_s19  ;;  %v2323_v6 = vld [vmem:[#allocation2 + $0xa] sm:$0xff]  ;;  %v2322_v21 = vld [vmem:[#allocation2 + $0x2] sm:$0xff] }
 0x333   : > { %v6474_v0 = vld [vmem:[#allocation2 + $0x22] sm:$0xff] }
 0x336   : > { %v4522_v54 = vpop.f32.mrb[16].mxu0 }
 0x337   : > { %v2206_v7 = vmax.f32 %v4522_v54, 0.0  ;;  %v2110_v4 = vpop.f32.mrb[17].mxu0  ;;  %v6478_v54 = vld [vmem:[#allocation2 + $0x1a] sm:$0xff] }
 0x338   : > { %v2205_v63 = vmax.f32 %v2110_v4, 0.0  ;;  %v2307_v32 = vld [vmem:[#allocation2 + $0xc9] sm:$0xff]  ;;  %v6486_v4 = vld [vmem:[#allocation2 + $0x32] sm:$0xff] }
 0x339   : > { %2238 = vst.msk [vmem:[#allocation2 + $0xe1] sm:$0xff] %vm171_vm0, %v2206_v7  ;;  %2612 = vrot.lane.b32.xlu1 %v2307_v32, %s4677_s19  ;;  %v2306_v57 = vld [vmem:[#allocation2 + $0xc1] sm:$0xff]  ;;  %v6494_v32 = vld [vmem:[#allocation2 + $0x4a] sm:$0xff] }
 0x33a   : > { %2237 = vst.msk [vmem:[#allocation2 + $0xd9] sm:$0xff] %vm171_vm0, %v2205_v63  ;;  %2610 = vrot.lane.b32.xlu0 %v2306_v57, %s4677_s19  ;;  %v6482_v7 = vld [vmem:[#allocation2 + $0x3a] sm:$0xff]  ;;  %v6490_v63 = vld [vmem:[#allocation2 + $0x52] sm:$0xff]  ;;  %v6498_v57 = vld [vmem:[#allocation2 + $0x6a] sm:$0xff] }
 0x33e   : > { %v4525_v24 = vpop.f32.mrb[18].mxu0 }
 0x33f   : > { %v2208_v46 = vmax.f32 %v4525_v24, 0.0  ;;  %v2120_v53 = vpop.f32.mrb[19].mxu0  ;;  %v6502_v24 = vld [vmem:[#allocation2 + $0x62] sm:$0xff] }
 0x340   : > { %v2207_v45 = vmax.f32 %v2120_v53, 0.0  ;;  %v2309_v10 = vld [vmem:[#allocation2 + $0xe1] sm:$0xff] }
 0x341   : > { %2240 = vst.msk [vmem:[#allocation2 + $0xf9] sm:$0xff] %vm171_vm0, %v2208_v46  ;;  %2616 = vrot.lane.b32.xlu1 %v2309_v10, %s4677_s19  ;;  %v2308_v60 = vld [vmem:[#allocation2 + $0xd9] sm:$0xff]  ;;  %v6506_v46 = vld [vmem:[#allocation2 + $0x82] sm:$0xff] }
 0x342   : > { %2239 = vst.msk [vmem:[#allocation2 + $0xf1] sm:$0xff] %vm171_vm0, %v2207_v45  ;;  %2614 = vrot.lane.b32.xlu0 %v2308_v60, %s4677_s19  ;;  %v6510_v53 = vld [vmem:[#allocation2 + $0x7a] sm:$0xff]  ;;  %v6518_v10 = vld [vmem:[#allocation2 + $0x92] sm:$0xff] }
 0x343   : > { %v6514_v45 = vld [vmem:[#allocation2 + $0x9a] sm:$0xff]  ;;  %v6522_v60 = vld [vmem:[#allocation2 + $0xb2] sm:$0xff] }
 0x346   : > { %v4528_v16 = vpop.f32.mrb[20].mxu0 }
 0x347   : > { %v2210_v19 = vmax.f32 %v4528_v16, 0.0  ;;  %v2130_v43 = vpop.f32.mrb[21].mxu0  ;;  %v6526_v16 = vld [vmem:[#allocation2 + $0xaa] sm:$0xff] }
 0x348   : > { %v2209_v58 = vmax.f32 %v2130_v43, 0.0  ;;  %v2311_v3 = vld [vmem:[#allocation2 + $0xf9] sm:$0xff]  ;;  %v6534_v43 = vld [vmem:[#allocation2 + $0xc2] sm:$0xff] }
 0x349   : > { %2242 = vst.msk [vmem:[#allocation2 + $0x111] sm:$0xff] %vm171_vm0, %v2210_v19  ;;  %2620 = vrot.lane.b32.xlu1 %v2311_v3, %s4677_s19  ;;  %v2310_v35 = vld [vmem:[#allocation2 + $0xf1] sm:$0xff]  ;;  %v6542_v3 = vld [vmem:[#allocation2 + $0xda] sm:$0xff] }
 0x34a   : > { %2241 = vst.msk [vmem:[#allocation2 + $0x109] sm:$0xff] %vm171_vm0, %v2209_v58  ;;  %2618 = vrot.lane.b32.xlu0 %v2310_v35, %s4677_s19  ;;  %v6530_v19 = vld [vmem:[#allocation2 + $0xca] sm:$0xff]  ;;  %v6538_v58 = vld [vmem:[#allocation2 + $0xe2] sm:$0xff]  ;;  %v6546_v35 = vld [vmem:[#allocation2 + $0xfa] sm:$0xff] }
 0x34b   : > { %8014 = vst [vmem:[#allocation3_spill] sm:$0xff] %v6546_v35 }
 0x34e   : > { %v4531_v27 = vpop.f32.mrb[22].mxu0 }
 0x34f   : > { %v2212_v41 = vmax.f32 %v4531_v27, 0.0  ;;  %v2140_v52 = vpop.f32.mrb[23].mxu0  ;;  %v6550_v27 = vld [vmem:[#allocation2 + $0xf2] sm:$0xff] }
 0x350   : > { %v2211_v28 = vmax.f32 %v2140_v52, 0.0  ;;  %v2313_v5 = vld [vmem:[#allocation2 + $0x111] sm:$0xff]  ;;  %v6554_v52 = vpop.permute.xlu1 %2580 }
 0x351   : > { %2244 = vst.msk [vmem:[#allocation2 + $0x129] sm:$0xff] %vm171_vm0, %v2212_v41  ;;  %2624 = vrot.lane.b32.xlu1 %v2313_v5, %s4677_s19  ;;  %v2312_v38 = vld [vmem:[#allocation2 + $0x109] sm:$0xff]  ;;  %v2345_v41 = vld [vmem:[#allocation2 + $0x112] sm:$0xff]  ;;  %v6557_v5 = vpop.permute.xlu0 %2578 }
 0x352   : > { %2243 = vst.msk [vmem:[#allocation2 + $0x121] sm:$0xff] %vm171_vm0, %v2211_v28  ;;  %2622 = vrot.lane.b32.xlu0 %v2312_v38, %s4677_s19  ;;  %v2344_v28 = vld [vmem:[#allocation2 + $0x10a] sm:$0xff] }
 0x356   : > { %v4534_v14 = vpop.f32.mrb[24].mxu0 }
 0x357   : > { %v2214_v25 = vmax.f32 %v4534_v14, 0.0  ;;  %v2150_v33 = vpop.f32.mrb[25].mxu0 }
 0x358   : > { %v2213_v31 = vmax.f32 %v2150_v33, 0.0  ;;  %v2315_v56 = vld [vmem:[#allocation2 + $0x129] sm:$0xff] }
 0x359   : > { %2246 = vst.msk [vmem:[#allocation2 + $0x141] sm:$0xff] %vm171_vm0, %v2214_v25  ;;  %2628 = vrot.lane.b32.xlu1 %v2315_v56, %s4677_s19  ;;  %v2314_v51 = vld [vmem:[#allocation2 + $0x121] sm:$0xff]  ;;  %v2347_v38 = vld [vmem:[#allocation2 + $0x12a] sm:$0xff] }
 0x35a   : > { %2245 = vst.msk [vmem:[#allocation2 + $0x139] sm:$0xff] %vm171_vm0, %v2213_v31  ;;  %2626 = vrot.lane.b32.xlu0 %v2314_v51, %s4677_s19  ;;  %v2346_v14 = vld [vmem:[#allocation2 + $0x122] sm:$0xff] }
 0x35e   : > { %v4537_v2 = vpop.f32.mrb[26].mxu0 }
 0x35f   : > { %v2216_v36 = vmax.f32 %v4537_v2, 0.0  ;;  %v2160_v22 = vpop.f32.mrb[27].mxu0 }
 0x360   : > { %v2215_v61 = vmax.f32 %v2160_v22, 0.0  ;;  %v2317_v49 = vld [vmem:[#allocation2 + $0x141] sm:$0xff] }
 0x361   : > { %2248 = vst.msk [vmem:[#allocation2 + $0x159] sm:$0xff] %vm171_vm0, %v2216_v36  ;;  %2632 = vrot.lane.b32.xlu1 %v2317_v49, %s4677_s19  ;;  %v2316_v40 = vld [vmem:[#allocation2 + $0x139] sm:$0xff]  ;;  %v2349_v31 = vld [vmem:[#allocation2 + $0x142] sm:$0xff] }
 0x362   : > { %2247 = vst.msk [vmem:[#allocation2 + $0x151] sm:$0xff] %vm171_vm0, %v2215_v61  ;;  %2630 = vrot.lane.b32.xlu0 %v2316_v40, %s4677_s19  ;;  %v2348_v56 = vld [vmem:[#allocation2 + $0x13a] sm:$0xff] }
 0x366   : > { %v4540_v13 = vpop.f32.mrb[28].mxu0 }
 0x367   : > { %v2218_v34 = vmax.f32 %v4540_v13, 0.0  ;;  %v2170_v29 = vpop.f32.mrb[29].mxu0  ;;  %v6578_v13 = vld [vmem:[#allocation2 + $0x20] sm:$0xff] }
 0x368   : > { %v2217_v47 = vmax.f32 %v2170_v29, 0.0  ;;  %v2319_v11 = vld [vmem:[#allocation2 + $0x159] sm:$0xff] }
 0x369   : > { %2250 = vst.msk [vmem:[#allocation2 + $0x171] sm:$0xff] %vm171_vm0, %v2218_v34  ;;  %2636 = vrot.lane.b32.xlu1 %v2319_v11, %s4677_s19  ;;  %v2318_v62 = vld [vmem:[#allocation2 + $0x151] sm:$0xff]  ;;  %v2351_v51 = vld [vmem:[#allocation2 + $0x15a] sm:$0xff] }
 0x36a   : > { %2249 = vst.msk [vmem:[#allocation2 + $0x169] sm:$0xff] %vm171_vm0, %v2217_v47  ;;  %2634 = vrot.lane.b32.xlu0 %v2318_v62, %s4677_s19  ;;  %v2350_v36 = vld [vmem:[#allocation2 + $0x152] sm:$0xff] }
 0x36b   : > { %v6582_v29 = vld [vmem:[#allocation2 + $0x18] sm:$0xff] }
 0x36c   : > { %v6590_v11 = vld [vmem:[#allocation2 + $0x38] sm:$0xff] }
 0x36e   : > { %v4543_v17 = vpop.f32.mrb[30].mxu0 }
 0x36f   : > { %v2220_v12 = vmax.f32 %v4543_v17, 0.0  ;;  %v2180_v39 = vpop.f32.mrb[31].mxu0  ;;  %v6594_v17 = vld [vmem:[#allocation2 + $0x30] sm:$0xff] }
 0x370   : > { %v2219_v26 = vmax.f32 %v2180_v39, 0.0  ;;  %v2321_v37 = vld [vmem:[#allocation2 + $0x171] sm:$0xff] }
 0x371   : > { %2252 = vst.msk [vmem:[#allocation2 + $0x189] sm:$0xff] %vm171_vm0, %v2220_v12  ;;  %2640 = vrot.lane.b32.xlu1 %v2321_v37, %s4677_s19  ;;  %v2320_v30 = vld [vmem:[#allocation2 + $0x169] sm:$0xff]  ;;  %v2353_v61 = vld [vmem:[#allocation2 + $0x172] sm:$0xff] }
 0x372   : > { %2251 = vst.msk [vmem:[#allocation2 + $0x181] sm:$0xff] %vm171_vm0, %v2219_v26  ;;  %2638 = vrot.lane.b32.xlu0 %v2320_v30, %s4677_s19  ;;  %v2352_v49 = vld [vmem:[#allocation2 + $0x16a] sm:$0xff] }
 0x373   : > { %v6602_v39 = vld [vmem:[#allocation2 + $0x50] sm:$0xff]  ;;  %v6606_v37 = vld [vmem:[#allocation2 + $0x48] sm:$0xff] }
 0x375   : > { %2708 = vrot.lane.b32.xlu1 %v2323_v6, %s4678_s20  ;;  %v6614_v6 = vld [vmem:[#allocation2 + $0x68] sm:$0xff] }
 0x376   : > { %2706 = vrot.lane.b32.xlu0 %v2322_v21, %s4678_s20 }
 0x379   : > { %2712 = vrot.lane.b32.xlu1 %v6474_v0, %s4678_s20 }
 0x37a   : > { %2710 = vrot.lane.b32.xlu0 %v6478_v54, %s4678_s20 }
 0x37c   : > { %v6562_v25 = vpop.permute.xlu1 %2584 }
 0x37d   : > { %2716 = vrot.lane.b32.xlu1 %v6482_v7, %s4678_s20  ;;  %v6564_v33 = vpop.permute.xlu0 %2582 }
 0x37e   : > { %2714 = vrot.lane.b32.xlu0 %v6486_v4, %s4678_s20 }
 0x380   : > { %v6568_v2 = vpop.permute.xlu1 %2588 }
 0x381   : > { %2720 = vrot.lane.b32.xlu1 %v6490_v63, %s4678_s20  ;;  %v6571_v22 = vpop.permute.xlu0 %2586 }
 0x382   : > { %2718 = vrot.lane.b32.xlu0 %v6494_v32, %s4678_s20 }
 0x384   : > { %v6576_v40 = vpop.permute.xlu1 %2592 }
 0x385   : > { %2724 = vrot.lane.b32.xlu1 %v6498_v57, %s4678_s20  ;;  %8015 = vst [vmem:[#allocation4_spill] sm:$0xff] %v6576_v40  ;;  %v6580_v34 = vpop.permute.xlu0 %2590  ;;  %v6690_v40 = vld [vmem:[#allocation2 + $0xf0] sm:$0xff] }
 0x386   : > { %2722 = vrot.lane.b32.xlu0 %v6502_v24, %s4678_s20  ;;  %8016 = vst [vmem:[#allocation6_spill] sm:$0xff] %v6580_v34  ;;  %v6702_v34 = vld [vmem:[#allocation2 + $0x108] sm:$0xff] }
 0x387   : > { %8041 = vst [vmem:[#allocation134_spill] sm:$0xff] %v6702_v34 }
 0x389   : > { %2728 = vrot.lane.b32.xlu1 %v6506_v46, %s4678_s20 }
 0x38a   : > { %2726 = vrot.lane.b32.xlu0 %v6510_v53, %s4678_s20 }
 0x38b   : > { %v6588_v47 = vpop.permute.xlu1 %2596 }
 0x38c   : > { %8017 = vst [vmem:[#allocation12_spill] sm:$0xff] %v6588_v47  ;;  %v6592_v62 = vpop.permute.xlu0 %2594  ;;  %v6678_v47 = vld [vmem:[#allocation2 + $0xd8] sm:$0xff] }
 0x38d   : > { %2732 = vrot.lane.b32.xlu1 %v6514_v45, %s4678_s20  ;;  %8018 = vst [vmem:[#allocation63_spill] sm:$0xff] %v6592_v62 }
 0x38e   : > { %2730 = vrot.lane.b32.xlu0 %v6518_v10, %s4678_s20 }
 0x391   : > { %2736 = vrot.lane.b32.xlu1 %v6522_v60, %s4678_s20 }
 0x392   : > { %2734 = vrot.lane.b32.xlu0 %v6526_v16, %s4678_s20 }
 0x393   : > { %v6600_v12 = vpop.permute.xlu1 %2600 }
 0x394   : > { %8019 = vst [vmem:[#allocation8_spill] sm:$0xff] %v6600_v12  ;;  %v6604_v26 = vpop.permute.xlu0 %2598  ;;  %v6666_v12 = vld [vmem:[#allocation2 + $0xc0] sm:$0xff] }
 0x395   : > { %2740 = vrot.lane.b32.xlu1 %v6530_v19, %s4678_s20  ;;  %8020 = vst [vmem:[#allocation68_spill] sm:$0xff] %v6604_v26 }
 0x396   : > { %2738 = vrot.lane.b32.xlu0 %v6534_v43, %s4678_s20 }
 0x399   : > { %2744 = vrot.lane.b32.xlu1 %v6538_v58, %s4678_s20 }
 0x39a   : > { %2742 = vrot.lane.b32.xlu0 %v6542_v3, %s4678_s20 }
 0x39b   : > { %v6612_v30 = vpop.permute.xlu1 %2604 }
 0x39c   : > { %8021 = vst [vmem:[#allocation10_spill] sm:$0xff] %v6612_v30  ;;  %v6616_v21 = vpop.permute.xlu0 %2602  ;;  %v6654_v30 = vld [vmem:[#allocation2 + $0xa8] sm:$0xff] }
 0x39d   : > { %2748 = vrot.lane.b32.xlu1 %v6546_v35, %s4678_s20  ;;  %8022 = vst [vmem:[#allocation18_spill] sm:$0xff] %v6616_v21  ;;  %8031 = vst [vmem:[#allocation15_spill] sm:$0xff] %v6654_v30 }
 0x39e   : > { %2746 = vrot.lane.b32.xlu0 %v6550_v27, %s4678_s20 }
 0x3a1   : > { %2752 = vrot.lane.b32.xlu1 %v2345_v41, %s4678_s20  ;;  %v6618_v41 = vld [vmem:[#allocation2 + $0x60] sm:$0xff] }
 0x3a2   : > { %2750 = vrot.lane.b32.xlu0 %v2344_v28, %s4678_s20 }
 0x3a3   : > { %v6624_v28 = vpop.permute.xlu1 %2608 }
 0x3a4   : > { %8023 = vst [vmem:[#allocation11_spill] sm:$0xff] %v6624_v28  ;;  %v6650_v28 = vld [vmem:[#allocation2 + $0xb0] sm:$0xff] }
 0x3a5   : > { %2756 = vrot.lane.b32.xlu1 %v2347_v38, %s4678_s20  ;;  %v6626_v38 = vld [vmem:[#allocation2 + $0x80] sm:$0xff]  ;;  %8029 = vst [vmem:[#allocation73_spill] sm:$0xff] %v6650_v28 }
 0x3a6   : > { %2754 = vrot.lane.b32.xlu0 %v2346_v14, %s4678_s20  ;;  %v6628_v14 = vpop.permute.xlu0 %2606 }
 0x3a7   : > { %8024 = vst [vmem:[#allocation67_spill] sm:$0xff] %v6628_v14 }
 0x3a9   : > { %2760 = vrot.lane.b32.xlu1 %v2349_v31, %s4678_s20  ;;  %v6630_v31 = vld [vmem:[#allocation2 + $0x78] sm:$0xff] }
 0x3aa   : > { %2758 = vrot.lane.b32.xlu0 %v2348_v56, %s4678_s20 }
 0x3ab   : > { %v6636_v56 = vpop.permute.xlu1 %2612 }
 0x3ac   : > { %8025 = vst [vmem:[#allocation71_spill] sm:$0xff] %v6636_v56 }
 0x3ad   : > { %2764 = vrot.lane.b32.xlu1 %v2351_v51, %s4678_s20  ;;  %v6638_v51 = vld [vmem:[#allocation2 + $0x98] sm:$0xff] }
 0x3ae   : > { %2762 = vrot.lane.b32.xlu0 %v2350_v36, %s4678_s20  ;;  %8026 = vst [vmem:[#allocation14_spill] sm:$0xff] %v6638_v51  ;;  %v6640_v36 = vpop.permute.xlu0 %2610 }
 0x3af   : > { %8027 = vst [vmem:[#allocation70_spill] sm:$0xff] %v6640_v36  ;;  %v6662_v36 = vld [vmem:[#allocation2 + $0xc8] sm:$0xff] }
 0x3b1   : > { %2768 = vrot.lane.b32.xlu1 %v2353_v61, %s4678_s20  ;;  %v6642_v61 = vld [vmem:[#allocation2 + $0x90] sm:$0xff] }
 0x3b2   : > { %2766 = vrot.lane.b32.xlu0 %v2352_v49, %s4678_s20 }
 0x3b3   : > { %v6648_v49 = vpop.permute.xlu1 %2616 }
 0x3b4   : > { %8028 = vst [vmem:[#allocation72_spill] sm:$0xff] %v6648_v49  ;;  %v6652_v14 = vpop.permute.xlu0 %2614 }
 0x3b5   : > { %2836 = vrot.lane.b32.xlu1 %v6578_v13, %s4679_s21  ;;  %8030 = vst [vmem:[#allocation17_spill] sm:$0xff] %v6652_v14  ;;  %v6674_v14 = vld [vmem:[#allocation2 + $0xe0] sm:$0xff] }
 0x3b6   : > { %2834 = vrot.lane.b32.xlu0 %v6582_v29, %s4679_s21 }
 0x3b9   : > { %2840 = vrot.lane.b32.xlu1 %v6590_v11, %s4679_s21 }
 0x3ba   : > { %2838 = vrot.lane.b32.xlu0 %v6594_v17, %s4679_s21 }
 0x3bb   : > { %v6660_v56 = vpop.permute.xlu1 %2620 }
 0x3bc   : > { %8032 = vst [vmem:[#allocation74_spill] sm:$0xff] %v6660_v56  ;;  %v6664_v21 = vpop.permute.xlu0 %2618 }
 0x3bd   : > { %2844 = vrot.lane.b32.xlu1 %v6602_v39, %s4679_s21  ;;  %8033 = vst [vmem:[#allocation21_spill] sm:$0xff] %v6664_v21  ;;  %v6686_v21 = vld [vmem:[#allocation2 + $0xf8] sm:$0xff] }
 0x3be   : > { %2842 = vrot.lane.b32.xlu0 %v6606_v37, %s4679_s21 }
 0x3c1   : > { %2848 = vrot.lane.b32.xlu1 %v6614_v6, %s4679_s21 }
 0x3c2   : > { %2846 = vrot.lane.b32.xlu0 %v6618_v41, %s4679_s21 }
 0x3c3   : > { %v6672_v49 = vpop.permute.xlu1 %2624 }
 0x3c4   : > { %8034 = vst [vmem:[#allocation19_spill] sm:$0xff] %v6672_v49  ;;  %v6676_v26 = vpop.permute.xlu0 %2622 }
 0x3c5   : > { %2852 = vrot.lane.b32.xlu1 %v6626_v38, %s4679_s21  ;;  %8035 = vst [vmem:[#allocation7_spill] sm:$0xff] %v6676_v26  ;;  %v6698_v26 = vld [vmem:[#allocation2 + $0x110] sm:$0xff] }
 0x3c6   : > { %2850 = vrot.lane.b32.xlu0 %v6630_v31, %s4679_s21  ;;  %8039 = vst [vmem:[#allocation135_spill] sm:$0xff] %v6698_v26 }
 0x3c9   : > { %2856 = vrot.lane.b32.xlu1 %v6638_v51, %s4679_s21 }
 0x3ca   : > { %2854 = vrot.lane.b32.xlu0 %v6642_v61, %s4679_s21 }
 0x3cb   : > { %v6684_v56 = vpop.permute.xlu1 %2628 }
 0x3cc   : > { %8036 = vst [vmem:[#allocation96_spill] sm:$0xff] %v6684_v56  ;;  %v6688_v62 = vpop.permute.xlu0 %2626 }
 0x3cd   : > { %2860 = vrot.lane.b32.xlu1 %v6650_v28, %s4679_s21  ;;  %8037 = vst [vmem:[#allocation58_spill] sm:$0xff] %v6688_v62 }
 0x3ce   : > { %2858 = vrot.lane.b32.xlu0 %v6654_v30, %s4679_s21 }
 0x3d1   : > { %2864 = vrot.lane.b32.xlu1 %v6662_v36, %s4679_s21 }
 0x3d2   : > { %2862 = vrot.lane.b32.xlu0 %v6666_v12, %s4679_s21 }
 0x3d3   : > { %v6696_v49 = vpop.permute.xlu1 %2632 }
 0x3d4   : > { %8038 = vst [vmem:[#allocation5_spill] sm:$0xff] %v6696_v49  ;;  %v6700_v35 = vpop.permute.xlu0 %2630  ;;  %v2253_v49 = vld [vmem:[%s7602_s2] sm:$0xff] }
 0x3d5   : > { %2868 = vrot.lane.b32.xlu1 %v6674_v14, %s4679_s21  ;;  %8040 = vst [vmem:[#allocation56_spill] sm:$0xff] %v6700_v35  ;;  %v2254_v35 = vld [vmem:[%s7602_s2 + $0x8] sm:$0xff] }
 0x3d6   : > { %2866 = vrot.lane.b32.xlu0 %v6678_v47, %s4679_s21 }
 0x3d9   : > { %2872 = vrot.lane.b32.xlu1 %v6686_v21, %s4679_s21 }
 0x3da   : > { %2870 = vrot.lane.b32.xlu0 %v6690_v40, %s4679_s21 }
 0x3db   : > { %v6708_v56 = vpop.permute.xlu1 %2636 }
 0x3dc   : > { %8042 = vst [vmem:[#allocation25_spill] sm:$0xff] %v6708_v56  ;;  %v6710_v62 = vpop.permute.xlu0 %2634 }
 0x3dd   : > { %2876 = vrot.lane.b32.xlu1 %v6698_v26, %s4679_s21  ;;  %8043 = vst [vmem:[#allocation76_spill] sm:$0xff] %v6710_v62 }
 0x3de   : > { %2874 = vrot.lane.b32.xlu0 %v6702_v34, %s4679_s21  ;;  %v4610_v34 = vpack.c.bf16 %v2254_v35, %v2253_v49 }
 0x3e0   : > { %4611 = vmatprep.subr.bf16.mxu1 %v4610_v34 }
 0x3e1   : > { %2964 = vrot.lane.b32.xlu1 %v6375_v50, %s4680_s22  ;;  %4613 = vmatpush3.bf16.msra.mxu1 %v4610_v34  ;;  %v2255_v50 = vld [vmem:[%s7602_s2 + $0x10] sm:$0xff]  ;;  %v2257_v34 = vld [vmem:[%s7602_s2 + $0x20] sm:$0xf] }
 0x3e2   : > { %2962 = vrot.lane.b32.xlu0 %v6380_v1, %s4680_s22  ;;  %v2256_v1 = vld [vmem:[%s7602_s2 + $0x18] sm:$0xff] }
 0x3e3   : > { %v6722_v26 = vpop.permute.xlu1 %2640  ;;  %v4614_v35 = vpack.c.bf16 %v2256_v1, %v2255_v50 }
 0x3e4   : > { %8044 = vst [vmem:[#allocation23_spill] sm:$0xff] %v6722_v26  ;;  %v6724_v56 = vpop.permute.xlu0 %2638 }
 0x3e5   : > { %8045 = vst [vmem:[#allocation98_spill] sm:$0xff] %v6724_v56  ;;  %3092 = vrot.lane.b32.xlu1 %v6474_v0, %s4681_s23  ;;  %4615 = vmatprep.subr.bf16.mxu1 %v4614_v35 }
 0x3e6   : > { %3090 = vrot.lane.b32.xlu0 %v6478_v54, %s4681_s23  ;;  %4617 = vmatpush3.bf16.msra.mxu1 %v4614_v35 }
 0x3e7   : > { %v6736_v26 = vpop.permute.xlu1 %2708  ;;  %4552 = vmatprep.subr.msk.mxu1 %vm1960_vm3, %v2257_v34 }
 0x3e8   : > { %v6738_v49 = vpop.permute.xlu0 %2706 }
 0x3e9   : > { %3220 = vrot.lane.b32.xlu1 %v6590_v11, %s4682_s24 }
 0x3ea   : > { %3218 = vrot.lane.b32.xlu0 %v6594_v17, %s4682_s24  ;;  %4553 = vmatpush3.msk.msra.mxu1 %vm1960_vm3, %v2257_v34 }
 0x3eb   : > { %v6744_v0 = vpop.permute.xlu1 %2712 }
 0x3ec   : > { %v6746_v54 = vpop.permute.xlu0 %2710 }
 0x3ed   : > { %2966 = vrot.lane.b32.xlu1 %v6389_v55, %s4680_s22 }
 0x3ee   : > { %3346 = vrot.lane.b32.xlu0 %v6389_v55, %s4683_s6 }
 0x3ef   : > { %v6757_v50 = vpop.permute.xlu1 %2716 }
 0x3f0   : > { %v6759_v1 = vpop.permute.xlu0 %2714 }
 0x3f1   : > { %3474 = vrot.lane.b32.xlu1 %v6486_v4, %s4684_s9 }
 0x3f2   : > { %3348 = vrot.lane.b32.xlu0 %v6385_v20, %s4683_s6 }
 0x3f3   : > { %v6765_v35 = vpop.permute.xlu1 %2720 }
 0x3f4   : > { %8046 = vst [vmem:[#allocation75_spill] sm:$0xff] %v6765_v35  ;;  %v6767_v56 = vpop.permute.xlu0 %2718 }
 0x3f5   : > { %3094 = vrot.lane.b32.xlu1 %v6486_v4, %s4681_s23 }
 0x3f6   : > { %2968 = vrot.lane.b32.xlu0 %v6385_v20, %s4680_s22 }
 0x3f7   : > { %v6773_v55 = vpop.permute.xlu1 %2724 }
 0x3f8   : > { %v6775_v34 = vpop.permute.xlu0 %2722 }
 0x3f9   : > { %3096 = vrot.lane.b32.xlu1 %v6482_v7, %s4681_s23 }
 0x3fa   : > { %3476 = vrot.lane.b32.xlu0 %v6482_v7, %s4684_s9 }
 0x3fb   : > { %v6781_v62 = vpop.permute.xlu1 %2728 }
 0x3fc   : > { %8047 = vst [vmem:[#allocation13_spill] sm:$0xff] %v6781_v62  ;;  %v6783_v35 = vpop.permute.xlu0 %2726 }
 0x3fd   : > { %8048 = vst [vmem:[#allocation97_spill] sm:$0xff] %v6783_v35  ;;  %3224 = vrot.lane.b32.xlu1 %v6602_v39, %s4682_s24 }
 0x3fe   : > { %3222 = vrot.lane.b32.xlu0 %v6606_v37, %s4682_s24 }
 0x3ff   : > { %v6789_v20 = vpop.permute.xlu1 %2732 }
 0x400   : > { %8049 = vst [vmem:[#allocation62_spill] sm:$0xff] %v6789_v20  ;;  %v6791_v4 = vpop.permute.xlu0 %2730 }
 0x401   : > { %8050 = vst [vmem:[#allocation9_spill] sm:$0xff] %v6791_v4  ;;  %2970 = vrot.lane.b32.xlu1 %v6399_v59, %s4680_s22 }
 0x402   : > { %3350 = vrot.lane.b32.xlu0 %v6399_v59, %s4683_s6 }
 0x403   : > { %v6797_v7 = vpop.permute.xlu1 %2736 }
 0x404   : > { %8051 = vst [vmem:[#allocation137_spill] sm:$0xff] %v6797_v7  ;;  %v6799_v62 = vpop.permute.xlu0 %2734 }
 0x405   : > { %8052 = vst [vmem:[#allocation60_spill] sm:$0xff] %v6799_v62  ;;  %3478 = vrot.lane.b32.xlu1 %v6494_v32, %s4684_s9 }
 0x406   : > { %3352 = vrot.lane.b32.xlu0 %v6394_v18, %s4683_s6 }
 0x407   : > { %v6805_v35 = vpop.permute.xlu1 %2740 }
 0x408   : > { %8053 = vst [vmem:[#allocation136_spill] sm:$0xff] %v6805_v35  ;;  %v6807_v20 = vpop.permute.xlu0 %2738 }
 0x409   : > { %8054 = vst [vmem:[#allocation29_spill] sm:$0xff] %v6807_v20  ;;  %3098 = vrot.lane.b32.xlu1 %v6494_v32, %s4681_s23 }
 0x40a   : > { %2972 = vrot.lane.b32.xlu0 %v6394_v18, %s4680_s22 }
 0x40b   : > { %v6813_v59 = vpop.permute.xlu1 %2744 }
 0x40c   : > { %8055 = vst [vmem:[#allocation78_spill] sm:$0xff] %v6813_v59  ;;  %v6815_v7 = vpop.permute.xlu0 %2742 }
 0x40d   : > { %8056 = vst [vmem:[#allocation27_spill] sm:$0xff] %v6815_v7  ;;  %3100 = vrot.lane.b32.xlu1 %v6490_v63, %s4681_s23 }
 0x40e   : > { %3480 = vrot.lane.b32.xlu0 %v6490_v63, %s4684_s9 }
 0x40f   : > { %v6821_v62 = vpop.permute.xlu1 %2748 }
 0x410   : > { %8057 = vst [vmem:[#allocation100_spill] sm:$0xff] %v6821_v62  ;;  %v6823_v35 = vpop.permute.xlu0 %2746 }
 0x411   : > { %8058 = vst [vmem:[#allocation77_spill] sm:$0xff] %v6823_v35  ;;  %3228 = vrot.lane.b32.xlu1 %v6614_v6, %s4682_s24 }
 0x412   : > { %3226 = vrot.lane.b32.xlu0 %v6618_v41, %s4682_s24 }
 0x413   : > { %v6829_v18 = vpop.permute.xlu1 %2752 }
 0x414   : > { %8059 = vst [vmem:[#allocation20_spill] sm:$0xff] %v6829_v18  ;;  %v6831_v32 = vpop.permute.xlu0 %2750 }
 0x415   : > { %8060 = vst [vmem:[#allocation99_spill] sm:$0xff] %v6831_v32  ;;  %2974 = vrot.lane.b32.xlu1 %v6408_v9, %s4680_s22 }
 0x416   : > { %3354 = vrot.lane.b32.xlu0 %v6408_v9, %s4683_s6 }
 0x417   : > { %v6837_v63 = vpop.permute.xlu1 %2756 }
 0x418   : > { %8061 = vst [vmem:[#allocation66_spill] sm:$0xff] %v6837_v63  ;;  %v6839_v62 = vpop.permute.xlu0 %2754 }
 0x419   : > { %8062 = vst [vmem:[#allocation16_spill] sm:$0xff] %v6839_v62  ;;  %3482 = vrot.lane.b32.xlu1 %v6502_v24, %s4684_s9 }
 0x41a   : > { %3356 = vrot.lane.b32.xlu0 %v6403_v23, %s4683_s6 }
 0x41b   : > { %v6845_v35 = vpop.permute.xlu1 %2760 }
 0x41c   : > { %8063 = vst [vmem:[#allocation139_spill] sm:$0xff] %v6845_v35  ;;  %v6847_v18 = vpop.permute.xlu0 %2758 }
 0x41d   : > { %8064 = vst [vmem:[#allocation64_spill] sm:$0xff] %v6847_v18  ;;  %3102 = vrot.lane.b32.xlu1 %v6502_v24, %s4681_s23 }
 0x41e   : > { %2976 = vrot.lane.b32.xlu0 %v6403_v23, %s4680_s22 }
 0x41f   : > { %v6853_v9 = vpop.permute.xlu1 %2764 }
 0x420   : > { %8065 = vst [vmem:[#allocation138_spill] sm:$0xff] %v6853_v9  ;;  %v6855_v63 = vpop.permute.xlu0 %2762 }
 0x421   : > { %8066 = vst [vmem:[#allocation33_spill] sm:$0xff] %v6855_v63  ;;  %3104 = vrot.lane.b32.xlu1 %v6498_v57, %s4681_s23 }
 0x422   : > { %3484 = vrot.lane.b32.xlu0 %v6498_v57, %s4684_s9 }
 0x423   : > { %v6861_v62 = vpop.permute.xlu1 %2768 }
 0x424   : > { %8067 = vst [vmem:[#allocation80_spill] sm:$0xff] %v6861_v62  ;;  %v6863_v35 = vpop.permute.xlu0 %2766 }
 0x425   : > { %8068 = vst [vmem:[#allocation31_spill] sm:$0xff] %v6863_v35  ;;  %3232 = vrot.lane.b32.xlu1 %v6626_v38, %s4682_s24 }
 0x426   : > { %3230 = vrot.lane.b32.xlu0 %v6630_v31, %s4682_s24 }
 0x427   : > { %v6869_v23 = vpop.permute.xlu1 %2836 }
 0x428   : > { %v2835_v24 = vpop.permute.xlu0 %2834 }
 0x429   : > { %2978 = vrot.lane.b32.xlu1 %v6418_v48, %s4680_s22 }
 0x42a   : > { %3358 = vrot.lane.b32.xlu0 %v6418_v48, %s4683_s6 }
 0x42b   : > { %v6875_v57 = vpop.permute.xlu1 %2840 }
 0x42c   : > { %v6877_v62 = vpop.permute.xlu0 %2838 }
 0x42d   : > { %3486 = vrot.lane.b32.xlu1 %v6510_v53, %s4684_s9 }
 0x42e   : > { %3360 = vrot.lane.b32.xlu0 %v6413_v8, %s4683_s6 }
 0x42f   : > { %v6883_v35 = vpop.permute.xlu1 %2844 }
 0x430   : > { %v6885_v9 = vpop.permute.xlu0 %2842 }
 0x431   : > { %3106 = vrot.lane.b32.xlu1 %v6510_v53, %s4681_s23 }
 0x432   : > { %2980 = vrot.lane.b32.xlu0 %v6413_v8, %s4680_s22 }
 0x433   : > { %v6891_v48 = vpop.permute.xlu1 %2848 }
 0x434   : > { %v6893_v63 = vpop.permute.xlu0 %2846 }
 0x435   : > { %3108 = vrot.lane.b32.xlu1 %v6506_v46, %s4681_s23 }
 0x436   : > { %3488 = vrot.lane.b32.xlu0 %v6506_v46, %s4684_s9 }
 0x437   : > { %v6899_v18 = vpop.permute.xlu1 %2852 }
 0x438   : > { %v6901_v32 = vpop.permute.xlu0 %2850 }
 0x439   : > { %3236 = vrot.lane.b32.xlu1 %v6638_v51, %s4682_s24 }
 0x43a   : > { %3234 = vrot.lane.b32.xlu0 %v6642_v61, %s4682_s24 }
 0x43b   : > { %v6907_v8 = vpop.permute.xlu1 %2856 }
 0x43c   : > { %v6909_v53 = vpop.permute.xlu0 %2854 }
 0x43d   : > { %2982 = vrot.lane.b32.xlu1 %v6428_v42, %s4680_s22 }
 0x43e   : > { %3362 = vrot.lane.b32.xlu0 %v6428_v42, %s4683_s6 }
 0x43f   : > { %v6915_v46 = vpop.permute.xlu1 %2860 }
 0x440   : > { %8069 = vst [vmem:[#allocation102_spill] sm:$0xff] %v6915_v46  ;;  %v6917_v59 = vpop.permute.xlu0 %2858 }
 0x441   : > { %8070 = vst [vmem:[#allocation79_spill] sm:$0xff] %v6917_v59  ;;  %3490 = vrot.lane.b32.xlu1 %v6518_v10, %s4684_s9 }
 0x442   : > { %3364 = vrot.lane.b32.xlu0 %v6423_v15, %s4683_s6 }
 0x443   : > { %v6923_v7 = vpop.permute.xlu1 %2864 }
 0x444   : > { %8071 = vst [vmem:[#allocation24_spill] sm:$0xff] %v6923_v7  ;;  %v6925_v20 = vpop.permute.xlu0 %2862 }
 0x445   : > { %8072 = vst [vmem:[#allocation101_spill] sm:$0xff] %v6925_v20  ;;  %3110 = vrot.lane.b32.xlu1 %v6518_v10, %s4681_s23 }
 0x446   : > { %2984 = vrot.lane.b32.xlu0 %v6423_v15, %s4680_s22 }
 0x447   : > { %v6931_v42 = vpop.permute.xlu1 %2868 }
 0x448   : > { %8073 = vst [vmem:[#allocation118_spill] sm:$0xff] %v6931_v42  ;;  %v6933_v46 = vpop.permute.xlu0 %2866 }
 0x449   : > { %8074 = vst [vmem:[#allocation22_spill] sm:$0xff] %v6933_v46  ;;  %3112 = vrot.lane.b32.xlu1 %v6514_v45, %s4681_s23 }
 0x44a   : > { %3492 = vrot.lane.b32.xlu0 %v6514_v45, %s4684_s9 }
 0x44b   : > { %v6939_v51 = vpop.permute.xlu1 %2872 }
 0x44c   : > { %8075 = vst [vmem:[#allocation141_spill] sm:$0xff] %v6939_v51  ;;  %v6941_v7 = vpop.permute.xlu0 %2870 }
 0x44d   : > { %8076 = vst [vmem:[#allocation69_spill] sm:$0xff] %v6941_v7  ;;  %3240 = vrot.lane.b32.xlu1 %v6650_v28, %s4682_s24  ;;  %v2493_v7 = vld [vmem:[#allocation2 + $0xb1] sm:$0xff] }
 0x44e   : > { %3238 = vrot.lane.b32.xlu0 %v6654_v30, %s4682_s24 }
 0x44f   : > { %v6947_v15 = vpop.permute.xlu1 %2876 }
 0x450   : > { %8077 = vst [vmem:[#allocation140_spill] sm:$0xff] %v6947_v15  ;;  %v6949_v10 = vpop.permute.xlu0 %2874  ;;  %v2258_v15 = vld [vmem:[#allocation2] sm:$0xff] }
 0x451   : > { %8078 = vst [vmem:[#allocation37_spill] sm:$0xff] %v6949_v10  ;;  %2986 = vrot.lane.b32.xlu1 %v6435_v44, %s4680_s22 }
 0x452   : > { %3366 = vrot.lane.b32.xlu0 %v6435_v44, %s4683_s6  ;;  %v3570_v44 = vsel %vm171_vm0, %v2258_v15, %v6557_v5 }
 0x453   : > { %v2965_v45 = vpop.permute.xlu1 %2964  ;;  %v3602_v20 = vsel %vm1632_vm4, %v3570_v44, %v6738_v49  ;;  %v2259_v49 = vld [vmem:[#allocation2 + $0x8] sm:$0xff] }
 0x454   : > { %v2963_v51 = vpop.permute.xlu0 %2962  ;;  %v3634_v30 = vsel %vm1665_vm5, %v3602_v20, %v2835_v24  ;;  %v2400_v20 = vld [vmem:[#allocation2 + $0xc1] sm:$0xff] }
 0x455   : > { %3494 = vrot.lane.b32.xlu1 %v6526_v16, %s4684_s9  ;;  %v3666_v59 = vsel %vm1698_vm6, %v3634_v30, %v2963_v51  ;;  %v3571_v30 = vsel %vm171_vm0, %v2259_v49, %v6554_v52 }
 0x456   : > { %3368 = vrot.lane.b32.xlu0 %v2493_v7, %s4683_s6 }
 0x457   : > { %v3093_v42 = vpop.permute.xlu1 %3092 }
 0x458   : > { %v3091_v46 = vpop.permute.xlu0 %3090 }
 0x459   : > { %3114 = vrot.lane.b32.xlu1 %v6526_v16, %s4681_s23  ;;  %v3698_v4 = vsel %vm1731_vm7, %v3666_v59, %v3091_v46  ;;  %v2495_v46 = vld [vmem:[#allocation2 + $0xc9] sm:$0xff] }
 0x45a   : > { %2988 = vrot.lane.b32.xlu0 %v2493_v7, %s4680_s22 }
 0x45b   : > { %v3221_v10 = vpop.permute.xlu1 %3220 }
 0x45c   : > { %v3219_v28 = vpop.permute.xlu0 %3218 }
 0x45d   : > { %3116 = vrot.lane.b32.xlu1 %v6522_v60, %s4681_s23  ;;  %v3730_v5 = vsel %vm1764_vm8, %v3698_v4, %v3219_v28  ;;  %v3603_v28 = vsel %vm1632_vm4, %v3571_v30, %v6736_v26  ;;  %v2402_v30 = vld [vmem:[#allocation2 + $0xd9] sm:$0xff] }
 0x45e   : > { %3496 = vrot.lane.b32.xlu0 %v6522_v60, %s4684_s9 }
 0x45f   : > { %v2967_v16 = vpop.permute.xlu1 %2966 }
 0x460   : > { %v3347_v7 = vpop.permute.xlu0 %3346 }
 0x461   : > { %3244 = vrot.lane.b32.xlu1 %v6662_v36, %s4682_s24  ;;  %v3762_v15 = vsel %vm1797_vm9, %v3730_v5, %v3347_v7  ;;  %v3635_v36 = vsel %vm1665_vm5, %v3603_v28, %v6869_v23 }
 0x462   : > { %3242 = vrot.lane.b32.xlu0 %v6666_v12, %s4682_s24  ;;  %v3667_v59 = vsel %vm1698_vm6, %v3635_v36, %v2965_v45 }
 0x463   : > { %v3475_v60 = vpop.permute.xlu1 %3474  ;;  %v3699_v7 = vsel %vm1731_vm7, %v3667_v59, %v3093_v42  ;;  %v3572_v42 = vsel %vm171_vm0, %v6582_v29, %v6564_v33  ;;  %v2497_v59 = vld [vmem:[#allocation2 + $0xe1] sm:$0xff] }
 0x464   : > { %v3349_v44 = vpop.permute.xlu0 %3348  ;;  %v3794_v24 = vsel %vm1830_vm10, %v3762_v15, %v3475_v60  ;;  %v3731_v52 = vsel %vm1764_vm8, %v3699_v7, %v3221_v10  ;;  %v3604_v10 = vsel %vm1632_vm4, %v3572_v42, %v6746_v54  ;;  %v2404_v42 = vld [vmem:[#allocation2 + $0xf1] sm:$0xff] }
 0x465   : > { %2990 = vrot.lane.b32.xlu1 %v2400_v20, %s4680_s22  ;;  %4554 = vmatprep.mubr.msk.f32.mxu1 %vm1863_vm11, %v3794_v24  ;;  %v3763_v26 = vsel %vm1797_vm9, %v3731_v52, %v3349_v44 }
 0x466   : > { %3370 = vrot.lane.b32.xlu0 %v2400_v20, %s4683_s6 }
 0x467   : > { %v3095_v51 = vpop.permute.xlu1 %3094 }
 0x468   : > { %v2969_v4 = vpop.permute.xlu0 %2968 }
 0x469   : > { %3498 = vrot.lane.b32.xlu1 %v6534_v43, %s4684_s9 }
 0x46a   : > { %3372 = vrot.lane.b32.xlu0 %v2495_v46, %s4683_s6 }
 0x46b   : > { %v3097_v5 = vpop.permute.xlu1 %3096 }
 0x46c   : > { %v3477_v49 = vpop.permute.xlu0 %3476 }
 0x46d   : > { %v3795_v15 = vsel %vm1830_vm10, %v3763_v26, %v3477_v49  ;;  %3118 = vrot.lane.b32.xlu1 %v6534_v43, %s4681_s23  ;;  %v3636_v43 = vsel %vm1665_vm5, %v3604_v10, %v6877_v62 }
 0x46e   : > { %2992 = vrot.lane.b32.xlu0 %v2495_v46, %s4680_s22  ;;  %4555 = vmatmul.mubr.msk.f32.vlgmr.msra.gmra.mrb[0].mxu1 %vm1863_vm11, %v3795_v15  ;;  %v3668_v44 = vsel %vm1698_vm6, %v3636_v43, %v2967_v16 }
 0x46f   : > { %v3225_v23 = vpop.permute.xlu1 %3224  ;;  %v3700_v24 = vsel %vm1731_vm7, %v3668_v44, %v3095_v51 }
 0x470   : > { %v3223_v45 = vpop.permute.xlu0 %3222 }
 0x471   : > { %3120 = vrot.lane.b32.xlu1 %v6530_v19, %s4681_s23  ;;  %v3732_v33 = vsel %vm1764_vm8, %v3700_v24, %v3223_v45 }
 0x472   : > { %3500 = vrot.lane.b32.xlu0 %v6530_v19, %s4684_s9 }
 0x473   : > { %v2971_v60 = vpop.permute.xlu1 %2970 }
 0x474   : > { %v3351_v20 = vpop.permute.xlu0 %3350 }
 0x475   : > { %3248 = vrot.lane.b32.xlu1 %v6674_v14, %s4682_s24  ;;  %v3764_v29 = vsel %vm1797_vm9, %v3732_v33, %v3351_v20  ;;  %v3573_v14 = vsel %vm171_vm0, %v6578_v13, %v6562_v25  ;;  %v2499_v20 = vld [vmem:[#allocation2 + $0xf9] sm:$0xff] }
 0x476   : > { %3246 = vrot.lane.b32.xlu0 %v6678_v47, %s4682_s24  ;;  %v3605_v47 = vsel %vm1632_vm4, %v3573_v14, %v6744_v0 }
 0x477   : > { %v3479_v19 = vpop.permute.xlu1 %3478  ;;  %v3637_v28 = vsel %vm1665_vm5, %v3605_v47, %v6875_v57 }
 0x478   : > { %v3796_v54 = vsel %vm1830_vm10, %v3764_v29, %v3479_v19  ;;  %v3353_v62 = vpop.permute.xlu0 %3352  ;;  %v3669_v36 = vsel %vm1698_vm6, %v3637_v28, %v2969_v4 }
 0x479   : > { %2994 = vrot.lane.b32.xlu1 %v2402_v30, %s4680_s22  ;;  %4557 = vmatprep.mubr.msk.f32.mxu1 %vm1863_vm11, %v3796_v54  ;;  %v3701_v46 = vsel %vm1731_vm7, %v3669_v36, %v3097_v5  ;;  %v3574_v5 = vsel %vm171_vm0, %v6594_v17, %v6571_v22  ;;  %v8079_v54 = vld [vmem:[#allocation6_spill] sm:$0xff] }
 0x47a   : > { %3374 = vrot.lane.b32.xlu0 %v2402_v30, %s4683_s6  ;;  %v3733_v25 = vsel %vm1764_vm8, %v3701_v46, %v3225_v23  ;;  %v3606_v26 = vsel %vm1632_vm4, %v3574_v5, %v6759_v1  ;;  %v8080_v30 = vld [vmem:[#allocation3_spill] sm:$0xff] }
 0x47b   : > { %v3099_v16 = vpop.permute.xlu1 %3098  ;;  %v3765_v0 = vsel %vm1797_vm9, %v3733_v25, %v3353_v62  ;;  %v3576_v62 = vsel %vm171_vm0, %v6606_v37, %v8079_v54  ;;  %v8081_v37 = vld [vmem:[#allocation135_spill] sm:$0xff] }
 0x47c   : > { %v2973_v51 = vpop.permute.xlu0 %2972  ;;  %v3608_v14 = vsel %vm1632_vm4, %v3576_v62, %v6767_v56 }
 0x47d   : > { %3502 = vrot.lane.b32.xlu1 %v6542_v3, %s4684_s9 }
 0x47e   : > { %3376 = vrot.lane.b32.xlu0 %v2497_v59, %s4683_s6 }
 0x47f   : > { %v3101_v13 = vpop.permute.xlu1 %3100 }
 0x480   : > { %v3481_v7 = vpop.permute.xlu0 %3480 }
 0x481   : > { %v3797_v52 = vsel %vm1830_vm10, %v3765_v0, %v3481_v7  ;;  %3122 = vrot.lane.b32.xlu1 %v6542_v3, %s4681_s23  ;;  %v3638_v3 = vsel %vm1665_vm5, %v3606_v26, %v6885_v9  ;;  %v8083_v0 = vld [vmem:[#allocation4_spill] sm:$0xff] }
 0x482   : > { %2996 = vrot.lane.b32.xlu0 %v2497_v59, %s4680_s22  ;;  %4558 = vmatmul.mubr.msk.f32.gmra.mrb[2].mxu1 %vm1863_vm11, %v3797_v52  ;;  %v3670_v15 = vsel %vm1698_vm6, %v3638_v3, %v2971_v60  ;;  %v8082_v59 = vld [vmem:[#allocation134_spill] sm:$0xff]  ;;  %v3577_v7 = vsel %vm171_vm0, %v6602_v39, %v8083_v0  ;;  %v8084_v52 = vld [vmem:[#allocation75_spill] sm:$0xff] }
 0x483   : > { %v3229_v57 = vpop.permute.xlu1 %3228  ;;  %v3702_v45 = vsel %vm1731_vm7, %v3670_v15, %v3099_v16  ;;  %v2532_v3 = vld [vmem:[#allocation2 + $0x10a] sm:$0xff] }
 0x484   : > { %v3227_v4 = vpop.permute.xlu0 %3226  ;;  %v2501_v15 = vld [vmem:[#allocation2 + $0x111] sm:$0xff] }
 0x485   : > { %3124 = vrot.lane.b32.xlu1 %v6538_v58, %s4681_s23  ;;  %v3734_v22 = vsel %vm1764_vm8, %v3702_v45, %v3227_v4 }
 0x486   : > { %3504 = vrot.lane.b32.xlu0 %v6538_v58, %s4684_s9 }
 0x487   : > { %v2975_v49 = vpop.permute.xlu1 %2974 }
 0x488   : > { %v3355_v23 = vpop.permute.xlu0 %3354 }
 0x489   : > { %3252 = vrot.lane.b32.xlu1 %v6686_v21, %s4682_s24  ;;  %v3766_v17 = vsel %vm1797_vm9, %v3734_v22, %v3355_v23  ;;  %v3575_v21 = vsel %vm171_vm0, %v6590_v11, %v6568_v2 }
 0x48a   : > { %3250 = vrot.lane.b32.xlu0 %v6690_v40, %s4682_s24  ;;  %v3607_v40 = vsel %vm1632_vm4, %v3575_v21, %v6757_v50 }
 0x48b   : > { %v3483_v58 = vpop.permute.xlu1 %3482  ;;  %v3639_v43 = vsel %vm1665_vm5, %v3607_v40, %v6883_v35 }
 0x48c   : > { %v3798_v1 = vsel %vm1830_vm10, %v3766_v17, %v3483_v58  ;;  %v3357_v9 = vpop.permute.xlu0 %3356  ;;  %v3671_v44 = vsel %vm1698_vm6, %v3639_v43, %v2973_v51 }
 0x48d   : > { %2998 = vrot.lane.b32.xlu1 %v2404_v42, %s4680_s22  ;;  %4560 = vmatprep.mubr.msk.f32.mxu1 %vm1863_vm11, %v3798_v1  ;;  %v3703_v24 = vsel %vm1731_vm7, %v3671_v44, %v3101_v13  ;;  %v2406_v13 = vld [vmem:[#allocation2 + $0x109] sm:$0xff] }
 0x48e   : > { %3378 = vrot.lane.b32.xlu0 %v2404_v42, %s4683_s6  ;;  %v3735_v2 = vsel %vm1764_vm8, %v3703_v24, %v3229_v57  ;;  %v3609_v57 = vsel %vm1632_vm4, %v3577_v7, %v8084_v52  ;;  %v8085_v42 = vld [vmem:[#allocation63_spill] sm:$0xff] }
 0x48f   : > { %v3103_v10 = vpop.permute.xlu1 %3102  ;;  %v3767_v50 = vsel %vm1797_vm9, %v3735_v2, %v3357_v9  ;;  %v3641_v5 = vsel %vm1665_vm5, %v3609_v57, %v6891_v48  ;;  %v2439_v9 = vld [vmem:[#allocation2 + $0x112] sm:$0xff]  ;;  %v3578_v21 = vsel %vm171_vm0, %v6618_v41, %v8085_v42  ;;  %v2441_v52 = vld [vmem:[#allocation2 + $0x12a] sm:$0xff] }
 0x490   : > { %v2977_v60 = vpop.permute.xlu0 %2976  ;;  %v3610_v40 = vsel %vm1632_vm4, %v3578_v21, %v6775_v34 }
 0x491   : > { %3506 = vrot.lane.b32.xlu1 %v6550_v27, %s4684_s9 }
 0x492   : > { %3380 = vrot.lane.b32.xlu0 %v2499_v20, %s4683_s6 }
 0x493   : > { %v3105_v11 = vpop.permute.xlu1 %3104 }
 0x494   : > { %v3485_v33 = vpop.permute.xlu0 %3484 }
 0x495   : > { %v3799_v29 = vsel %vm1830_vm10, %v3767_v50, %v3485_v33  ;;  %3126 = vrot.lane.b32.xlu1 %v6550_v27, %s4681_s23  ;;  %v3640_v27 = vsel %vm1665_vm5, %v3608_v14, %v6893_v63  ;;  %v2502_v50 = vld [vmem:[#allocation2 + $0x121] sm:$0xff] }
 0x496   : > { %3000 = vrot.lane.b32.xlu0 %v2499_v20, %s4680_s22  ;;  %4561 = vmatmul.mubr.msk.f32.gmra.mrb[4].mxu1 %vm1863_vm11, %v3799_v29  ;;  %v3672_v16 = vsel %vm1698_vm6, %v3640_v27, %v2975_v49  ;;  %v3673_v49 = vsel %vm1698_vm6, %v3641_v5, %v2977_v60  ;;  %v7133_v60 = vld [vmem:[#allocation2 + $0x120] sm:$0xff]  ;;  %v7144_v33 = vld [vmem:[#allocation2 + $0x128] sm:$0xff]  ;;  %v8086_v29 = vld [vmem:[#allocation12_spill] sm:$0xff] }
 0x497   : > { %v3233_v35 = vpop.permute.xlu1 %3232  ;;  %v3704_v51 = vsel %vm1731_vm7, %v3672_v16, %v3103_v10  ;;  %v3705_v23 = vsel %vm1731_vm7, %v3673_v49, %v3105_v11  ;;  %v3642_v10 = vsel %vm1665_vm5, %v3610_v40, %v6901_v32  ;;  %v8089_v49 = vld [vmem:[#allocation8_spill] sm:$0xff] }
 0x498   : > { %v3231_v19 = vpop.permute.xlu0 %3230  ;;  %v3737_v39 = vsel %vm1764_vm8, %v3705_v23, %v3233_v35  ;;  %v3579_v35 = vsel %vm171_vm0, %v6614_v6, %v8086_v29  ;;  %v8090_v23 = vld [vmem:[#allocation13_spill] sm:$0xff] }
 0x499   : > { %3128 = vrot.lane.b32.xlu1 %v8080_v30, %s4681_s23  ;;  %v3736_v36 = vsel %vm1764_vm8, %v3704_v51, %v3231_v19  ;;  %v3611_v19 = vsel %vm1632_vm4, %v3579_v35, %v6773_v55 }
 0x49a   : > { %3508 = vrot.lane.b32.xlu0 %v8080_v30, %s4684_s9  ;;  %v3643_v62 = vsel %vm1665_vm5, %v3611_v19, %v6899_v18  ;;  %v2503_v18 = vld [vmem:[#allocation2 + $0x129] sm:$0xff] }
 0x49b   : > { %v2979_v47 = vpop.permute.xlu1 %2978 }
 0x49c   : > { %v3359_v28 = vpop.permute.xlu0 %3358  ;;  %v3674_v44 = vsel %vm1698_vm6, %v3642_v10, %v2979_v47 }
 0x49d   : > { %3256 = vrot.lane.b32.xlu1 %v8081_v37, %s4682_s24  ;;  %v3768_v56 = vsel %vm1797_vm9, %v3736_v36, %v3359_v28  ;;  %v2534_v28 = vld [vmem:[#allocation2 + $0x122] sm:$0xff] }
 0x49e   : > { %3254 = vrot.lane.b32.xlu0 %v8082_v59, %s4682_s24  ;;  %v8087_v59 = vld [vmem:[#allocation68_spill] sm:$0xff] }
 0x49f   : > { %v3487_v46 = vpop.permute.xlu1 %3486 }
 0x4a0   : > { %v3800_v25 = vsel %vm1830_vm10, %v3768_v56, %v3487_v46  ;;  %v3361_v63 = vpop.permute.xlu0 %3360  ;;  %v3580_v56 = vsel %vm171_vm0, %v6630_v31, %v8087_v59  ;;  %v8088_v46 = vld [vmem:[#allocation97_spill] sm:$0xff]  ;;  %v2380_v59 = vld [vmem:[#allocation2 + $0x150] sm:$0xff] }
 0x4a1   : > { %3002 = vrot.lane.b32.xlu1 %v2406_v13, %s4680_s22  ;;  %4563 = vmatprep.mubr.msk.f32.mxu1 %vm1863_vm11, %v3800_v25  ;;  %v3769_v22 = vsel %vm1797_vm9, %v3737_v39, %v3361_v63  ;;  %v3612_v25 = vsel %vm1632_vm4, %v3580_v56, %v8088_v46 }
 0x4a2   : > { %3382 = vrot.lane.b32.xlu0 %v2406_v13, %s4683_s6  ;;  %v3644_v63 = vsel %vm1665_vm5, %v3612_v25, %v6909_v53 }
 0x4a3   : > { %v3107_v4 = vpop.permute.xlu1 %3106 }
 0x4a4   : > { %v2981_v26 = vpop.permute.xlu0 %2980  ;;  %v3706_v24 = vsel %vm1731_vm7, %v3674_v44, %v3107_v4  ;;  %v2536_v44 = vld [vmem:[#allocation2 + $0x13a] sm:$0xff] }
 0x4a5   : > { %3510 = vrot.lane.b32.xlu1 %v2532_v3, %s4684_s9  ;;  %v3675_v14 = vsel %vm1698_vm6, %v3643_v62, %v2981_v26  ;;  %v7183_v26 = vld [vmem:[#allocation2 + $0x138] sm:$0xff] }
 0x4a6   : > { %3384 = vrot.lane.b32.xlu0 %v2501_v15, %s4683_s6 }
 0x4a7   : > { %v3109_v45 = vpop.permute.xlu1 %3108 }
 0x4a8   : > { %v3489_v17 = vpop.permute.xlu0 %3488  ;;  %v3707_v27 = vsel %vm1731_vm7, %v3675_v14, %v3109_v45 }
 0x4a9   : > { %v3801_v58 = vsel %vm1830_vm10, %v3769_v22, %v3489_v17  ;;  %3130 = vrot.lane.b32.xlu1 %v2532_v3, %s4681_s23 }
 0x4aa   : > { %3004 = vrot.lane.b32.xlu0 %v2501_v15, %s4680_s22  ;;  %4564 = vmatmul.mubr.msk.f32.gmra.mrb[6].mxu1 %vm1863_vm11, %v3801_v58  ;;  %v3581_v15 = vsel %vm171_vm0, %v6626_v38, %v8089_v49  ;;  %v2504_v58 = vld [vmem:[#allocation2 + $0x139] sm:$0xff] }
 0x4ab   : > { %v3237_v48 = vpop.permute.xlu1 %3236  ;;  %v3613_v39 = vsel %vm1632_vm4, %v3581_v15, %v8090_v23  ;;  %v8100_v49 = vld [vmem:[#allocation60_spill] sm:$0xff]  ;;  %v8101_v23 = vld [vmem:[#allocation101_spill] sm:$0xff] }
 0x4ac   : > { %v3235_v1 = vpop.permute.xlu0 %3234  ;;  %v3739_v6 = vsel %vm1764_vm8, %v3707_v27, %v3237_v48  ;;  %v3645_v22 = vsel %vm1665_vm5, %v3613_v39, %v6907_v8  ;;  %v2443_v27 = vld [vmem:[#allocation2 + $0x142] sm:$0xff] }
 0x4ad   : > { %3132 = vrot.lane.b32.xlu1 %v2439_v9, %s4681_s23  ;;  %v3738_v41 = vsel %vm1764_vm8, %v3706_v24, %v3235_v1  ;;  %v2473_v1 = vld [vmem:[#allocation2 + $0x140] sm:$0xff] }
 0x4ae   : > { %3512 = vrot.lane.b32.xlu0 %v2439_v9, %s4684_s9 }
 0x4af   : > { %v2983_v43 = vpop.permute.xlu1 %2982 }
 0x4b0   : > { %v3363_v20 = vpop.permute.xlu0 %3362  ;;  %v3676_v0 = vsel %vm1698_vm6, %v3644_v63, %v2983_v43 }
 0x4b1   : > { %2878 = vrot.lane.b32.xlu1 %v7133_v60, %s4679_s21  ;;  %v3770_v34 = vsel %vm1797_vm9, %v3738_v41, %v3363_v20  ;;  %v8091_v20 = vld [vmem:[#allocation18_spill] sm:$0xff] }
 0x4b2   : > { %3258 = vrot.lane.b32.xlu0 %v7133_v60, %s4682_s24  ;;  %v3582_v24 = vsel %vm171_vm0, %v6642_v61, %v8091_v20  ;;  %v2505_v41 = vld [vmem:[#allocation2 + $0x141] sm:$0xff] }
 0x4b3   : > { %v3491_v2 = vpop.permute.xlu1 %3490 }
 0x4b4   : > { %v3802_v32 = vsel %vm1830_vm10, %v3770_v34, %v3491_v2  ;;  %v3365_v11 = vpop.permute.xlu0 %3364  ;;  %v8092_v34 = vld [vmem:[#allocation9_spill] sm:$0xff] }
 0x4b5   : > { %3386 = vrot.lane.b32.xlu1 %v2502_v50, %s4683_s6  ;;  %4566 = vmatprep.mubr.msk.f32.mxu1 %vm1863_vm11, %v3802_v32  ;;  %v3771_v16 = vsel %vm1797_vm9, %v3739_v6, %v3365_v11  ;;  %v3614_v2 = vsel %vm1632_vm4, %v3582_v24, %v8092_v34  ;;  %v8093_v32 = vld [vmem:[#allocation79_spill] sm:$0xff]  ;;  %v8094_v6 = vld [vmem:[#allocation10_spill] sm:$0xff] }
 0x4b6   : > { %3260 = vrot.lane.b32.xlu0 %v7144_v33, %s4682_s24  ;;  %v3646_v11 = vsel %vm1665_vm5, %v3614_v2, %v8093_v32  ;;  %v2445_v32 = vld [vmem:[#allocation2 + $0x15a] sm:$0xff] }
 0x4b7   : > { %v3111_v54 = vpop.permute.xlu1 %3110 }
 0x4b8   : > { %v2985_v30 = vpop.permute.xlu0 %2984  ;;  %v3708_v57 = vsel %vm1731_vm7, %v3676_v0, %v3111_v54 }
 0x4b9   : > { %3006 = vrot.lane.b32.xlu1 %v2502_v50, %s4680_s22  ;;  %v3677_v48 = vsel %vm1698_vm6, %v3645_v22, %v2985_v30 }
 0x4ba   : > { %2880 = vrot.lane.b32.xlu0 %v7144_v33, %s4679_s21 }
 0x4bb   : > { %v3113_v47 = vpop.permute.xlu1 %3112 }
 0x4bc   : > { %v3493_v55 = vpop.permute.xlu0 %3492  ;;  %v3709_v9 = vsel %vm1731_vm7, %v3677_v48, %v3113_v47  ;;  %v8095_v47 = vld [vmem:[#allocation14_spill] sm:$0xff] }
 0x4bd   : > { %v3803_v51 = vsel %vm1830_vm10, %v3771_v16, %v3493_v55  ;;  %3514 = vrot.lane.b32.xlu1 %v2534_v28, %s4684_s9  ;;  %v3583_v16 = vsel %vm171_vm0, %v8095_v47, %v8094_v6  ;;  %v8096_v55 = vld [vmem:[#allocation62_spill] sm:$0xff] }
 0x4be   : > { %3388 = vrot.lane.b32.xlu0 %v2503_v18, %s4683_s6  ;;  %4567 = vmatmul.mubr.msk.f32.gmra.mrb[8].mxu1 %vm1863_vm11, %v3803_v51  ;;  %v8106_v6 = vld [vmem:[#allocation70_spill] sm:$0xff] }
 0x4bf   : > { %v3241_v37 = vpop.permute.xlu1 %3240  ;;  %v3586_v47 = vsel %vm171_vm0, %v6666_v12, %v8106_v6 }
 0x4c0   : > { %v3239_v36 = vpop.permute.xlu0 %3238  ;;  %v3741_v38 = vsel %vm1764_vm8, %v3709_v9, %v3241_v37 }
 0x4c1   : > { %3134 = vrot.lane.b32.xlu1 %v2534_v28, %s4681_s23  ;;  %v3740_v31 = vsel %vm1764_vm8, %v3708_v57, %v3239_v36  ;;  %v3615_v28 = vsel %vm1632_vm4, %v3583_v16, %v8096_v55  ;;  %v2475_v57 = vld [vmem:[#allocation2 + $0x158] sm:$0xff]  ;;  %v2477_v16 = vld [vmem:[#allocation2 + $0x170] sm:$0xff]  ;;  %v8107_v55 = vld [vmem:[#allocation29_spill] sm:$0xff] }
 0x4c2   : > { %3008 = vrot.lane.b32.xlu0 %v2503_v18, %s4680_s22  ;;  %v8097_v18 = vld [vmem:[#allocation102_spill] sm:$0xff] }
 0x4c3   : > { %v2987_v13 = vpop.permute.xlu1 %2986  ;;  %v3647_v37 = vsel %vm1665_vm5, %v3615_v28, %v8097_v18  ;;  %v3618_v28 = vsel %vm1632_vm4, %v3586_v47, %v8107_v55  ;;  %v8117_v47 = vld [vmem:[#allocation141_spill] sm:$0xff] }
 0x4c4   : > { %v3367_v7 = vpop.permute.xlu0 %3366  ;;  %v3678_v29 = vsel %vm1698_vm6, %v3646_v11, %v2987_v13 }
 0x4c5   : > { %3136 = vrot.lane.b32.xlu1 %v2441_v52, %s4681_s23  ;;  %v3772_v4 = vsel %vm1797_vm9, %v3740_v31, %v3367_v7  ;;  %v2506_v7 = vld [vmem:[#allocation2 + $0x151] sm:$0xff] }
 0x4c6   : > { %3516 = vrot.lane.b32.xlu0 %v2441_v52, %s4684_s9 }
 0x4c7   : > { %v3495_v5 = vpop.permute.xlu1 %3494 }
 0x4c8   : > { %v3804_v53 = vsel %vm1830_vm10, %v3772_v4, %v3495_v5  ;;  %v3369_v3 = vpop.permute.xlu0 %3368  ;;  %v8098_v5 = vld [vmem:[#allocation67_spill] sm:$0xff] }
 0x4c9   : > { %2882 = vrot.lane.b32.xlu1 %v7183_v26, %s4679_s21  ;;  %4569 = vmatprep.mubr.msk.f32.mxu1 %vm1863_vm11, %v3804_v53  ;;  %v3773_v21 = vsel %vm1797_vm9, %v3741_v38, %v3369_v3  ;;  %v8099_v53 = vld [vmem:[#allocation15_spill] sm:$0xff] }
 0x4ca   : > { %3262 = vrot.lane.b32.xlu0 %v7183_v26, %s4682_s24  ;;  %v3584_v3 = vsel %vm171_vm0, %v8099_v53, %v8098_v5 }
 0x4cb   : > { %v3115_v45 = vpop.permute.xlu1 %3114  ;;  %v3616_v15 = vsel %vm1632_vm4, %v3584_v3, %v8100_v49  ;;  %v8111_v3 = vld [vmem:[#allocation118_spill] sm:$0xff] }
 0x4cc   : > { %v2989_v17 = vpop.permute.xlu0 %2988  ;;  %v3710_v19 = vsel %vm1731_vm7, %v3678_v29, %v3115_v45  ;;  %v3648_v39 = vsel %vm1665_vm5, %v3616_v15, %v8101_v23 }
 0x4cd   : > { %3390 = vrot.lane.b32.xlu1 %v2504_v58, %s4683_s6  ;;  %v3679_v56 = vsel %vm1698_vm6, %v3647_v37, %v2989_v17 }
 0x4ce   : > { %3264 = vrot.lane.b32.xlu0 %v2473_v1, %s4682_s24 }
 0x4cf   : > { %v3117_v42 = vpop.permute.xlu1 %3116 }
 0x4d0   : > { %v3497_v40 = vpop.permute.xlu0 %3496  ;;  %v3711_v46 = vsel %vm1731_vm7, %v3679_v56, %v3117_v42 }
 0x4d1   : > { %v3805_v10 = vsel %vm1830_vm10, %v3773_v21, %v3497_v40  ;;  %3010 = vrot.lane.b32.xlu1 %v2504_v58, %s4680_s22  ;;  %v2538_v58 = vld [vmem:[#allocation2 + $0x152] sm:$0xff] }
 0x4d2   : > { %2884 = vrot.lane.b32.xlu0 %v2473_v1, %s4679_s21  ;;  %4570 = vmatmul.mubr.msk.f32.gmra.mrb[10].mxu1 %vm1863_vm11, %v3805_v10  ;;  %v2507_v1 = vld [vmem:[#allocation2 + $0x159] sm:$0xff]  ;;  %v8102_v10 = vld [vmem:[#allocation11_spill] sm:$0xff] }
 0x4d3   : > { %v3245_v8 = vpop.permute.xlu1 %3244 }
 0x4d4   : > { %v3243_v43 = vpop.permute.xlu0 %3242  ;;  %v3743_v25 = vsel %vm1764_vm8, %v3711_v46, %v3245_v8  ;;  %v8103_v8 = vld [vmem:[#allocation73_spill] sm:$0xff] }
 0x4d5   : > { %3518 = vrot.lane.b32.xlu1 %v2536_v44, %s4684_s9  ;;  %v3742_v61 = vsel %vm1764_vm8, %v3710_v19, %v3243_v43  ;;  %v3585_v43 = vsel %vm171_vm0, %v8103_v8, %v8102_v10  ;;  %v8113_v8 = vld [vmem:[#allocation27_spill] sm:$0xff] }
 0x4d6   : > { %3392 = vrot.lane.b32.xlu0 %v2505_v41, %s4683_s6 }
 0x4d7   : > { %v2991_v50 = vpop.permute.xlu1 %2990 }
 0x4d8   : > { %v3371_v35 = vpop.permute.xlu0 %3370  ;;  %v3680_v22 = vsel %vm1698_vm6, %v3648_v39, %v2991_v50 }
 0x4d9   : > { %3138 = vrot.lane.b32.xlu1 %v2536_v44, %s4681_s23  ;;  %v3774_v54 = vsel %vm1797_vm9, %v3742_v61, %v3371_v35  ;;  %v8104_v44 = vld [vmem:[#allocation137_spill] sm:$0xff] }
 0x4da   : > { %3012 = vrot.lane.b32.xlu0 %v2505_v41, %s4680_s22  ;;  %v3617_v20 = vsel %vm1632_vm4, %v3585_v43, %v8104_v44  ;;  %v8105_v41 = vld [vmem:[#allocation24_spill] sm:$0xff]  ;;  %v8114_v44 = vld [vmem:[#allocation69_spill] sm:$0xff] }
 0x4db   : > { %v3499_v62 = vpop.permute.xlu1 %3498  ;;  %v3649_v34 = vsel %vm1665_vm5, %v3617_v20, %v8105_v41 }
 0x4dc   : > { %v3806_v30 = vsel %vm1830_vm10, %v3774_v54, %v3499_v62  ;;  %v3373_v14 = vpop.permute.xlu0 %3372  ;;  %v2382_v54 = vld [vmem:[#allocation2 + $0x168] sm:$0xff] }
 0x4dd   : > { %3140 = vrot.lane.b32.xlu1 %v2443_v27, %s4681_s23  ;;  %4572 = vmatprep.mubr.msk.f32.mxu1 %vm1863_vm11, %v3806_v30  ;;  %v3775_v13 = vsel %vm1797_vm9, %v3743_v25, %v3373_v14 }
 0x4de   : > { %3520 = vrot.lane.b32.xlu0 %v2443_v27, %s4684_s9  ;;  %v2508_v27 = vld [vmem:[#allocation2 + $0x169] sm:$0xff] }
 0x4df   : > { %v3119_v51 = vpop.permute.xlu1 %3118 }
 0x4e0   : > { %v2993_v36 = vpop.permute.xlu0 %2992  ;;  %v3712_v48 = vsel %vm1731_vm7, %v3680_v22, %v3119_v51  ;;  %v8108_v51 = vld [vmem:[#allocation22_spill] sm:$0xff] }
 0x4e1   : > { %2886 = vrot.lane.b32.xlu1 %v2380_v59, %s4679_s21  ;;  %v3681_v11 = vsel %vm1698_vm6, %v3649_v34, %v2993_v36  ;;  %v3650_v18 = vsel %vm1665_vm5, %v3618_v28, %v8108_v51  ;;  %v2542_v28 = vld [vmem:[#allocation2 + $0x182] sm:$0xff] }
 0x4e2   : > { %3266 = vrot.lane.b32.xlu0 %v2380_v59, %s4682_s24 }
 0x4e3   : > { %v3121_v63 = vpop.permute.xlu1 %3120 }
 0x4e4   : > { %v3501_v0 = vpop.permute.xlu0 %3500  ;;  %v3713_v50 = vsel %vm1731_vm7, %v3681_v11, %v3121_v63  ;;  %v2479_v11 = vld [vmem:[#allocation2 + $0x188] sm:$0xff] }
 0x4e5   : > { %v3807_v52 = vsel %vm1830_vm10, %v3775_v13, %v3501_v0  ;;  %3394 = vrot.lane.b32.xlu1 %v2506_v7, %s4683_s6  ;;  %v2540_v0 = vld [vmem:[#allocation2 + $0x16a] sm:$0xff] }
 0x4e6   : > { %3268 = vrot.lane.b32.xlu0 %v2475_v57, %s4682_s24  ;;  %4573 = vmatmul.mubr.msk.f32.gmra.mrb[12].mxu1 %vm1863_vm11, %v3807_v52  ;;  %v4661_v52 = vld [vmem:[#allocation2 + $0xc8] sm:$0xff] }
 0x4e7   : > { %v3249_v31 = vpop.permute.xlu1 %3248 }
 0x4e8   : > { %v3247_v4 = vpop.permute.xlu0 %3246  ;;  %v3745_v29 = vsel %vm1764_vm8, %v3713_v50, %v3249_v31 }
 0x4e9   : > { %3014 = vrot.lane.b32.xlu1 %v2506_v7, %s4680_s22  ;;  %v3744_v9 = vsel %vm1764_vm8, %v3712_v48, %v3247_v4  ;;  %v2509_v7 = vld [vmem:[#allocation2 + $0x171] sm:$0xff] }
 0x4ea   : > { %2888 = vrot.lane.b32.xlu0 %v2475_v57, %s4679_s21  ;;  %v8109_v57 = vld [vmem:[#allocation71_spill] sm:$0xff]  ;;  %v8110_v4 = vld [vmem:[#allocation136_spill] sm:$0xff] }
 0x4eb   : > { %v2995_v45 = vpop.permute.xlu1 %2994  ;;  %v3587_v31 = vsel %vm171_vm0, %v4661_v52, %v8109_v57  ;;  %v2447_v48 = vld [vmem:[#allocation2 + $0x172] sm:$0xff] }
 0x4ec   : > { %v3375_v17 = vpop.permute.xlu0 %3374  ;;  %v3682_v36 = vsel %vm1698_vm6, %v3650_v18, %v2995_v45  ;;  %v3619_v5 = vsel %vm1632_vm4, %v3587_v31, %v8110_v4  ;;  %v2511_v18 = vld [vmem:[#allocation2 + $0x189] sm:$0xff]  ;;  %v2480_v52 = vld [vmem:[#allocation2 + $0x198] sm:$0xff]  ;;  %v8118_v4 = vld [vmem:[#allocation21_spill] sm:$0xff] }
 0x4ed   : > { %3522 = vrot.lane.b32.xlu1 %v2538_v58, %s4684_s9  ;;  %v3776_v38 = vsel %vm1797_vm9, %v3744_v9, %v3375_v17  ;;  %v3651_v49 = vsel %vm1665_vm5, %v3619_v5, %v8111_v3  ;;  %v4664_v31 = vld [vmem:[#allocation2 + $0xf0] sm:$0xff] }
 0x4ee   : > { %3396 = vrot.lane.b32.xlu0 %v2507_v1, %s4683_s6  ;;  %v3590_v5 = vsel %vm171_vm0, %v4664_v31, %v8118_v4 }
 0x4ef   : > { %v3503_v42 = vpop.permute.xlu1 %3502 }
 0x4f0   : > { %v3808_v21 = vsel %vm1830_vm10, %v3776_v38, %v3503_v42  ;;  %v3377_v40 = vpop.permute.xlu0 %3376  ;;  %v2384_v42 = vld [vmem:[#allocation2 + $0x180] sm:$0xff] }
 0x4f1   : > { %3142 = vrot.lane.b32.xlu1 %v2538_v58, %s4681_s23  ;;  %4575 = vmatprep.mubr.msk.f32.mxu1 %vm1863_vm11, %v3808_v21  ;;  %v3777_v19 = vsel %vm1797_vm9, %v3745_v29, %v3377_v40  ;;  %v4662_v21 = vld [vmem:[#allocation2 + $0xd8] sm:$0xff]  ;;  %v8112_v40 = vld [vmem:[#allocation17_spill] sm:$0xff] }
 0x4f2   : > { %3016 = vrot.lane.b32.xlu0 %v2507_v1, %s4680_s22  ;;  %v3588_v10 = vsel %vm171_vm0, %v4662_v21, %v8112_v40 }
 0x4f3   : > { %v3123_v24 = vpop.permute.xlu1 %3122  ;;  %v3620_v43 = vsel %vm1632_vm4, %v3588_v10, %v8113_v8  ;;  %v4665_v10 = vld [vmem:[#allocation2 + $0xf8] sm:$0xff]  ;;  %v8121_v8 = vld [vmem:[#allocation74_spill] sm:$0xff] }
 0x4f4   : > { %v2997_v2 = vpop.permute.xlu0 %2996  ;;  %v3714_v56 = vsel %vm1731_vm7, %v3682_v36, %v3123_v24  ;;  %v3652_v20 = vsel %vm1665_vm5, %v3620_v43, %v8114_v44  ;;  %v3591_v43 = vsel %vm171_vm0, %v4665_v10, %v8121_v8  ;;  %v8122_v44 = vld [vmem:[#allocation100_spill] sm:$0xff] }
 0x4f5   : > { %3144 = vrot.lane.b32.xlu1 %v2445_v32, %s4681_s23  ;;  %v3683_v23 = vsel %vm1698_vm6, %v3651_v49, %v2997_v2  ;;  %v2510_v2 = vld [vmem:[#allocation2 + $0x181] sm:$0xff]  ;;  %v4185_v10 = vld [vmem:[%s4771_s18 + $0x18] sm:$0xff] }
 0x4f6   : > { %3524 = vrot.lane.b32.xlu0 %v2445_v32, %s4684_s9  ;;  %v2513_v49 = vld [vmem:[#allocation2 + $0x1a1] sm:$0xff] }
 0x4f7   : > { %v3125_v35 = vpop.permute.xlu1 %3124 }
 0x4f8   : > { %v3505_v61 = vpop.permute.xlu0 %3504  ;;  %v3715_v39 = vsel %vm1731_vm7, %v3683_v23, %v3125_v35 }
 0x4f9   : > { %v3809_v62 = vsel %vm1830_vm10, %v3777_v19, %v3505_v61  ;;  %2890 = vrot.lane.b32.xlu1 %v2382_v54, %s4679_s21 }
 0x4fa   : > { %3270 = vrot.lane.b32.xlu0 %v2382_v54, %s4682_s24  ;;  %4576 = vmatmul.mubr.msk.f32.gmra.mrb[14].mxu1 %vm1863_vm11, %v3809_v62  ;;  %v4663_v54 = vld [vmem:[#allocation2 + $0xe0] sm:$0xff]  ;;  %v8115_v62 = vld [vmem:[#allocation72_spill] sm:$0xff] }
 0x4fb   : > { %v3253_v30 = vpop.permute.xlu1 %3252 }
 0x4fc   : > { %v3251_v14 = vpop.permute.xlu0 %3250  ;;  %v3747_v45 = vsel %vm1764_vm8, %v3715_v39, %v3253_v30  ;;  %v3589_v30 = vsel %vm171_vm0, %v4663_v54, %v8115_v62 }
 0x4fd   : > { %3398 = vrot.lane.b32.xlu1 %v2508_v27, %s4683_s6  ;;  %v3746_v12 = vsel %vm1764_vm8, %v3714_v56, %v3251_v14  ;;  %v8116_v14 = vld [vmem:[#allocation78_spill] sm:$0xff] }
 0x4fe   : > { %3272 = vrot.lane.b32.xlu0 %v2477_v16, %s4682_s24 }
 0x4ff   : > { %v2999_v37 = vpop.permute.xlu1 %2998 }
 0x500   : > { %v3379_v59 = vpop.permute.xlu0 %3378  ;;  %v3684_v41 = vsel %vm1698_vm6, %v3652_v20, %v2999_v37  ;;  %v3623_v20 = vsel %vm1632_vm4, %v3591_v43, %v8122_v44  ;;  %v4184_v44 = vld [vmem:[%s4771_s18 + $0x10] sm:$0xff] }
 0x501   : > { %3018 = vrot.lane.b32.xlu1 %v2508_v27, %s4680_s22  ;;  %v3778_v46 = vsel %vm1797_vm9, %v3746_v12, %v3379_v59  ;;  %v3621_v27 = vsel %vm1632_vm4, %v3589_v30, %v8116_v14 }
 0x502   : > { %2892 = vrot.lane.b32.xlu0 %v2477_v16, %s4679_s21  ;;  %v3653_v16 = vsel %vm1665_vm5, %v3621_v27, %v8117_v47  ;;  %v4666_v27 = vld [vmem:[#allocation2 + $0x108] sm:$0xff] }
 0x503   : > { %v3507_v25 = vpop.permute.xlu1 %3506 }
 0x504   : > { %v3810_v63 = vsel %vm1830_vm10, %v3778_v46, %v3507_v25  ;;  %v3381_v13 = vpop.permute.xlu0 %3380 }
 0x505   : > { %3526 = vrot.lane.b32.xlu1 %v2540_v0, %s4684_s9  ;;  %4578 = vmatprep.mubr.msk.f32.mxu1 %vm1863_vm11, %v3810_v63  ;;  %v3779_v17 = vsel %vm1797_vm9, %v3747_v45, %v3381_v13  ;;  %v2449_v13 = vld [vmem:[#allocation2 + $0x18a] sm:$0xff]  ;;  %v2512_v45 = vld [vmem:[#allocation2 + $0x199] sm:$0xff] }
 0x506   : > { %3400 = vrot.lane.b32.xlu0 %v2509_v7, %s4683_s6 }
 0x507   : > { %v3127_v53 = vpop.permute.xlu1 %3126 }
 0x508   : > { %v3001_v15 = vpop.permute.xlu0 %3000  ;;  %v3716_v32 = vsel %vm1731_vm7, %v3684_v41, %v3127_v53  ;;  %v8119_v53 = vld [vmem:[#allocation77_spill] sm:$0xff]  ;;  %v8123_v41 = vld [vmem:[#allocation140_spill] sm:$0xff] }
 0x509   : > { %3146 = vrot.lane.b32.xlu1 %v2540_v0, %s4681_s23  ;;  %v3685_v51 = vsel %vm1698_vm6, %v3653_v16, %v3001_v15  ;;  %v2481_v0 = vld [vmem:[#allocation2 + $0x1a0] sm:$0xff]  ;;  %v3622_v3 = vsel %vm1632_vm4, %v3590_v5, %v8119_v53  ;;  %v4667_v5 = vld [vmem:[#allocation2 + $0x110] sm:$0xff] }
 0x50a   : > { %3020 = vrot.lane.b32.xlu0 %v2509_v7, %s4680_s22  ;;  %v8120_v15 = vld [vmem:[#allocation37_spill] sm:$0xff]  ;;  %v8126_v53 = vld [vmem:[#allocation19_spill] sm:$0xff] }
 0x50b   : > { %v3129_v22 = vpop.permute.xlu1 %3128  ;;  %v3654_v23 = vsel %vm1665_vm5, %v3622_v3, %v8120_v15  ;;  %v3593_v3 = vsel %vm171_vm0, %v4667_v5, %v8126_v53 }
 0x50c   : > { %v3509_v58 = vpop.permute.xlu0 %3508  ;;  %v3717_v37 = vsel %vm1731_vm7, %v3685_v51, %v3129_v22 }
 0x50d   : > { %v3811_v1 = vsel %vm1830_vm10, %v3779_v17, %v3509_v58  ;;  %3148 = vrot.lane.b32.xlu1 %v2447_v48, %s4681_s23 }
 0x50e   : > { %3528 = vrot.lane.b32.xlu0 %v2447_v48, %s4684_s9  ;;  %4579 = vmatmul.mubr.msk.f32.gmra.mrb[16].mxu1 %vm1863_vm11, %v3811_v1  ;;  %v2545_v1 = vld [vmem:[#allocation2 + $0x1a2] sm:$0xff] }
 0x50f   : > { %v3257_v9 = vpop.permute.xlu1 %3256 }
 0x510   : > { %v3255_v38 = vpop.permute.xlu0 %3254  ;;  %v3749_v36 = vsel %vm1764_vm8, %v3717_v37, %v3257_v9 }
 0x511   : > { %2894 = vrot.lane.b32.xlu1 %v2384_v42, %s4679_s21  ;;  %v3748_v50 = vsel %vm1764_vm8, %v3716_v32, %v3255_v38 }
 0x512   : > { %3274 = vrot.lane.b32.xlu0 %v2384_v42, %s4682_s24  ;;  %v2544_v42 = vld [vmem:[#allocation2 + $0x19a] sm:$0xff] }
 0x513   : > { %v3003_v24 = vpop.permute.xlu1 %3002 }
 0x514   : > { %v3383_v34 = vpop.permute.xlu0 %3382  ;;  %v3686_v22 = vsel %vm1698_vm6, %v3654_v23, %v3003_v24 }
 0x515   : > { %3402 = vrot.lane.b32.xlu1 %v2510_v2, %s4683_s6  ;;  %v3780_v29 = vsel %vm1797_vm9, %v3748_v50, %v3383_v34  ;;  %v3655_v34 = vsel %vm1665_vm5, %v3623_v20, %v8123_v41 }
 0x516   : > { %3276 = vrot.lane.b32.xlu0 %v2479_v11, %s4682_s24 }
 0x517   : > { %v3511_v35 = vpop.permute.xlu1 %3510 }
 0x518   : > { %v3812_v19 = vsel %vm1830_vm10, %v3780_v29, %v3511_v35  ;;  %v3385_v61 = vpop.permute.xlu0 %3384 }
 0x519   : > { %4581 = vmatprep.mubr.msk.f32.mxu1 %vm1863_vm11, %v3812_v19  ;;  %3022 = vrot.lane.b32.xlu1 %v2510_v2, %s4680_s22  ;;  %v3781_v56 = vsel %vm1797_vm9, %v3749_v36, %v3385_v61  ;;  %v4182_v36 = vld [vmem:[%s4771_s18] sm:$0xff] }
 0x51a   : > { %2896 = vrot.lane.b32.xlu0 %v2479_v11, %s4679_s21 }
 0x51b   : > { %v3131_v6 = vpop.permute.xlu1 %3130 }
 0x51c   : > { %v3005_v55 = vpop.permute.xlu0 %3004  ;;  %v3718_v58 = vsel %vm1731_vm7, %v3686_v22, %v3131_v6  ;;  %v8124_v6 = vld [vmem:[#allocation7_spill] sm:$0xff] }
 0x51d   : > { %3530 = vrot.lane.b32.xlu1 %v2542_v28, %s4684_s9  ;;  %v3687_v32 = vsel %vm1698_vm6, %v3655_v34, %v3005_v55  ;;  %v3592_v47 = vsel %vm171_vm0, %v4666_v27, %v8124_v6  ;;  %v4183_v55 = vld [vmem:[%s4771_s18 + $0x8] sm:$0xff] }
 0x51e   : > { %3404 = vrot.lane.b32.xlu0 %v2511_v18, %s4683_s6 }
 0x51f   : > { %v3133_v59 = vpop.permute.xlu1 %3132 }
 0x520   : > { %v3513_v12 = vpop.permute.xlu0 %3512  ;;  %v3719_v11 = vsel %vm1731_vm7, %v3687_v32, %v3133_v59 }
 0x521   : > { %v3813_v46 = vsel %vm1830_vm10, %v3781_v56, %v3513_v12  ;;  %3150 = vrot.lane.b32.xlu1 %v2542_v28, %s4681_s23  ;;  %v8125_v28 = vld [vmem:[#allocation99_spill] sm:$0xff] }
 0x522   : > { %4582 = vmatmul.mubr.msk.f32.gmra.mrb[18].mxu1 %vm1863_vm11, %v3813_v46  ;;  %3024 = vrot.lane.b32.xlu0 %v2511_v18, %s4680_s22  ;;  %v3624_v51 = vsel %vm1632_vm4, %v3592_v47, %v8125_v28 }
 0x523   : > { %v2879_v25 = vpop.permute.xlu1 %2878 }
 0x524   : > { %v3259_v63 = vpop.permute.xlu0 %3258  ;;  %v3656_v59 = vsel %vm1665_vm5, %v3624_v51, %v2879_v25 }
 0x525   : > { %3152 = vrot.lane.b32.xlu1 %v2449_v13, %s4681_s23  ;;  %v3750_v48 = vsel %vm1764_vm8, %v3718_v58, %v3259_v63  ;;  %s7393_s23 = scalar_lea.vmem %s7603_s3, %s4410_s15 }
 0x526   : > { %3532 = vrot.lane.b32.xlu0 %v2449_v13, %s4684_s9 }
 0x527   : > { %v3387_v7 = vpop.permute.xlu1 %3386 }
 0x528   : > { %v3261_v57 = vpop.permute.xlu0 %3260  ;;  %v3782_v9 = vsel %vm1797_vm9, %v3750_v48, %v3387_v7 }
 0x529   : > { %3280 = vrot.lane.b32.xlu1 %v2481_v0, %s4682_s24  ;;  %v3751_v50 = vsel %vm1764_vm8, %v3719_v11, %v3261_v57 }
 0x52a   : > { %3278 = vrot.lane.b32.xlu0 %v2480_v52, %s4682_s24 }
 0x52b   : > { %v3007_v39 = vpop.permute.xlu1 %3006 }
 0x52c   : > { %v2881_v17 = vpop.permute.xlu0 %2880  ;;  %v3688_v46 = vsel %vm1698_vm6, %v3656_v59, %v3007_v39 }
 0x52d   : > { %3408 = vrot.lane.b32.xlu1 %v2513_v49, %s4683_s6  ;;  %v8127_v49 = vld [vmem:[#allocation20_spill] sm:$0xff] }
 0x52e   : > { %3406 = vrot.lane.b32.xlu0 %v2512_v45, %s4683_s6  ;;  %v3625_v15 = vsel %vm1632_vm4, %v3593_v3, %v8127_v49 }
 0x52f   : > { %v3515_v38 = vpop.permute.xlu1 %3514  ;;  %v3657_v39 = vsel %vm1665_vm5, %v3625_v15, %v2881_v17  ;;  %v8132_v15 = vld [vmem:[#allocation56_spill] sm:$0xff] }
 0x530   : > { %v3814_v21 = vsel %vm1830_vm10, %v3782_v9, %v3515_v38  ;;  %v3389_v40 = vpop.permute.xlu0 %3388 }
 0x531   : > { %4584 = vmatprep.mubr.msk.f32.mxu1 %vm1863_vm11, %v3814_v21  ;;  %3536 = vrot.lane.b32.xlu1 %v2545_v1, %s4684_s9  ;;  %v3783_v35 = vsel %vm1797_vm9, %v3751_v50, %v3389_v40  ;;  %v8129_v50 = vld [vmem:[#allocation16_spill] sm:$0xff] }
 0x532   : > { %3534 = vrot.lane.b32.xlu0 %v2544_v42, %s4684_s9 }
 0x533   : > { %v3135_v24 = vpop.permute.xlu1 %3134 }
 0x534   : > { %v3009_v2 = vpop.permute.xlu0 %3008  ;;  %v3720_v0 = vsel %vm1731_vm7, %v3688_v46, %v3135_v24 }
 0x535   : > { %v3689_v22 = vsel %vm1698_vm6, %v3657_v39, %v3009_v2  ;;  %v8128_v2 = vld [vmem:[#allocation58_spill] sm:$0xff]  ;;  %v8133_v39 = vld [vmem:[#allocation64_spill] sm:$0xff] }
 0x536   : > { %v3594_v32 = vsel %vm171_vm0, %v7133_v60, %v8128_v2 }
 0x537   : > { %v3137_v29 = vpop.permute.xlu1 %3136 }
 0x538   : > { %v3517_v19 = vpop.permute.xlu0 %3516  ;;  %v3721_v58 = vsel %vm1731_vm7, %v3689_v22, %v3137_v29  ;;  %v3626_v29 = vsel %vm1632_vm4, %v3594_v32, %v8129_v50  ;;  %v4189_v32 = vld [vmem:[%s4771_s18 + $0x38] sm:$0xff] }
 0x539   : > { %v3815_v61 = vsel %vm1830_vm10, %v3783_v35, %v3517_v19 }
 0x53a   : > { %4585 = vmatmul.mubr.msk.f32.gmra.mrb[20].mxu1 %vm1863_vm11, %v3815_v61 }
 0x53b   : > { %v2883_v54 = vpop.permute.xlu1 %2882 }
 0x53c   : > { %v3263_v62 = vpop.permute.xlu0 %3262  ;;  %v3658_v35 = vsel %vm1665_vm5, %v3626_v29, %v2883_v54  ;;  %v8130_v54 = vld [vmem:[#allocation96_spill] sm:$0xff] }
 0x53d   : > { %v3752_v52 = vsel %vm1764_vm8, %v3720_v0, %v3263_v62 }
 0x53f   : > { %v3391_v30 = vpop.permute.xlu1 %3390 }
 0x540   : > { %v3265_v14 = vpop.permute.xlu0 %3264  ;;  %v3784_v25 = vsel %vm1797_vm9, %v3752_v52, %v3391_v30 }
 0x541   : > { %v4556_v16 = vpop.f32.mrb[0].mxu1  ;;  %v3753_v48 = vsel %vm1764_vm8, %v3721_v58, %v3265_v14 }
 0x542   : > { %v4151_v18 = vmul.f32 0.1, %v4556_v16  ;;  %v3991_v37 = vpop.f32.mrb[1].mxu1  ;;  %v3595_v16 = vsel %vm171_vm0, %v7144_v33, %v8130_v54 }
 0x543   : > { %v4150_v56 = vmul.f32 0.1, %v3991_v37  ;;  %v3011_v12 = vpop.permute.xlu1 %3010 }
 0x544   : > { %v4215_v63 = vadd.f32 %v4183_v55, %v4151_v18  ;;  %v2885_v13 = vpop.permute.xlu0 %2884  ;;  %v3690_v61 = vsel %vm1698_vm6, %v3658_v35, %v3011_v12  ;;  %v8131_v55 = vld [vmem:[#allocation66_spill] sm:$0xff]  ;;  %v4188_v35 = vld [vmem:[%s4771_s18 + $0x30] sm:$0xff] }
 0x545   : > { %v4214_v7 = vadd.f32 %v4182_v36, %v4150_v56  ;;  %v3627_v28 = vsel %vm1632_vm4, %v3595_v16, %v8131_v55  ;;  %v2286_v55 = vld [vmem:[#allocation2 + $0x150] sm:$0xff] }
 0x546   : > { %4247 = vst.msk [vmem:[%s7393_s23 + $0x8] sm:$0xff] %vm171_vm0, %v4215_v63  ;;  %v3659_v18 = vsel %vm1665_vm5, %v3627_v28, %v2885_v13  ;;  %v4186_v13 = vld [vmem:[%s4771_s18 + $0x20] sm:$0xff] }
 0x547   : > { %4246 = vst.msk [vmem:[%s7393_s23] sm:$0xff] %vm171_vm0, %v4214_v7  ;;  %v3519_v57 = vpop.permute.xlu1 %3518  ;;  %v4187_v7 = vld [vmem:[%s4771_s18 + $0x28] sm:$0xff] }
 0x548   : > { %v3816_v31 = vsel %vm1830_vm10, %v3784_v25, %v3519_v57  ;;  %v3393_v4 = vpop.permute.xlu0 %3392 }
 0x549   : > { %4587 = vmatprep.mubr.msk.f32.mxu1 %vm1863_vm11, %v3816_v31  ;;  %v3785_v9 = vsel %vm1797_vm9, %v3753_v48, %v3393_v4 }
 0x54b   : > { %v3139_v23 = vpop.permute.xlu1 %3138 }
 0x54c   : > { %v3013_v45 = vpop.permute.xlu0 %3012  ;;  %v3722_v30 = vsel %vm1731_vm7, %v3690_v61, %v3139_v23  ;;  %v3596_v23 = vsel %vm171_vm0, %v7183_v26, %v8132_v15  ;;  %v8139_v15 = vld [vmem:[#allocation138_spill] sm:$0xff] }
 0x54d   : > { %v3691_v36 = vsel %vm1698_vm6, %v3659_v18, %v3013_v45  ;;  %v3628_v45 = vsel %vm1632_vm4, %v3596_v23, %v8133_v39 }
 0x54f   : > { %v3141_v1 = vpop.permute.xlu1 %3140 }
 0x550   : > { %v3521_v38 = vpop.permute.xlu0 %3520  ;;  %v3723_v59 = vsel %vm1731_vm7, %v3691_v36, %v3141_v1 }
 0x551   : > { %v3817_v42 = vsel %vm1830_vm10, %v3785_v9, %v3521_v38 }
 0x552   : > { %4588 = vmatmul.mubr.msk.f32.gmra.mrb[22].mxu1 %vm1863_vm11, %v3817_v42 }
 0x553   : > { %v2887_v21 = vpop.permute.xlu1 %2886 }
 0x554   : > { %v3267_v17 = vpop.permute.xlu0 %3266  ;;  %v3660_v22 = vsel %vm1665_vm5, %v3628_v45, %v2887_v21  ;;  %v8134_v21 = vld [vmem:[#allocation5_spill] sm:$0xff] }
 0x555   : > { %v4559_v40 = vpop.f32.mrb[2].mxu1  ;;  %v3754_v14 = vsel %vm1764_vm8, %v3722_v30, %v3267_v17 }
 0x556   : > { %v4153_v8 = vmul.f32 0.1, %v4559_v40  ;;  %v4001_v43 = vpop.f32.mrb[3].mxu1 }
 0x557   : > { %v4152_v20 = vmul.f32 0.1, %v4001_v43  ;;  %v3395_v24 = vpop.permute.xlu1 %3394  ;;  %v8135_v43 = vld [vmem:[#allocation139_spill] sm:$0xff] }
 0x558   : > { %v4217_v41 = vadd.f32 %v4185_v10, %v4153_v8  ;;  %v3269_v34 = vpop.permute.xlu0 %3268  ;;  %v3786_v60 = vsel %vm1797_vm9, %v3754_v14, %v3395_v24  ;;  %v2285_v10 = vld [vmem:[#allocation2 + $0x140] sm:$0xff] }
 0x559   : > { %v4216_v11 = vadd.f32 %v4184_v44, %v4152_v20  ;;  %v3755_v56 = vsel %vm1764_vm8, %v3723_v59, %v3269_v34  ;;  %v3597_v8 = vsel %vm171_vm0, %v2285_v10, %v8134_v21 }
 0x55a   : > { %4249 = vst.msk [vmem:[%s7393_s23 + $0x18] sm:$0xff] %vm171_vm0, %v4217_v41  ;;  %v3629_v44 = vsel %vm1632_vm4, %v3597_v8, %v8135_v43  ;;  %v2288_v43 = vld [vmem:[#allocation2 + $0x168] sm:$0xff] }
 0x55b   : > { %4248 = vst.msk [vmem:[%s7393_s23 + $0x10] sm:$0xff] %vm171_vm0, %v4216_v11  ;;  %v3015_v19 = vpop.permute.xlu1 %3014 }
 0x55c   : > { %v2889_v62 = vpop.permute.xlu0 %2888  ;;  %v3692_v48 = vsel %vm1698_vm6, %v3660_v22, %v3015_v19 }
 0x55d   : > { %v3661_v24 = vsel %vm1665_vm5, %v3629_v44, %v2889_v62  ;;  %v2289_v44 = vld [vmem:[#allocation2 + $0x170] sm:$0xff] }
 0x55f   : > { %v3523_v27 = vpop.permute.xlu1 %3522 }
 0x560   : > { %v3818_v6 = vsel %vm1830_vm10, %v3786_v60, %v3523_v27  ;;  %v3397_v47 = vpop.permute.xlu0 %3396 }
 0x561   : > { %4590 = vmatprep.mubr.msk.f32.mxu1 %vm1863_vm11, %v3818_v6  ;;  %v3787_v46 = vsel %vm1797_vm9, %v3755_v56, %v3397_v47 }
 0x563   : > { %v3143_v51 = vpop.permute.xlu1 %3142 }
 0x564   : > { %v3017_v37 = vpop.permute.xlu0 %3016  ;;  %v3724_v9 = vsel %vm1731_vm7, %v3692_v48, %v3143_v51  ;;  %v8136_v51 = vld [vmem:[#allocation76_spill] sm:$0xff] }
 0x565   : > { %v3693_v34 = vsel %vm1698_vm6, %v3661_v24, %v3017_v37  ;;  %v3598_v18 = vsel %vm171_vm0, %v2286_v55, %v8136_v51  ;;  %v8137_v37 = vld [vmem:[#allocation33_spill] sm:$0xff] }
 0x566   : > { %v3630_v36 = vsel %vm1632_vm4, %v3598_v18, %v8137_v37  ;;  %v4193_v18 = vld [vmem:[%s4771_s18 + $0x58] sm:$0xff] }
 0x567   : > { %v3145_v12 = vpop.permute.xlu1 %3144 }
 0x568   : > { %v3525_v33 = vpop.permute.xlu0 %3524  ;;  %v3725_v11 = vsel %vm1731_vm7, %v3693_v34, %v3145_v12 }
 0x569   : > { %v3819_v63 = vsel %vm1830_vm10, %v3787_v46, %v3525_v33  ;;  %v4562_v0 = vpop.f32.mrb[4].mxu1 }
 0x56a   : > { %v4155_v52 = vmul.f32 0.1, %v4562_v0  ;;  %v4011_v25 = vpop.f32.mrb[5].mxu1  ;;  %4591 = vmatmul.mubr.msk.f32.gmra.mrb[24].mxu1 %vm1863_vm11, %v3819_v63 }
 0x56b   : > { %v4154_v57 = vmul.f32 0.1, %v4011_v25  ;;  %v2891_v31 = vpop.permute.xlu1 %2890 }
 0x56c   : > { %v4219_v4 = vadd.f32 %v4187_v7, %v4155_v52  ;;  %v3271_v5 = vpop.permute.xlu0 %3270  ;;  %v3662_v59 = vsel %vm1665_vm5, %v3630_v36, %v2891_v31  ;;  %v8138_v31 = vld [vmem:[#allocation25_spill] sm:$0xff] }
 0x56d   : > { %v4218_v53 = vadd.f32 %v4186_v13, %v4154_v57  ;;  %v3756_v38 = vsel %vm1764_vm8, %v3724_v9, %v3271_v5  ;;  %v2287_v13 = vld [vmem:[#allocation2 + $0x158] sm:$0xff] }
 0x56e   : > { %4251 = vst.msk [vmem:[%s7393_s23 + $0x28] sm:$0xff] %vm171_vm0, %v4219_v4  ;;  %v4191_v4 = vld [vmem:[%s4771_s18 + $0x48] sm:$0xff]  ;;  %v3599_v5 = vsel %vm171_vm0, %v2287_v13, %v8138_v31 }
 0x56f   : > { %4250 = vst.msk [vmem:[%s7393_s23 + $0x20] sm:$0xff] %vm171_vm0, %v4218_v53  ;;  %v3399_v3 = vpop.permute.xlu1 %3398  ;;  %v3631_v23 = vsel %vm1632_vm4, %v3599_v5, %v8139_v15  ;;  %v4197_v5 = vld [vmem:[%s4771_s18 + $0x78] sm:$0xff] }
 0x570   : > { %v3273_v49 = vpop.permute.xlu0 %3272  ;;  %v3788_v42 = vsel %vm1797_vm9, %v3756_v38, %v3399_v3 }
 0x571   : > { %v3757_v19 = vsel %vm1764_vm8, %v3725_v11, %v3273_v49  ;;  %v4190_v49 = vld [vmem:[%s4771_s18 + $0x40] sm:$0xff] }
 0x573   : > { %v3019_v58 = vpop.permute.xlu1 %3018 }
 0x574   : > { %v2893_v1 = vpop.permute.xlu0 %2892  ;;  %v3694_v12 = vsel %vm1698_vm6, %v3662_v59, %v3019_v58 }
 0x575   : > { %v3663_v22 = vsel %vm1665_vm5, %v3631_v23, %v2893_v1 }
 0x577   : > { %v3527_v17 = vpop.permute.xlu1 %3526 }
 0x578   : > { %v3820_v26 = vsel %vm1830_vm10, %v3788_v42, %v3527_v17  ;;  %v3401_v40 = vpop.permute.xlu0 %3400 }
 0x579   : > { %4593 = vmatprep.mubr.msk.f32.mxu1 %vm1863_vm11, %v3820_v26  ;;  %v3789_v14 = vsel %vm1797_vm9, %v3757_v19, %v3401_v40 }
 0x57b   : > { %v3147_v20 = vpop.permute.xlu1 %3146 }
 0x57c   : > { %v3021_v41 = vpop.permute.xlu0 %3020  ;;  %v3726_v33 = vsel %vm1731_vm7, %v3694_v12, %v3147_v20  ;;  %v8140_v20 = vld [vmem:[#allocation98_spill] sm:$0xff] }
 0x57d   : > { %v4565_v2 = vpop.f32.mrb[6].mxu1  ;;  %v3695_v9 = vsel %vm1698_vm6, %v3663_v22, %v3021_v41  ;;  %v3600_v24 = vsel %vm171_vm0, %v2288_v43, %v8140_v20  ;;  %v8141_v41 = vld [vmem:[#allocation23_spill] sm:$0xff]  ;;  %v4199_v22 = vld [vmem:[%s4771_s18 + $0x88] sm:$0xff] }
 0x57e   : > { %v4157_v50 = vmul.f32 0.1, %v4565_v2  ;;  %v4021_v29 = vpop.f32.mrb[7].mxu1  ;;  %v3601_v34 = vsel %vm171_vm0, %v2289_v44, %v8141_v41  ;;  %v8142_v2 = vld [vmem:[#allocation31_spill] sm:$0xff] }
 0x57f   : > { %v4156_v61 = vmul.f32 0.1, %v4021_v29  ;;  %v3149_v30 = vpop.permute.xlu1 %3148 }
 0x580   : > { %v4221_v60 = vadd.f32 %v4189_v32, %v4157_v50  ;;  %v3529_v62 = vpop.permute.xlu0 %3528  ;;  %v3727_v42 = vsel %vm1731_vm7, %v3695_v9, %v3149_v30  ;;  %v3632_v32 = vsel %vm1632_vm4, %v3600_v24, %v8142_v2  ;;  %v8143_v50 = vld [vmem:[#allocation80_spill] sm:$0xff]  ;;  %v4198_v9 = vld [vmem:[%s4771_s18 + $0x80] sm:$0xff]  ;;  %v4203_v24 = vld [vmem:[%s4771_s18 + $0xa8] sm:$0xff] }
 0x581   : > { %v4220_v27 = vadd.f32 %v4188_v35, %v4156_v61  ;;  %v3821_v6 = vsel %vm1830_vm10, %v3789_v14, %v3529_v62  ;;  %v3633_v29 = vsel %vm1632_vm4, %v3601_v34, %v8143_v50  ;;  %v4202_v2 = vld [vmem:[%s4771_s18 + $0xa0] sm:$0xff] }
 0x582   : > { %4253 = vst.msk [vmem:[%s7393_s23 + $0x38] sm:$0xff] %vm171_vm0, %v4221_v60  ;;  %4594 = vmatmul.mubr.msk.f32.gmra.mrb[26].mxu1 %vm1863_vm11, %v3821_v6 }
 0x583   : > { %4252 = vst.msk [vmem:[%s7393_s23 + $0x30] sm:$0xff] %vm171_vm0, %v4220_v27  ;;  %v2895_v47 = vpop.permute.xlu1 %2894 }
 0x584   : > { %v3275_v54 = vpop.permute.xlu0 %3274  ;;  %v3664_v35 = vsel %vm1665_vm5, %v3632_v32, %v2895_v47 }
 0x585   : > { %v3758_v63 = vsel %vm1764_vm8, %v3726_v33, %v3275_v54 }
 0x587   : > { %v3403_v16 = vpop.permute.xlu1 %3402 }
 0x588   : > { %v3277_v28 = vpop.permute.xlu0 %3276  ;;  %v3790_v0 = vsel %vm1797_vm9, %v3758_v63, %v3403_v16 }
 0x589   : > { %v3759_v17 = vsel %vm1764_vm8, %v3727_v42, %v3277_v28 }
 0x58b   : > { %v3023_v56 = vpop.permute.xlu1 %3022 }
 0x58c   : > { %v2897_v46 = vpop.permute.xlu0 %2896  ;;  %v3696_v61 = vsel %vm1698_vm6, %v3664_v35, %v3023_v56  ;;  %v4192_v56 = vld [vmem:[%s4771_s18 + $0x50] sm:$0xff]  ;;  %v4205_v35 = vld [vmem:[%s4771_s18 + $0xb8] sm:$0xff] }
 0x58d   : > { %v3665_v30 = vsel %vm1665_vm5, %v3633_v29, %v2897_v46 }
 0x58f   : > { %v3531_v7 = vpop.permute.xlu1 %3530 }
 0x590   : > { %v3822_v52 = vsel %vm1830_vm10, %v3790_v0, %v3531_v7  ;;  %v3405_v25 = vpop.permute.xlu0 %3404  ;;  %v4195_v0 = vld [vmem:[%s4771_s18 + $0x68] sm:$0xff] }
 0x591   : > { %v4568_v57 = vpop.f32.mrb[8].mxu1  ;;  %4596 = vmatprep.mubr.msk.f32.mxu1 %vm1863_vm11, %v3822_v52  ;;  %v3791_v40 = vsel %vm1797_vm9, %v3759_v17, %v3405_v25  ;;  %v4194_v25 = vld [vmem:[%s4771_s18 + $0x60] sm:$0xff] }
 0x592   : > { %v4159_v53 = vmul.f32 0.1, %v4568_v57  ;;  %v4031_v3 = vpop.f32.mrb[9].mxu1 }
 0x593   : > { %v4158_v39 = vmul.f32 0.1, %v4031_v3  ;;  %v3151_v45 = vpop.permute.xlu1 %3150 }
 0x594   : > { %v4223_v58 = vadd.f32 %v4191_v4, %v4159_v53  ;;  %v3025_v48 = vpop.permute.xlu0 %3024  ;;  %v3728_v14 = vsel %vm1731_vm7, %v3696_v61, %v3151_v45 }
 0x595   : > { %v4222_v38 = vadd.f32 %v4190_v49, %v4158_v39  ;;  %v3697_v60 = vsel %vm1698_vm6, %v3665_v30, %v3025_v48  ;;  %v4196_v49 = vld [vmem:[%s4771_s18 + $0x70] sm:$0xff] }
 0x596   : > { %4255 = vst.msk [vmem:[%s7393_s23 + $0x48] sm:$0xff] %vm171_vm0, %v4223_v58  ;;  %v4204_v30 = vld [vmem:[%s4771_s18 + $0xb0] sm:$0xff] }
 0x597   : > { %4254 = vst.msk [vmem:[%s7393_s23 + $0x40] sm:$0xff] %vm171_vm0, %v4222_v38  ;;  %v3153_v26 = vpop.permute.xlu1 %3152 }
 0x598   : > { %v3533_v10 = vpop.permute.xlu0 %3532  ;;  %v3729_v62 = vsel %vm1731_vm7, %v3697_v60, %v3153_v26 }
 0x599   : > { %v3823_v21 = vsel %vm1830_vm10, %v3791_v40, %v3533_v10  ;;  %v4201_v40 = vld [vmem:[%s4771_s18 + $0x98] sm:$0xff] }
 0x59a   : > { %4597 = vmatmul.mubr.msk.f32.gmra.mrb[28].mxu1 %vm1863_vm11, %v3823_v21 }
 0x59b   : > { %v3281_v1 = vpop.permute.xlu1 %3280 }
 0x59c   : > { %v3279_v8 = vpop.permute.xlu0 %3278  ;;  %v3761_v54 = vsel %vm1764_vm8, %v3729_v62, %v3281_v1  ;;  %v4200_v1 = vld [vmem:[%s4771_s18 + $0x90] sm:$0xff] }
 0x59d   : > { %v3760_v27 = vsel %vm1764_vm8, %v3728_v14, %v3279_v8 }
 0x59f   : > { %v3409_v11 = vpop.permute.xlu1 %3408 }
 0x5a0   : > { %v3407_v19 = vpop.permute.xlu0 %3406  ;;  %v3793_v55 = vsel %vm1797_vm9, %v3761_v54, %v3409_v11 }
 0x5a1   : > { %v3792_v47 = vsel %vm1797_vm9, %v3760_v27, %v3407_v19 }
 0x5a3   : > { %v3537_v6 = vpop.permute.xlu1 %3536 }
 0x5a4   : > { %v3535_v16 = vpop.permute.xlu0 %3534  ;;  %v3825_v37 = vsel %vm1830_vm10, %v3793_v55, %v3537_v6  ;;  %v4207_v6 = vld [vmem:[%s4771_s18 + $0xc8] sm:$0xff] }
 0x5a5   : > { %v3824_v28 = vsel %vm1830_vm10, %v3792_v47, %v3535_v16  ;;  %v4571_v51 = vpop.f32.mrb[10].mxu1  ;;  %v4206_v16 = vld [vmem:[%s4771_s18 + $0xc0] sm:$0xff] }
 0x5a6   : > { %v4161_v36 = vmul.f32 0.1, %v4571_v51  ;;  %v4041_v59 = vpop.f32.mrb[11].mxu1  ;;  %4599 = vmatprep.mubr.msk.f32.mxu1 %vm1863_vm11, %v3824_v28 }
 0x5a7   : > { %v4160_v12 = vmul.f32 0.1, %v4041_v59  ;;  %4600 = vmatmul.mubr.msk.f32.gmra.mrb[30].mxu1 %vm1863_vm11, %v3825_v37  ;;  %v4209_v37 = vld [vmem:[%s4771_s18 + $0xd8] sm:$0xff] }
 0x5a8   : > { %v4225_v46 = vadd.f32 %v4193_v18, %v4161_v36 }
 0x5a9   : > { %v4224_v33 = vadd.f32 %v4192_v56, %v4160_v12  ;;  %v4208_v56 = vld [vmem:[%s4771_s18 + $0xd0] sm:$0xff] }
 0x5aa   : > { %4257 = vst.msk [vmem:[%s7393_s23 + $0x58] sm:$0xff] %vm171_vm0, %v4225_v46 }
 0x5ab   : > { %4256 = vst.msk [vmem:[%s7393_s23 + $0x50] sm:$0xff] %vm171_vm0, %v4224_v33 }
 0x5b9   : > { %v4574_v63 = vpop.f32.mrb[12].mxu1 }
 0x5ba   : > { %v4163_v7 = vmul.f32 0.1, %v4574_v63  ;;  %v4051_v52 = vpop.f32.mrb[13].mxu1 }
 0x5bb   : > { %v4162_v13 = vmul.f32 0.1, %v4051_v52 }
 0x5bc   : > { %v4227_v57 = vadd.f32 %v4195_v0, %v4163_v7  ;;  %v4211_v0 = vld [vmem:[%s4771_s18 + $0xe8] sm:$0xff] }
 0x5bd   : > { %v4226_v4 = vadd.f32 %v4194_v25, %v4162_v13  ;;  %v4210_v25 = vld [vmem:[%s4771_s18 + $0xe0] sm:$0xff] }
 0x5be   : > { %4259 = vst.msk [vmem:[%s7393_s23 + $0x68] sm:$0xff] %vm171_vm0, %v4227_v57 }
 0x5bf   : > { %4258 = vst.msk [vmem:[%s7393_s23 + $0x60] sm:$0xff] %vm171_vm0, %v4226_v4 }
 0x5cd   : > { %v4577_v31 = vpop.f32.mrb[14].mxu1 }
 0x5ce   : > { %v4165_v53 = vmul.f32 0.1, %v4577_v31  ;;  %v4061_v3 = vpop.f32.mrb[15].mxu1 }
 0x5cf   : > { %v4164_v15 = vmul.f32 0.1, %v4061_v3 }
 0x5d0   : > { %v4229_v23 = vadd.f32 %v4197_v5, %v4165_v53  ;;  %v4213_v5 = vld [vmem:[%s4771_s18 + $0xf8] sm:$0xff] }
 0x5d1   : > { %v4228_v39 = vadd.f32 %v4196_v49, %v4164_v15  ;;  %v4212_v49 = vld [vmem:[%s4771_s18 + $0xf0] sm:$0xff] }
 0x5d2   : > { %4261 = vst.msk [vmem:[%s7393_s23 + $0x78] sm:$0xff] %vm171_vm0, %v4229_v23 }
 0x5d3   : > { %4260 = vst.msk [vmem:[%s7393_s23 + $0x70] sm:$0xff] %vm171_vm0, %v4228_v39 }
 0x5e1   : > { %v4580_v45 = vpop.f32.mrb[16].mxu1 }
 0x5e2   : > { %v4167_v58 = vmul.f32 0.1, %v4580_v45  ;;  %v4071_v48 = vpop.f32.mrb[17].mxu1 }
 0x5e3   : > { %v4166_v38 = vmul.f32 0.1, %v4071_v48 }
 0x5e4   : > { %v4231_v42 = vadd.f32 %v4199_v22, %v4167_v58 }
 0x5e5   : > { %v4230_v17 = vadd.f32 %v4198_v9, %v4166_v38 }
 0x5e6   : > { %4263 = vst.msk [vmem:[%s7393_s23 + $0x88] sm:$0xff] %vm171_vm0, %v4231_v42 }
 0x5e7   : > { %4262 = vst.msk [vmem:[%s7393_s23 + $0x80] sm:$0xff] %vm171_vm0, %v4230_v17 }
 0x5f5   : > { %v4583_v26 = vpop.f32.mrb[18].mxu1 }
 0x5f6   : > { %v4169_v10 = vmul.f32 0.1, %v4583_v26  ;;  %v4081_v21 = vpop.f32.mrb[19].mxu1 }
 0x5f7   : > { %v4168_v8 = vmul.f32 0.1, %v4081_v21 }
 0x5f8   : > { %v4233_v43 = vadd.f32 %v4201_v40, %v4169_v10 }
 0x5f9   : > { %v4232_v44 = vadd.f32 %v4200_v1, %v4168_v8 }
 0x5fa   : > { %4265 = vst.msk [vmem:[%s7393_s23 + $0x98] sm:$0xff] %vm171_vm0, %v4233_v43 }
 0x5fb   : > { %4264 = vst.msk [vmem:[%s7393_s23 + $0x90] sm:$0xff] %vm171_vm0, %v4232_v44 }
 0x60d   : > { %v4586_v20 = vpop.f32.mrb[20].mxu1 }
 0x60e   : > { %v4171_v41 = vmul.f32 0.1, %v4586_v20  ;;  %v4091_v34 = vpop.f32.mrb[21].mxu1 }
 0x60f   : > { %v4170_v32 = vmul.f32 0.1, %v4091_v34 }
 0x610   : > { %v4235_v11 = vadd.f32 %v4203_v24, %v4171_v41 }
 0x611   : > { %v4234_v50 = vadd.f32 %v4202_v2, %v4170_v32 }
 0x612   : > { %4267 = vst.msk [vmem:[%s7393_s23 + $0xa8] sm:$0xff] %vm171_vm0, %v4235_v11 }
 0x613   : > { %4266 = vst.msk [vmem:[%s7393_s23 + $0xa0] sm:$0xff] %vm171_vm0, %v4234_v50 }
 0x625   : > { %v4589_v29 = vpop.f32.mrb[22].mxu1 }
 0x626   : > { %v4173_v19 = vmul.f32 0.1, %v4589_v29  ;;  %v4101_v61 = vpop.f32.mrb[23].mxu1 }
 0x627   : > { %v4172_v14 = vmul.f32 0.1, %v4101_v61 }
 0x628   : > { %v4237_v60 = vadd.f32 %v4205_v35, %v4173_v19 }
 0x629   : > { %v4236_v62 = vadd.f32 %v4204_v30, %v4172_v14 }
 0x62a   : > { %4269 = vst.msk [vmem:[%s7393_s23 + $0xb8] sm:$0xff] %vm171_vm0, %v4237_v60 }
 0x62b   : > { %4268 = vst.msk [vmem:[%s7393_s23 + $0xb0] sm:$0xff] %vm171_vm0, %v4236_v62 }
 0x63d   : > { %v4592_v27 = vpop.f32.mrb[24].mxu1 }
 0x63e   : > { %v4175_v54 = vmul.f32 0.1, %v4592_v27  ;;  %v4111_v47 = vpop.f32.mrb[25].mxu1 }
 0x63f   : > { %v4174_v55 = vmul.f32 0.1, %v4111_v47 }
 0x640   : > { %v4239_v28 = vadd.f32 %v4207_v6, %v4175_v54 }
 0x641   : > { %v4238_v51 = vadd.f32 %v4206_v16, %v4174_v55 }
 0x642   : > { %4271 = vst.msk [vmem:[%s7393_s23 + $0xc8] sm:$0xff] %vm171_vm0, %v4239_v28 }
 0x643   : > { %4270 = vst.msk [vmem:[%s7393_s23 + $0xc0] sm:$0xff] %vm171_vm0, %v4238_v51 }
 0x655   : > { %v4595_v18 = vpop.f32.mrb[26].mxu1 }
 0x656   : > { %v4177_v36 = vmul.f32 0.1, %v4595_v18  ;;  %v4121_v59 = vpop.f32.mrb[27].mxu1 }
 0x657   : > { %v4176_v12 = vmul.f32 0.1, %v4121_v59 }
 0x658   : > { %v4241_v46 = vadd.f32 %v4209_v37, %v4177_v36 }
 0x659   : > { %v4240_v33 = vadd.f32 %v4208_v56, %v4176_v12 }
 0x65a   : > { %4273 = vst.msk [vmem:[%s7393_s23 + $0xd8] sm:$0xff] %vm171_vm0, %v4241_v46 }
 0x65b   : > { %4272 = vst.msk [vmem:[%s7393_s23 + $0xd0] sm:$0xff] %vm171_vm0, %v4240_v33 }
 0x66d   : > { %v4598_v63 = vpop.f32.mrb[28].mxu1 }
 0x66e   : > { %v4179_v7 = vmul.f32 0.1, %v4598_v63  ;;  %v4131_v52 = vpop.f32.mrb[29].mxu1 }
 0x66f   : > { %v4178_v13 = vmul.f32 0.1, %v4131_v52 }
 0x670   : > { %v4243_v57 = vadd.f32 %v4211_v0, %v4179_v7 }
 0x671   : > { %v4242_v4 = vadd.f32 %v4210_v25, %v4178_v13 }
 0x672   : > { %4275 = vst.msk [vmem:[%s7393_s23 + $0xe8] sm:$0xff] %vm171_vm0, %v4243_v57 }
 0x673   : > { %4274 = vst.msk [vmem:[%s7393_s23 + $0xe0] sm:$0xff] %vm171_vm0, %v4242_v4 }
 0x67a   : > { %v4601_v31 = vpop.f32.mrb[30].mxu1 }
 0x67b   : > { %v4181_v53 = vmul.f32 0.1, %v4601_v31  ;;  %v4141_v3 = vpop.f32.mrb[31].mxu1 }
 0x67c   : > { %v4180_v15 = vmul.f32 0.1, %v4141_v3 }
 0x67d   : > { %v4245_v23 = vadd.f32 %v4213_v5, %v4181_v53 }
 0x67e   : > { %v4244_v39 = vadd.f32 %v4212_v49, %v4180_v15 }
 0x67f   : > { %4277 = vst.msk [vmem:[%s7393_s23 + $0xf8] sm:$0xff] %vm171_vm0, %v4245_v23 }
 0x680   : > { %4276 = vst.msk [vmem:[%s7393_s23 + $0xf0] sm:$0xff] %vm171_vm0, %v4244_v39 }
 0x681 PF: > { %s13_s12 = sadd.s32 1, %s4674_s12  }
 0x682   : > { %p10_p4 = scmp.ge.s32.totalorder %s13_s12, 4  }
 0x684   :  { %12 = sbr.rel (!%p10_p4) target bundleno = 1 (0x1), region = 65 }

</bundles_post_ra>
